<compile_context>
chip_gen: v7x
topology: tpu7x:2x2x1
jax: 0.10.0
libtpu: 0.0.40
codegen_flags: <defaults>
</compile_context>

<pallas_src>
import jax
import jax.numpy as jnp
from jax import lax
from jax.experimental import pallas as pl
from jax.experimental.pallas import tpu as pltpu

# ----------------------------- configuration --------------------------------
VOCAB = 50
EMB_DIM = 16
HIDDEN = 32
NUM_LAYERS = 2
BATCH = 2
SEQ = 8
NUM_CLASSES = 6
PADDING_IDX = 0
BN_EPS = 1e-5

H = HIDDEN
TB = SEQ * BATCH


# ------------------------------ fused kernel --------------------------------
def _fused_bilstm_kernel(tok_ref, emb_ref,
                         w0_ref, b0_ref, whh0f_ref, whh0b_ref,
                         w1_ref, b1_ref, whh1f_ref, whh1b_ref,
                         wcls_ref, bcls_ref,
                         o_ref,
                         hbuf):
    """Whole BiLSTM forward pass with all intermediates kept in VMEM.

    tok_ref : (T*B, 1) int32  token ids, t-major (row = t*B + b)
    emb_ref : (VOCAB, E)      embedding table
    w{l}    : (in_l, 8H)      [w_ih_fwd | w_ih_bwd] for layer l (pre-transposed)
    b{l}    : (1, 8H)         [b_ih+b_hh fwd | b_ih+b_hh bwd]
    whh{l}{f,b}: (H, 4H)      recurrent weights (pre-transposed)
    wcls    : (4H, 6), bcls: (1, 6)
    o_ref   : (B, 6)          sigmoid(classifier) output
    hbuf    : (T*B, 2H)       VMEM scratch holding layer-0 [h_fwd | h_bwd]
    Gate order follows PyTorch: i, f, g, o.
    """
    T, B = SEQ, BATCH
    f32 = jnp.float32

    # ---- embedding lookup via one-hot matmul (table is VMEM-resident) ----
    tok = tok_ref[...]                                                 # (T*B, 1)
    onehot = (tok == lax.broadcasted_iota(jnp.int32, (TB, VOCAB), 1)).astype(f32)
    x = jnp.dot(onehot, emb_ref[...], preferred_element_type=f32)      # (T*B, E)

    # ---- BatchNorm1d emulation on (T, B, E): channel = dim 1 (batch index),
    #      training-mode batch statistics, no affine.
    # TODO(synk): original module calls nn.BatchNorm1d() with no num_features,
    # which is invalid PyTorch; we emulate the implied normalization instead.
    bid = lax.broadcasted_iota(jnp.int32, (TB, 1), 0) % B              # row -> b
    rmean = jnp.mean(x, axis=1, keepdims=True)                         # (T*B, 1)
    rsq = jnp.mean(x * x, axis=1, keepdims=True)                       # (T*B, 1)
    mean_rows = jnp.zeros_like(rmean)
    sq_rows = jnp.zeros_like(rsq)
    for b in range(B):                                                 # B == 2
        mask = bid == b
        m_b = jnp.sum(jnp.where(mask, rmean, 0.0), axis=0, keepdims=True) / T
        s_b = jnp.sum(jnp.where(mask, rsq, 0.0), axis=0, keepdims=True) / T
        mean_rows = jnp.where(mask, m_b, mean_rows)
        sq_rows = jnp.where(mask, s_b, sq_rows)
    var_rows = sq_rows - mean_rows * mean_rows
    x = (x - mean_rows) * lax.rsqrt(var_rows + BN_EPS)                 # (T*B, E)

    # ---- one LSTM direction: statically unrolled recurrence ----
    def run_direction(gin, whh, reverse, col_off=None):
        # gin: (T*B, 4H) hoisted input projections with bias already added.
        h = jnp.zeros((B, H), f32)
        c = jnp.zeros((B, H), f32)
        order = range(T - 1, -1, -1) if reverse else range(T)
        for t in order:
            g = gin[t * B:(t + 1) * B, :] + jnp.dot(
                h, whh, preferred_element_type=f32)                    # (B, 4H)
            sg = jax.nn.sigmoid(g)      # full-vreg EUP
            th = jnp.tanh(g)            # full-vreg EUP
            i_g = sg[:, 0:H]
            f_g = sg[:, H:2 * H]
            g_g = th[:, 2 * H:3 * H]
            o_g = sg[:, 3 * H:4 * H]
            c = f_g * c + i_g * g_g
            h = o_g * jnp.tanh(c)
            if col_off is not None:     # store per-step hidden (layer 0 only)
                hbuf[t * B:(t + 1) * B, col_off:col_off + H] = h
        return c

    # ---- layer 0: one projection matmul feeds both directions ----
    gin0 = jnp.dot(x, w0_ref[...], preferred_element_type=f32) + b0_ref[...]
    c_f0 = run_direction(gin0[:, 0:4 * H], whh0f_ref[...], reverse=False, col_off=0)
    c_b0 = run_direction(gin0[:, 4 * H:8 * H], whh0b_ref[...], reverse=True, col_off=H)

    # ---- layer 1 (input = layer-0 [h_fwd | h_bwd] straight from scratch) ----
    # inter-layer dropout is identity in inference mode.
    gin1 = jnp.dot(hbuf[...], w1_ref[...], preferred_element_type=f32) + b1_ref[...]
    c_f1 = run_direction(gin1[:, 0:4 * H], whh1f_ref[...], reverse=False)
    c_b1 = run_direction(gin1[:, 4 * H:8 * H], whh1b_ref[...], reverse=True)

    # ---- torch.cat([c_n[i] for i in range(4)], dim=1): (B, 4H = 128 lanes) ----
    cat = jnp.concatenate([c_f0, c_b0, c_f1, c_b1], axis=1)

    # ---- dropout (identity, eval) -> Linear -> sigmoid ----
    logits = jnp.dot(cat, wcls_ref[...], preferred_element_type=f32) + bcls_ref[...]
    o_ref[...] = jax.nn.sigmoid(logits)


# ------------------------------ wrapper --------------------------------------
_VMEM = pl.BlockSpec(memory_space=pltpu.MemorySpace.VMEM)


def bilstm_pallas(tok_flat, params):
    return pl.pallas_call(
        _fused_bilstm_kernel,
        out_shape=jax.ShapeDtypeStruct((BATCH, NUM_CLASSES), jnp.float32),
        in_specs=[_VMEM] * 12,
        out_specs=_VMEM,
        scratch_shapes=[pltpu.VMEM((TB, 2 * H), jnp.float32)],
    )(tok_flat, params["embedding"],
      params["w0"], params["b0"], params["whh0f"], params["whh0b"],
      params["w1"], params["b1"], params["whh1f"], params["whh1b"],
      params["w_cls"], params["b_cls"])


@jax.jit
def bilstm_forward(tokens, params):
    # (B, T) token ids -> t-major flat (T*B, 1); everything else is in-kernel.
    tok_flat = jnp.transpose(tokens).reshape(SEQ * BATCH, 1)
    return bilstm_pallas(tok_flat, params)


# ------------------------------ parameter setup ------------------------------
def init_params(key):
    ks = jax.random.split(key, 32)
    it = iter(ks)
    params = {}

    # "pretrained" embedding table; padding row kept at zero like a typical LM.
    emb = jax.random.normal(next(it), (VOCAB, EMB_DIM), dtype=jnp.float32) * 0.1
    params["embedding"] = emb.at[PADDING_IDX].set(0.0)

    bound = 1.0 / (HIDDEN ** 0.5)

    def u(k, shape):
        return jax.random.uniform(k, shape, jnp.float32, -bound, bound)

    for layer in range(NUM_LAYERS):
        in_dim = EMB_DIM if layer == 0 else 2 * HIDDEN
        wih, bias, whh = [], [], []
        for _direction in range(2):                     # fwd, bwd
            w_ih = u(next(it), (in_dim, 4 * HIDDEN))    # pre-transposed
            w_hh = u(next(it), (HIDDEN, 4 * HIDDEN))    # pre-transposed
            b_ih = u(next(it), (1, 4 * HIDDEN))
            b_hh = u(next(it), (1, 4 * HIDDEN))
            wih.append(w_ih)
            bias.append(b_ih + b_hh)
            whh.append(w_hh)
        params[f"w{layer}"] = jnp.concatenate(wih, axis=1)    # (in, 8H)
        params[f"b{layer}"] = jnp.concatenate(bias, axis=1)   # (1, 8H)
        params[f"whh{layer}f"] = whh[0]
        params[f"whh{layer}b"] = whh[1]

    cls_in = HIDDEN * NUM_LAYERS * 2
    cb = 1.0 / (cls_in ** 0.5)
    params["w_cls"] = jax.random.uniform(next(it), (cls_in, NUM_CLASSES),
                                         jnp.float32, -cb, cb)
    params["b_cls"] = jax.random.uniform(next(it), (1, NUM_CLASSES),
                                         jnp.float32, -cb, cb)
    return params


# ----------------------------------- main ------------------------------------
if __name__ == "__main__":
    key = jax.random.PRNGKey(0)
    k_param, k_tok = jax.random.split(key)
    params = init_params(k_param)

    # token ids, shape (batch, seq) as implied by the embedding lookup
    tokens = jax.random.randint(k_tok, (BATCH, SEQ), 0, VOCAB, dtype=jnp.int32)

    out = jax.block_until_ready(bilstm_forward(tokens, params))

    assert out.shape == (BATCH, NUM_CLASSES)
    assert bool(jnp.all(jnp.isfinite(out)))
    assert bool(jnp.all((out >= 0.0) & (out <= 1.0)))
    print("KERNEL_OK")
</pallas_src>

<mosaic_0001>
module attributes {stable_mosaic.version = 11 : i64} {
  func.func @_fused_bilstm_kernel(%arg0: memref<16x1xi32, #tpu.memory_space<vmem>>, %arg1: memref<50x16xf32, #tpu.memory_space<vmem>>, %arg2: memref<16x256xf32, #tpu.memory_space<vmem>>, %arg3: memref<1x256xf32, #tpu.memory_space<vmem>>, %arg4: memref<32x128xf32, #tpu.memory_space<vmem>>, %arg5: memref<32x128xf32, #tpu.memory_space<vmem>>, %arg6: memref<64x256xf32, #tpu.memory_space<vmem>>, %arg7: memref<1x256xf32, #tpu.memory_space<vmem>>, %arg8: memref<32x128xf32, #tpu.memory_space<vmem>>, %arg9: memref<32x128xf32, #tpu.memory_space<vmem>>, %arg10: memref<128x6xf32, #tpu.memory_space<vmem>>, %arg11: memref<1x6xf32, #tpu.memory_space<vmem>>, %arg12: memref<2x6xf32, #tpu.memory_space<vmem>>, %arg13: memref<16x64xf32, #tpu.memory_space<vmem>>) attributes {dimension_semantics = [], scalar_prefetch = 0 : i64, scratch_operands = 1 : i64, tpu.core_type = #tpu.core_type<tc>} {
    %c0 = arith.constant 0 : index
    %c0_0 = arith.constant 0 : index
    %0 = vector.load %arg0[%c0, %c0_0] : memref<16x1xi32, #tpu.memory_space<vmem>>, vector<16x1xi32>
    %1 = tpu.iota {dimensions = array<i32: 1>} : vector<16x50xi32>
    %2 = vector.broadcast %0 : vector<16x1xi32> to vector<16x50xi32>
    %3 = arith.cmpi eq, %2, %1 : vector<16x50xi32>
    %4 = arith.extui %3 : vector<16x50xi1> to vector<16x50xi32>
    %5 = arith.sitofp %4 : vector<16x50xi32> to vector<16x50xf32>
    %c0_1 = arith.constant 0 : index
    %c0_2 = arith.constant 0 : index
    %6 = vector.load %arg1[%c0_1, %c0_2] : memref<50x16xf32, #tpu.memory_space<vmem>>, vector<50x16xf32>
    %cst = arith.constant dense<0.000000e+00> : vector<16x16xf32>
    %7 = tpu.matmul %5, %6, %cst {dimension_numbers = #tpu.dot_dimension_numbers<[1], [0], [0], [1], [0, 0, 1, 1], [], []>} : vector<16x50xf32>, vector<50x16xf32>, vector<16x16xf32> -> vector<16x16xf32>
    %8 = tpu.iota {dimensions = array<i32: 0>} : vector<16x1xi32>
    %c2_i32 = arith.constant 2 : i32
    %c0_i32 = arith.constant 0 : i32
    %9 = arith.cmpi eq, %c2_i32, %c0_i32 : i32
    %c1_i32 = arith.constant 1 : i32
    %10 = arith.select %9, %c1_i32, %c2_i32 : i32
    %11 = vector.broadcast %10 : i32 to vector<16x1xi32>
    %12 = arith.remsi %8, %11 : vector<16x1xi32>
    %c0_i32_3 = arith.constant 0 : i32
    %13 = vector.broadcast %c0_i32_3 : i32 to vector<16x1xi32>
    %14 = arith.cmpi ne, %12, %13 : vector<16x1xi32>
    %c0_i32_4 = arith.constant 0 : i32
    %15 = vector.broadcast %c0_i32_4 : i32 to vector<16x1xi32>
    %16 = arith.cmpi slt, %12, %15 : vector<16x1xi32>
    %c0_i32_5 = arith.constant 0 : i32
    %17 = arith.cmpi slt, %10, %c0_i32_5 : i32
    %18 = vector.broadcast %17 : i1 to vector<16x1xi1>
    %19 = vector.broadcast %18 : vector<16x1xi1> to vector<16x1xi1>
    %20 = arith.xori %16, %19 : vector<16x1xi1>
    %21 = arith.andi %20, %14 : vector<16x1xi1>
    %22 = vector.broadcast %10 : i32 to vector<16x1xi32>
    %23 = arith.addi %12, %22 : vector<16x1xi32>
    %24 = arith.select %21, %23, %12 : vector<16x1xi1>, vector<16x1xi32>
    %cst_6 = arith.constant dense<0.000000e+00> : vector<16xf32>
    %25 = vector.multi_reduction <add>, %7, %cst_6 [1] : vector<16x16xf32> to vector<16xf32>
    %26 = vector.shape_cast %25 : vector<16xf32> to vector<16x1xf32>
    %cst_7 = arith.constant 1.600000e+01 : f32
    %27 = vector.broadcast %cst_7 : f32 to vector<16x1xf32>
    %28 = arith.divf %26, %27 : vector<16x1xf32>
    %29 = arith.mulf %7, %7 : vector<16x16xf32>
    %cst_8 = arith.constant dense<0.000000e+00> : vector<16xf32>
    %30 = vector.multi_reduction <add>, %29, %cst_8 [1] : vector<16x16xf32> to vector<16xf32>
    %31 = vector.shape_cast %30 : vector<16xf32> to vector<16x1xf32>
    %cst_9 = arith.constant 1.600000e+01 : f32
    %32 = vector.broadcast %cst_9 : f32 to vector<16x1xf32>
    %33 = arith.divf %31, %32 : vector<16x1xf32>
    %cst_10 = arith.constant 0.000000e+00 : f32
    %34 = vector.broadcast %cst_10 : f32 to vector<16x1xf32>
    %cst_11 = arith.constant 0.000000e+00 : f32
    %35 = vector.broadcast %cst_11 : f32 to vector<16x1xf32>
    %c0_i32_12 = arith.constant 0 : i32
    %36 = vector.broadcast %c0_i32_12 : i32 to vector<16x1xi32>
    %37 = arith.cmpi eq, %24, %36 : vector<16x1xi32>
    %cst_13 = arith.constant 0.000000e+00 : f32
    %38 = vector.broadcast %cst_13 : f32 to vector<16x1xf32>
    %39 = arith.select %37, %28, %38 : vector<16x1xi1>, vector<16x1xf32>
    %cst_14 = arith.constant dense<0.000000e+00> : vector<1xf32>
    %40 = vector.multi_reduction <add>, %39, %cst_14 [0] : vector<16x1xf32> to vector<1xf32>
    %41 = vector.shape_cast %40 : vector<1xf32> to vector<1x1xf32>
    %cst_15 = arith.constant 8.000000e+00 : f32
    %42 = vector.broadcast %cst_15 : f32 to vector<1x1xf32>
    %43 = arith.divf %41, %42 : vector<1x1xf32>
    %cst_16 = arith.constant 0.000000e+00 : f32
    %44 = vector.broadcast %cst_16 : f32 to vector<16x1xf32>
    %45 = arith.select %37, %33, %44 : vector<16x1xi1>, vector<16x1xf32>
    %cst_17 = arith.constant dense<0.000000e+00> : vector<1xf32>
    %46 = vector.multi_reduction <add>, %45, %cst_17 [0] : vector<16x1xf32> to vector<1xf32>
    %47 = vector.shape_cast %46 : vector<1xf32> to vector<1x1xf32>
    %cst_18 = arith.constant 8.000000e+00 : f32
    %48 = vector.broadcast %cst_18 : f32 to vector<1x1xf32>
    %49 = arith.divf %47, %48 : vector<1x1xf32>
    %50 = vector.shape_cast %43 : vector<1x1xf32> to vector<1x1xf32>
    %51 = vector.broadcast %50 : vector<1x1xf32> to vector<16x1xf32>
    %52 = arith.select %37, %51, %34 : vector<16x1xi1>, vector<16x1xf32>
    %53 = vector.shape_cast %49 : vector<1x1xf32> to vector<1x1xf32>
    %54 = vector.broadcast %53 : vector<1x1xf32> to vector<16x1xf32>
    %55 = arith.select %37, %54, %35 : vector<16x1xi1>, vector<16x1xf32>
    %c1_i32_19 = arith.constant 1 : i32
    %56 = vector.broadcast %c1_i32_19 : i32 to vector<16x1xi32>
    %57 = arith.cmpi eq, %24, %56 : vector<16x1xi32>
    %cst_20 = arith.constant 0.000000e+00 : f32
    %58 = vector.broadcast %cst_20 : f32 to vector<16x1xf32>
    %59 = arith.select %57, %28, %58 : vector<16x1xi1>, vector<16x1xf32>
    %cst_21 = arith.constant dense<0.000000e+00> : vector<1xf32>
    %60 = vector.multi_reduction <add>, %59, %cst_21 [0] : vector<16x1xf32> to vector<1xf32>
    %61 = vector.shape_cast %60 : vector<1xf32> to vector<1x1xf32>
    %cst_22 = arith.constant 8.000000e+00 : f32
    %62 = vector.broadcast %cst_22 : f32 to vector<1x1xf32>
    %63 = arith.divf %61, %62 : vector<1x1xf32>
    %cst_23 = arith.constant 0.000000e+00 : f32
    %64 = vector.broadcast %cst_23 : f32 to vector<16x1xf32>
    %65 = arith.select %57, %33, %64 : vector<16x1xi1>, vector<16x1xf32>
    %cst_24 = arith.constant dense<0.000000e+00> : vector<1xf32>
    %66 = vector.multi_reduction <add>, %65, %cst_24 [0] : vector<16x1xf32> to vector<1xf32>
    %67 = vector.shape_cast %66 : vector<1xf32> to vector<1x1xf32>
    %cst_25 = arith.constant 8.000000e+00 : f32
    %68 = vector.broadcast %cst_25 : f32 to vector<1x1xf32>
    %69 = arith.divf %67, %68 : vector<1x1xf32>
    %70 = vector.shape_cast %63 : vector<1x1xf32> to vector<1x1xf32>
    %71 = vector.broadcast %70 : vector<1x1xf32> to vector<16x1xf32>
    %72 = arith.select %57, %71, %52 : vector<16x1xi1>, vector<16x1xf32>
    %73 = vector.shape_cast %69 : vector<1x1xf32> to vector<1x1xf32>
    %74 = vector.broadcast %73 : vector<1x1xf32> to vector<16x1xf32>
    %75 = arith.select %57, %74, %55 : vector<16x1xi1>, vector<16x1xf32>
    %76 = arith.mulf %72, %72 : vector<16x1xf32>
    %77 = arith.subf %75, %76 : vector<16x1xf32>
    %78 = vector.broadcast %72 : vector<16x1xf32> to vector<16x16xf32>
    %79 = arith.subf %7, %78 : vector<16x16xf32>
    %cst_26 = arith.constant 9.99999974E-6 : f32
    %80 = vector.broadcast %cst_26 : f32 to vector<16x1xf32>
    %81 = arith.addf %77, %80 : vector<16x1xf32>
    %82 = math.rsqrt %81 : vector<16x1xf32>
    %83 = vector.broadcast %82 : vector<16x1xf32> to vector<16x16xf32>
    %84 = arith.mulf %79, %83 : vector<16x16xf32>
    %c0_27 = arith.constant 0 : index
    %c0_28 = arith.constant 0 : index
    %85 = vector.load %arg2[%c0_27, %c0_28] : memref<16x256xf32, #tpu.memory_space<vmem>>, vector<16x256xf32>
    %cst_29 = arith.constant dense<0.000000e+00> : vector<16x256xf32>
    %86 = tpu.matmul %84, %85, %cst_29 {dimension_numbers = #tpu.dot_dimension_numbers<[1], [0], [0], [1], [0, 0, 1, 1], [], []>} : vector<16x16xf32>, vector<16x256xf32>, vector<16x256xf32> -> vector<16x256xf32>
    %c0_30 = arith.constant 0 : index
    %c0_31 = arith.constant 0 : index
    %87 = vector.load %arg3[%c0_30, %c0_31] : memref<1x256xf32, #tpu.memory_space<vmem>>, vector<1x256xf32>
    %88 = vector.broadcast %87 : vector<1x256xf32> to vector<16x256xf32>
    %89 = arith.addf %86, %88 : vector<16x256xf32>
    %90 = vector.extract_strided_slice %89 {offsets = [0, 0], sizes = [16, 128], strides = [1, 1]} : vector<16x256xf32> to vector<16x128xf32>
    %c0_32 = arith.constant 0 : index
    %c0_33 = arith.constant 0 : index
    %91 = vector.load %arg4[%c0_32, %c0_33] : memref<32x128xf32, #tpu.memory_space<vmem>>, vector<32x128xf32>
    %cst_34 = arith.constant 0.000000e+00 : f32
    %92 = vector.broadcast %cst_34 : f32 to vector<2x32xf32>
    %cst_35 = arith.constant 0.000000e+00 : f32
    %93 = vector.broadcast %cst_35 : f32 to vector<2x32xf32>
    %94 = vector.extract_strided_slice %90 {offsets = [0, 0], sizes = [2, 128], strides = [1, 1]} : vector<16x128xf32> to vector<2x128xf32>
    %cst_36 = arith.constant dense<0.000000e+00> : vector<2x128xf32>
    %95 = tpu.matmul %92, %91, %cst_36 {dimension_numbers = #tpu.dot_dimension_numbers<[1], [0], [0], [1], [0, 0, 1, 1], [], []>} : vector<2x32xf32>, vector<32x128xf32>, vector<2x128xf32> -> vector<2x128xf32>
    %96 = arith.addf %94, %95 : vector<2x128xf32>
    %97 = arith.negf %96 : vector<2x128xf32>
    %98 = math.exp %97 : vector<2x128xf32>
    %cst_37 = arith.constant 1.000000e+00 : f32
    %99 = vector.broadcast %cst_37 : f32 to vector<2x128xf32>
    %100 = arith.addf %99, %98 : vector<2x128xf32>
    %101 = arith.divf %99, %100 : vector<2x128xf32>
    %102 = math.tanh %96 : vector<2x128xf32>
    %103 = vector.extract_strided_slice %101 {offsets = [0, 0], sizes = [2, 32], strides = [1, 1]} : vector<2x128xf32> to vector<2x32xf32>
    %104 = vector.extract_strided_slice %101 {offsets = [0, 32], sizes = [2, 32], strides = [1, 1]} : vector<2x128xf32> to vector<2x32xf32>
    %105 = vector.extract_strided_slice %102 {offsets = [0, 64], sizes = [2, 32], strides = [1, 1]} : vector<2x128xf32> to vector<2x32xf32>
    %106 = vector.extract_strided_slice %101 {offsets = [0, 96], sizes = [2, 32], strides = [1, 1]} : vector<2x128xf32> to vector<2x32xf32>
    %107 = arith.mulf %104, %93 : vector<2x32xf32>
    %108 = arith.mulf %103, %105 : vector<2x32xf32>
    %109 = arith.addf %107, %108 : vector<2x32xf32>
    %110 = math.tanh %109 : vector<2x32xf32>
    %111 = arith.mulf %106, %110 : vector<2x32xf32>
    %c0_38 = arith.constant 0 : index
    %c0_39 = arith.constant 0 : index
    %112 = vector.load %arg13[%c0_38, %c0_39] : memref<16x64xf32, #tpu.memory_space<vmem>>, vector<2x32xf32>
    tpu.vector_store %arg13[%c0_38, %c0_39], %111 {strides = array<i32>} : memref<16x64xf32, #tpu.memory_space<vmem>>, vector<2x32xf32>,
    %113 = vector.extract_strided_slice %90 {offsets = [2, 0], sizes = [2, 128], strides = [1, 1]} : vector<16x128xf32> to vector<2x128xf32>
    %cst_40 = arith.constant dense<0.000000e+00> : vector<2x128xf32>
    %114 = tpu.matmul %111, %91, %cst_40 {dimension_numbers = #tpu.dot_dimension_numbers<[1], [0], [0], [1], [0, 0, 1, 1], [], []>} : vector<2x32xf32>, vector<32x128xf32>, vector<2x128xf32> -> vector<2x128xf32>
    %115 = arith.addf %113, %114 : vector<2x128xf32>
    %116 = arith.negf %115 : vector<2x128xf32>
    %117 = math.exp %116 : vector<2x128xf32>
    %cst_41 = arith.constant 1.000000e+00 : f32
    %118 = vector.broadcast %cst_41 : f32 to vector<2x128xf32>
    %119 = arith.addf %118, %117 : vector<2x128xf32>
    %120 = arith.divf %118, %119 : vector<2x128xf32>
    %121 = math.tanh %115 : vector<2x128xf32>
    %122 = vector.extract_strided_slice %120 {offsets = [0, 0], sizes = [2, 32], strides = [1, 1]} : vector<2x128xf32> to vector<2x32xf32>
    %123 = vector.extract_strided_slice %120 {offsets = [0, 32], sizes = [2, 32], strides = [1, 1]} : vector<2x128xf32> to vector<2x32xf32>
    %124 = vector.extract_strided_slice %121 {offsets = [0, 64], sizes = [2, 32], strides = [1, 1]} : vector<2x128xf32> to vector<2x32xf32>
    %125 = vector.extract_strided_slice %120 {offsets = [0, 96], sizes = [2, 32], strides = [1, 1]} : vector<2x128xf32> to vector<2x32xf32>
    %126 = arith.mulf %123, %109 : vector<2x32xf32>
    %127 = arith.mulf %122, %124 : vector<2x32xf32>
    %128 = arith.addf %126, %127 : vector<2x32xf32>
    %129 = math.tanh %128 : vector<2x32xf32>
    %130 = arith.mulf %125, %129 : vector<2x32xf32>
    %c2 = arith.constant 2 : index
    %c0_42 = arith.constant 0 : index
    %131 = vector.load %arg13[%c2, %c0_42] : memref<16x64xf32, #tpu.memory_space<vmem>>, vector<2x32xf32>
    tpu.vector_store %arg13[%c2, %c0_42], %130 {strides = array<i32>} : memref<16x64xf32, #tpu.memory_space<vmem>>, vector<2x32xf32>,
    %132 = vector.extract_strided_slice %90 {offsets = [4, 0], sizes = [2, 128], strides = [1, 1]} : vector<16x128xf32> to vector<2x128xf32>
    %cst_43 = arith.constant dense<0.000000e+00> : vector<2x128xf32>
    %133 = tpu.matmul %130, %91, %cst_43 {dimension_numbers = #tpu.dot_dimension_numbers<[1], [0], [0], [1], [0, 0, 1, 1], [], []>} : vector<2x32xf32>, vector<32x128xf32>, vector<2x128xf32> -> vector<2x128xf32>
    %134 = arith.addf %132, %133 : vector<2x128xf32>
    %135 = arith.negf %134 : vector<2x128xf32>
    %136 = math.exp %135 : vector<2x128xf32>
    %cst_44 = arith.constant 1.000000e+00 : f32
    %137 = vector.broadcast %cst_44 : f32 to vector<2x128xf32>
    %138 = arith.addf %137, %136 : vector<2x128xf32>
    %139 = arith.divf %137, %138 : vector<2x128xf32>
    %140 = math.tanh %134 : vector<2x128xf32>
    %141 = vector.extract_strided_slice %139 {offsets = [0, 0], sizes = [2, 32], strides = [1, 1]} : vector<2x128xf32> to vector<2x32xf32>
    %142 = vector.extract_strided_slice %139 {offsets = [0, 32], sizes = [2, 32], strides = [1, 1]} : vector<2x128xf32> to vector<2x32xf32>
    %143 = vector.extract_strided_slice %140 {offsets = [0, 64], sizes = [2, 32], strides = [1, 1]} : vector<2x128xf32> to vector<2x32xf32>
    %144 = vector.extract_strided_slice %139 {offsets = [0, 96], sizes = [2, 32], strides = [1, 1]} : vector<2x128xf32> to vector<2x32xf32>
    %145 = arith.mulf %142, %128 : vector<2x32xf32>
    %146 = arith.mulf %141, %143 : vector<2x32xf32>
    %147 = arith.addf %145, %146 : vector<2x32xf32>
    %148 = math.tanh %147 : vector<2x32xf32>
    %149 = arith.mulf %144, %148 : vector<2x32xf32>
    %c4 = arith.constant 4 : index
    %c0_45 = arith.constant 0 : index
    %150 = vector.load %arg13[%c4, %c0_45] : memref<16x64xf32, #tpu.memory_space<vmem>>, vector<2x32xf32>
    tpu.vector_store %arg13[%c4, %c0_45], %149 {strides = array<i32>} : memref<16x64xf32, #tpu.memory_space<vmem>>, vector<2x32xf32>,
    %151 = vector.extract_strided_slice %90 {offsets = [6, 0], sizes = [2, 128], strides = [1, 1]} : vector<16x128xf32> to vector<2x128xf32>
    %cst_46 = arith.constant dense<0.000000e+00> : vector<2x128xf32>
    %152 = tpu.matmul %149, %91, %cst_46 {dimension_numbers = #tpu.dot_dimension_numbers<[1], [0], [0], [1], [0, 0, 1, 1], [], []>} : vector<2x32xf32>, vector<32x128xf32>, vector<2x128xf32> -> vector<2x128xf32>
    %153 = arith.addf %151, %152 : vector<2x128xf32>
    %154 = arith.negf %153 : vector<2x128xf32>
    %155 = math.exp %154 : vector<2x128xf32>
    %cst_47 = arith.constant 1.000000e+00 : f32
    %156 = vector.broadcast %cst_47 : f32 to vector<2x128xf32>
    %157 = arith.addf %156, %155 : vector<2x128xf32>
    %158 = arith.divf %156, %157 : vector<2x128xf32>
    %159 = math.tanh %153 : vector<2x128xf32>
    %160 = vector.extract_strided_slice %158 {offsets = [0, 0], sizes = [2, 32], strides = [1, 1]} : vector<2x128xf32> to vector<2x32xf32>
    %161 = vector.extract_strided_slice %158 {offsets = [0, 32], sizes = [2, 32], strides = [1, 1]} : vector<2x128xf32> to vector<2x32xf32>
    %162 = vector.extract_strided_slice %159 {offsets = [0, 64], sizes = [2, 32], strides = [1, 1]} : vector<2x128xf32> to vector<2x32xf32>
    %163 = vector.extract_strided_slice %158 {offsets = [0, 96], sizes = [2, 32], strides = [1, 1]} : vector<2x128xf32> to vector<2x32xf32>
    %164 = arith.mulf %161, %147 : vector<2x32xf32>
    %165 = arith.mulf %160, %162 : vector<2x32xf32>
    %166 = arith.addf %164, %165 : vector<2x32xf32>
    %167 = math.tanh %166 : vector<2x32xf32>
    %168 = arith.mulf %163, %167 : vector<2x32xf32>
    %c6 = arith.constant 6 : index
    %c0_48 = arith.constant 0 : index
    %169 = vector.load %arg13[%c6, %c0_48] : memref<16x64xf32, #tpu.memory_space<vmem>>, vector<2x32xf32>
    tpu.vector_store %arg13[%c6, %c0_48], %168 {strides = array<i32>} : memref<16x64xf32, #tpu.memory_space<vmem>>, vector<2x32xf32>,
    %170 = vector.extract_strided_slice %90 {offsets = [8, 0], sizes = [2, 128], strides = [1, 1]} : vector<16x128xf32> to vector<2x128xf32>
    %cst_49 = arith.constant dense<0.000000e+00> : vector<2x128xf32>
    %171 = tpu.matmul %168, %91, %cst_49 {dimension_numbers = #tpu.dot_dimension_numbers<[1], [0], [0], [1], [0, 0, 1, 1], [], []>} : vector<2x32xf32>, vector<32x128xf32>, vector<2x128xf32> -> vector<2x128xf32>
    %172 = arith.addf %170, %171 : vector<2x128xf32>
    %173 = arith.negf %172 : vector<2x128xf32>
    %174 = math.exp %173 : vector<2x128xf32>
    %cst_50 = arith.constant 1.000000e+00 : f32
    %175 = vector.broadcast %cst_50 : f32 to vector<2x128xf32>
    %176 = arith.addf %175, %174 : vector<2x128xf32>
    %177 = arith.divf %175, %176 : vector<2x128xf32>
    %178 = math.tanh %172 : vector<2x128xf32>
    %179 = vector.extract_strided_slice %177 {offsets = [0, 0], sizes = [2, 32], strides = [1, 1]} : vector<2x128xf32> to vector<2x32xf32>
    %180 = vector.extract_strided_slice %177 {offsets = [0, 32], sizes = [2, 32], strides = [1, 1]} : vector<2x128xf32> to vector<2x32xf32>
    %181 = vector.extract_strided_slice %178 {offsets = [0, 64], sizes = [2, 32], strides = [1, 1]} : vector<2x128xf32> to vector<2x32xf32>
    %182 = vector.extract_strided_slice %177 {offsets = [0, 96], sizes = [2, 32], strides = [1, 1]} : vector<2x128xf32> to vector<2x32xf32>
    %183 = arith.mulf %180, %166 : vector<2x32xf32>
    %184 = arith.mulf %179, %181 : vector<2x32xf32>
    %185 = arith.addf %183, %184 : vector<2x32xf32>
    %186 = math.tanh %185 : vector<2x32xf32>
    %187 = arith.mulf %182, %186 : vector<2x32xf32>
    %c8 = arith.constant 8 : index
    %c0_51 = arith.constant 0 : index
    %188 = vector.load %arg13[%c8, %c0_51] : memref<16x64xf32, #tpu.memory_space<vmem>>, vector<2x32xf32>
    tpu.vector_store %arg13[%c8, %c0_51], %187 {strides = array<i32>} : memref<16x64xf32, #tpu.memory_space<vmem>>, vector<2x32xf32>,
    %189 = vector.extract_strided_slice %90 {offsets = [10, 0], sizes = [2, 128], strides = [1, 1]} : vector<16x128xf32> to vector<2x128xf32>
    %cst_52 = arith.constant dense<0.000000e+00> : vector<2x128xf32>
    %190 = tpu.matmul %187, %91, %cst_52 {dimension_numbers = #tpu.dot_dimension_numbers<[1], [0], [0], [1], [0, 0, 1, 1], [], []>} : vector<2x32xf32>, vector<32x128xf32>, vector<2x128xf32> -> vector<2x128xf32>
    %191 = arith.addf %189, %190 : vector<2x128xf32>
    %192 = arith.negf %191 : vector<2x128xf32>
    %193 = math.exp %192 : vector<2x128xf32>
    %cst_53 = arith.constant 1.000000e+00 : f32
    %194 = vector.broadcast %cst_53 : f32 to vector<2x128xf32>
    %195 = arith.addf %194, %193 : vector<2x128xf32>
    %196 = arith.divf %194, %195 : vector<2x128xf32>
    %197 = math.tanh %191 : vector<2x128xf32>
    %198 = vector.extract_strided_slice %196 {offsets = [0, 0], sizes = [2, 32], strides = [1, 1]} : vector<2x128xf32> to vector<2x32xf32>
    %199 = vector.extract_strided_slice %196 {offsets = [0, 32], sizes = [2, 32], strides = [1, 1]} : vector<2x128xf32> to vector<2x32xf32>
    %200 = vector.extract_strided_slice %197 {offsets = [0, 64], sizes = [2, 32], strides = [1, 1]} : vector<2x128xf32> to vector<2x32xf32>
    %201 = vector.extract_strided_slice %196 {offsets = [0, 96], sizes = [2, 32], strides = [1, 1]} : vector<2x128xf32> to vector<2x32xf32>
    %202 = arith.mulf %199, %185 : vector<2x32xf32>
    %203 = arith.mulf %198, %200 : vector<2x32xf32>
    %204 = arith.addf %202, %203 : vector<2x32xf32>
    %205 = math.tanh %204 : vector<2x32xf32>
    %206 = arith.mulf %201, %205 : vector<2x32xf32>
    %c10 = arith.constant 10 : index
    %c0_54 = arith.constant 0 : index
    %207 = vector.load %arg13[%c10, %c0_54] : memref<16x64xf32, #tpu.memory_space<vmem>>, vector<2x32xf32>
    tpu.vector_store %arg13[%c10, %c0_54], %206 {strides = array<i32>} : memref<16x64xf32, #tpu.memory_space<vmem>>, vector<2x32xf32>,
    %208 = vector.extract_strided_slice %90 {offsets = [12, 0], sizes = [2, 128], strides = [1, 1]} : vector<16x128xf32> to vector<2x128xf32>
    %cst_55 = arith.constant dense<0.000000e+00> : vector<2x128xf32>
    %209 = tpu.matmul %206, %91, %cst_55 {dimension_numbers = #tpu.dot_dimension_numbers<[1], [0], [0], [1], [0, 0, 1, 1], [], []>} : vector<2x32xf32>, vector<32x128xf32>, vector<2x128xf32> -> vector<2x128xf32>
    %210 = arith.addf %208, %209 : vector<2x128xf32>
    %211 = arith.negf %210 : vector<2x128xf32>
    %212 = math.exp %211 : vector<2x128xf32>
    %cst_56 = arith.constant 1.000000e+00 : f32
    %213 = vector.broadcast %cst_56 : f32 to vector<2x128xf32>
    %214 = arith.addf %213, %212 : vector<2x128xf32>
    %215 = arith.divf %213, %214 : vector<2x128xf32>
    %216 = math.tanh %210 : vector<2x128xf32>
    %217 = vector.extract_strided_slice %215 {offsets = [0, 0], sizes = [2, 32], strides = [1, 1]} : vector<2x128xf32> to vector<2x32xf32>
    %218 = vector.extract_strided_slice %215 {offsets = [0, 32], sizes = [2, 32], strides = [1, 1]} : vector<2x128xf32> to vector<2x32xf32>
    %219 = vector.extract_strided_slice %216 {offsets = [0, 64], sizes = [2, 32], strides = [1, 1]} : vector<2x128xf32> to vector<2x32xf32>
    %220 = vector.extract_strided_slice %215 {offsets = [0, 96], sizes = [2, 32], strides = [1, 1]} : vector<2x128xf32> to vector<2x32xf32>
    %221 = arith.mulf %218, %204 : vector<2x32xf32>
    %222 = arith.mulf %217, %219 : vector<2x32xf32>
    %223 = arith.addf %221, %222 : vector<2x32xf32>
    %224 = math.tanh %223 : vector<2x32xf32>
    %225 = arith.mulf %220, %224 : vector<2x32xf32>
    %c12 = arith.constant 12 : index
    %c0_57 = arith.constant 0 : index
    %226 = vector.load %arg13[%c12, %c0_57] : memref<16x64xf32, #tpu.memory_space<vmem>>, vector<2x32xf32>
    tpu.vector_store %arg13[%c12, %c0_57], %225 {strides = array<i32>} : memref<16x64xf32, #tpu.memory_space<vmem>>, vector<2x32xf32>,
    %227 = vector.extract_strided_slice %90 {offsets = [14, 0], sizes = [2, 128], strides = [1, 1]} : vector<16x128xf32> to vector<2x128xf32>
    %cst_58 = arith.constant dense<0.000000e+00> : vector<2x128xf32>
    %228 = tpu.matmul %225, %91, %cst_58 {dimension_numbers = #tpu.dot_dimension_numbers<[1], [0], [0], [1], [0, 0, 1, 1], [], []>} : vector<2x32xf32>, vector<32x128xf32>, vector<2x128xf32> -> vector<2x128xf32>
    %229 = arith.addf %227, %228 : vector<2x128xf32>
    %230 = arith.negf %229 : vector<2x128xf32>
    %231 = math.exp %230 : vector<2x128xf32>
    %cst_59 = arith.constant 1.000000e+00 : f32
    %232 = vector.broadcast %cst_59 : f32 to vector<2x128xf32>
    %233 = arith.addf %232, %231 : vector<2x128xf32>
    %234 = arith.divf %232, %233 : vector<2x128xf32>
    %235 = math.tanh %229 : vector<2x128xf32>
    %236 = vector.extract_strided_slice %234 {offsets = [0, 0], sizes = [2, 32], strides = [1, 1]} : vector<2x128xf32> to vector<2x32xf32>
    %237 = vector.extract_strided_slice %234 {offsets = [0, 32], sizes = [2, 32], strides = [1, 1]} : vector<2x128xf32> to vector<2x32xf32>
    %238 = vector.extract_strided_slice %235 {offsets = [0, 64], sizes = [2, 32], strides = [1, 1]} : vector<2x128xf32> to vector<2x32xf32>
    %239 = vector.extract_strided_slice %234 {offsets = [0, 96], sizes = [2, 32], strides = [1, 1]} : vector<2x128xf32> to vector<2x32xf32>
    %240 = arith.mulf %237, %223 : vector<2x32xf32>
    %241 = arith.mulf %236, %238 : vector<2x32xf32>
    %242 = arith.addf %240, %241 : vector<2x32xf32>
    %243 = math.tanh %242 : vector<2x32xf32>
    %244 = arith.mulf %239, %243 : vector<2x32xf32>
    %c14 = arith.constant 14 : index
    %c0_60 = arith.constant 0 : index
    %245 = vector.load %arg13[%c14, %c0_60] : memref<16x64xf32, #tpu.memory_space<vmem>>, vector<2x32xf32>
    tpu.vector_store %arg13[%c14, %c0_60], %244 {strides = array<i32>} : memref<16x64xf32, #tpu.memory_space<vmem>>, vector<2x32xf32>,
    %246 = vector.extract_strided_slice %89 {offsets = [0, 128], sizes = [16, 128], strides = [1, 1]} : vector<16x256xf32> to vector<16x128xf32>
    %c0_61 = arith.constant 0 : index
    %c0_62 = arith.constant 0 : index
    %247 = vector.load %arg5[%c0_61, %c0_62] : memref<32x128xf32, #tpu.memory_space<vmem>>, vector<32x128xf32>
    %cst_63 = arith.constant 0.000000e+00 : f32
    %248 = vector.broadcast %cst_63 : f32 to vector<2x32xf32>
    %cst_64 = arith.constant 0.000000e+00 : f32
    %249 = vector.broadcast %cst_64 : f32 to vector<2x32xf32>
    %250 = vector.extract_strided_slice %246 {offsets = [14, 0], sizes = [2, 128], strides = [1, 1]} : vector<16x128xf32> to vector<2x128xf32>
    %cst_65 = arith.constant dense<0.000000e+00> : vector<2x128xf32>
    %251 = tpu.matmul %248, %247, %cst_65 {dimension_numbers = #tpu.dot_dimension_numbers<[1], [0], [0], [1], [0, 0, 1, 1], [], []>} : vector<2x32xf32>, vector<32x128xf32>, vector<2x128xf32> -> vector<2x128xf32>
    %252 = arith.addf %250, %251 : vector<2x128xf32>
    %253 = arith.negf %252 : vector<2x128xf32>
    %254 = math.exp %253 : vector<2x128xf32>
    %cst_66 = arith.constant 1.000000e+00 : f32
    %255 = vector.broadcast %cst_66 : f32 to vector<2x128xf32>
    %256 = arith.addf %255, %254 : vector<2x128xf32>
    %257 = arith.divf %255, %256 : vector<2x128xf32>
    %258 = math.tanh %252 : vector<2x128xf32>
    %259 = vector.extract_strided_slice %257 {offsets = [0, 0], sizes = [2, 32], strides = [1, 1]} : vector<2x128xf32> to vector<2x32xf32>
    %260 = vector.extract_strided_slice %257 {offsets = [0, 32], sizes = [2, 32], strides = [1, 1]} : vector<2x128xf32> to vector<2x32xf32>
    %261 = vector.extract_strided_slice %258 {offsets = [0, 64], sizes = [2, 32], strides = [1, 1]} : vector<2x128xf32> to vector<2x32xf32>
    %262 = vector.extract_strided_slice %257 {offsets = [0, 96], sizes = [2, 32], strides = [1, 1]} : vector<2x128xf32> to vector<2x32xf32>
    %263 = arith.mulf %260, %249 : vector<2x32xf32>
    %264 = arith.mulf %259, %261 : vector<2x32xf32>
    %265 = arith.addf %263, %264 : vector<2x32xf32>
    %266 = math.tanh %265 : vector<2x32xf32>
    %267 = arith.mulf %262, %266 : vector<2x32xf32>
    %c14_67 = arith.constant 14 : index
    %c32 = arith.constant 32 : index
    %268 = vector.load %arg13[%c14_67, %c32] : memref<16x64xf32, #tpu.memory_space<vmem>>, vector<2x32xf32>
    tpu.vector_store %arg13[%c14_67, %c32], %267 {strides = array<i32>} : memref<16x64xf32, #tpu.memory_space<vmem>>, vector<2x32xf32>,
    %269 = vector.extract_strided_slice %246 {offsets = [12, 0], sizes = [2, 128], strides = [1, 1]} : vector<16x128xf32> to vector<2x128xf32>
    %cst_68 = arith.constant dense<0.000000e+00> : vector<2x128xf32>
    %270 = tpu.matmul %267, %247, %cst_68 {dimension_numbers = #tpu.dot_dimension_numbers<[1], [0], [0], [1], [0, 0, 1, 1], [], []>} : vector<2x32xf32>, vector<32x128xf32>, vector<2x128xf32> -> vector<2x128xf32>
    %271 = arith.addf %269, %270 : vector<2x128xf32>
    %272 = arith.negf %271 : vector<2x128xf32>
    %273 = math.exp %272 : vector<2x128xf32>
    %cst_69 = arith.constant 1.000000e+00 : f32
    %274 = vector.broadcast %cst_69 : f32 to vector<2x128xf32>
    %275 = arith.addf %274, %273 : vector<2x128xf32>
    %276 = arith.divf %274, %275 : vector<2x128xf32>
    %277 = math.tanh %271 : vector<2x128xf32>
    %278 = vector.extract_strided_slice %276 {offsets = [0, 0], sizes = [2, 32], strides = [1, 1]} : vector<2x128xf32> to vector<2x32xf32>
    %279 = vector.extract_strided_slice %276 {offsets = [0, 32], sizes = [2, 32], strides = [1, 1]} : vector<2x128xf32> to vector<2x32xf32>
    %280 = vector.extract_strided_slice %277 {offsets = [0, 64], sizes = [2, 32], strides = [1, 1]} : vector<2x128xf32> to vector<2x32xf32>
    %281 = vector.extract_strided_slice %276 {offsets = [0, 96], sizes = [2, 32], strides = [1, 1]} : vector<2x128xf32> to vector<2x32xf32>
    %282 = arith.mulf %279, %265 : vector<2x32xf32>
    %283 = arith.mulf %278, %280 : vector<2x32xf32>
    %284 = arith.addf %282, %283 : vector<2x32xf32>
    %285 = math.tanh %284 : vector<2x32xf32>
    %286 = arith.mulf %281, %285 : vector<2x32xf32>
    %c12_70 = arith.constant 12 : index
    %c32_71 = arith.constant 32 : index
    %287 = vector.load %arg13[%c12_70, %c32_71] : memref<16x64xf32, #tpu.memory_space<vmem>>, vector<2x32xf32>
    tpu.vector_store %arg13[%c12_70, %c32_71], %286 {strides = array<i32>} : memref<16x64xf32, #tpu.memory_space<vmem>>, vector<2x32xf32>,
    %288 = vector.extract_strided_slice %246 {offsets = [10, 0], sizes = [2, 128], strides = [1, 1]} : vector<16x128xf32> to vector<2x128xf32>
    %cst_72 = arith.constant dense<0.000000e+00> : vector<2x128xf32>
    %289 = tpu.matmul %286, %247, %cst_72 {dimension_numbers = #tpu.dot_dimension_numbers<[1], [0], [0], [1], [0, 0, 1, 1], [], []>} : vector<2x32xf32>, vector<32x128xf32>, vector<2x128xf32> -> vector<2x128xf32>
    %290 = arith.addf %288, %289 : vector<2x128xf32>
    %291 = arith.negf %290 : vector<2x128xf32>
    %292 = math.exp %291 : vector<2x128xf32>
    %cst_73 = arith.constant 1.000000e+00 : f32
    %293 = vector.broadcast %cst_73 : f32 to vector<2x128xf32>
    %294 = arith.addf %293, %292 : vector<2x128xf32>
    %295 = arith.divf %293, %294 : vector<2x128xf32>
    %296 = math.tanh %290 : vector<2x128xf32>
    %297 = vector.extract_strided_slice %295 {offsets = [0, 0], sizes = [2, 32], strides = [1, 1]} : vector<2x128xf32> to vector<2x32xf32>
    %298 = vector.extract_strided_slice %295 {offsets = [0, 32], sizes = [2, 32], strides = [1, 1]} : vector<2x128xf32> to vector<2x32xf32>
    %299 = vector.extract_strided_slice %296 {offsets = [0, 64], sizes = [2, 32], strides = [1, 1]} : vector<2x128xf32> to vector<2x32xf32>
    %300 = vector.extract_strided_slice %295 {offsets = [0, 96], sizes = [2, 32], strides = [1, 1]} : vector<2x128xf32> to vector<2x32xf32>
    %301 = arith.mulf %298, %284 : vector<2x32xf32>
    %302 = arith.mulf %297, %299 : vector<2x32xf32>
    %303 = arith.addf %301, %302 : vector<2x32xf32>
    %304 = math.tanh %303 : vector<2x32xf32>
    %305 = arith.mulf %300, %304 : vector<2x32xf32>
    %c10_74 = arith.constant 10 : index
    %c32_75 = arith.constant 32 : index
    %306 = vector.load %arg13[%c10_74, %c32_75] : memref<16x64xf32, #tpu.memory_space<vmem>>, vector<2x32xf32>
    tpu.vector_store %arg13[%c10_74, %c32_75], %305 {strides = array<i32>} : memref<16x64xf32, #tpu.memory_space<vmem>>, vector<2x32xf32>,
    %307 = vector.extract_strided_slice %246 {offsets = [8, 0], sizes = [2, 128], strides = [1, 1]} : vector<16x128xf32> to vector<2x128xf32>
    %cst_76 = arith.constant dense<0.000000e+00> : vector<2x128xf32>
    %308 = tpu.matmul %305, %247, %cst_76 {dimension_numbers = #tpu.dot_dimension_numbers<[1], [0], [0], [1], [0, 0, 1, 1], [], []>} : vector<2x32xf32>, vector<32x128xf32>, vector<2x128xf32> -> vector<2x128xf32>
    %309 = arith.addf %307, %308 : vector<2x128xf32>
    %310 = arith.negf %309 : vector<2x128xf32>
    %311 = math.exp %310 : vector<2x128xf32>
    %cst_77 = arith.constant 1.000000e+00 : f32
    %312 = vector.broadcast %cst_77 : f32 to vector<2x128xf32>
    %313 = arith.addf %312, %311 : vector<2x128xf32>
    %314 = arith.divf %312, %313 : vector<2x128xf32>
    %315 = math.tanh %309 : vector<2x128xf32>
    %316 = vector.extract_strided_slice %314 {offsets = [0, 0], sizes = [2, 32], strides = [1, 1]} : vector<2x128xf32> to vector<2x32xf32>
    %317 = vector.extract_strided_slice %314 {offsets = [0, 32], sizes = [2, 32], strides = [1, 1]} : vector<2x128xf32> to vector<2x32xf32>
    %318 = vector.extract_strided_slice %315 {offsets = [0, 64], sizes = [2, 32], strides = [1, 1]} : vector<2x128xf32> to vector<2x32xf32>
    %319 = vector.extract_strided_slice %314 {offsets = [0, 96], sizes = [2, 32], strides = [1, 1]} : vector<2x128xf32> to vector<2x32xf32>
    %320 = arith.mulf %317, %303 : vector<2x32xf32>
    %321 = arith.mulf %316, %318 : vector<2x32xf32>
    %322 = arith.addf %320, %321 : vector<2x32xf32>
    %323 = math.tanh %322 : vector<2x32xf32>
    %324 = arith.mulf %319, %323 : vector<2x32xf32>
    %c8_78 = arith.constant 8 : index
    %c32_79 = arith.constant 32 : index
    %325 = vector.load %arg13[%c8_78, %c32_79] : memref<16x64xf32, #tpu.memory_space<vmem>>, vector<2x32xf32>
    tpu.vector_store %arg13[%c8_78, %c32_79], %324 {strides = array<i32>} : memref<16x64xf32, #tpu.memory_space<vmem>>, vector<2x32xf32>,
    %326 = vector.extract_strided_slice %246 {offsets = [6, 0], sizes = [2, 128], strides = [1, 1]} : vector<16x128xf32> to vector<2x128xf32>
    %cst_80 = arith.constant dense<0.000000e+00> : vector<2x128xf32>
    %327 = tpu.matmul %324, %247, %cst_80 {dimension_numbers = #tpu.dot_dimension_numbers<[1], [0], [0], [1], [0, 0, 1, 1], [], []>} : vector<2x32xf32>, vector<32x128xf32>, vector<2x128xf32> -> vector<2x128xf32>
    %328 = arith.addf %326, %327 : vector<2x128xf32>
    %329 = arith.negf %328 : vector<2x128xf32>
    %330 = math.exp %329 : vector<2x128xf32>
    %cst_81 = arith.constant 1.000000e+00 : f32
    %331 = vector.broadcast %cst_81 : f32 to vector<2x128xf32>
    %332 = arith.addf %331, %330 : vector<2x128xf32>
    %333 = arith.divf %331, %332 : vector<2x128xf32>
    %334 = math.tanh %328 : vector<2x128xf32>
    %335 = vector.extract_strided_slice %333 {offsets = [0, 0], sizes = [2, 32], strides = [1, 1]} : vector<2x128xf32> to vector<2x32xf32>
    %336 = vector.extract_strided_slice %333 {offsets = [0, 32], sizes = [2, 32], strides = [1, 1]} : vector<2x128xf32> to vector<2x32xf32>
    %337 = vector.extract_strided_slice %334 {offsets = [0, 64], sizes = [2, 32], strides = [1, 1]} : vector<2x128xf32> to vector<2x32xf32>
    %338 = vector.extract_strided_slice %333 {offsets = [0, 96], sizes = [2, 32], strides = [1, 1]} : vector<2x128xf32> to vector<2x32xf32>
    %339 = arith.mulf %336, %322 : vector<2x32xf32>
    %340 = arith.mulf %335, %337 : vector<2x32xf32>
    %341 = arith.addf %339, %340 : vector<2x32xf32>
    %342 = math.tanh %341 : vector<2x32xf32>
    %343 = arith.mulf %338, %342 : vector<2x32xf32>
    %c6_82 = arith.constant 6 : index
    %c32_83 = arith.constant 32 : index
    %344 = vector.load %arg13[%c6_82, %c32_83] : memref<16x64xf32, #tpu.memory_space<vmem>>, vector<2x32xf32>
    tpu.vector_store %arg13[%c6_82, %c32_83], %343 {strides = array<i32>} : memref<16x64xf32, #tpu.memory_space<vmem>>, vector<2x32xf32>,
    %345 = vector.extract_strided_slice %246 {offsets = [4, 0], sizes = [2, 128], strides = [1, 1]} : vector<16x128xf32> to vector<2x128xf32>
    %cst_84 = arith.constant dense<0.000000e+00> : vector<2x128xf32>
    %346 = tpu.matmul %343, %247, %cst_84 {dimension_numbers = #tpu.dot_dimension_numbers<[1], [0], [0], [1], [0, 0, 1, 1], [], []>} : vector<2x32xf32>, vector<32x128xf32>, vector<2x128xf32> -> vector<2x128xf32>
    %347 = arith.addf %345, %346 : vector<2x128xf32>
    %348 = arith.negf %347 : vector<2x128xf32>
    %349 = math.exp %348 : vector<2x128xf32>
    %cst_85 = arith.constant 1.000000e+00 : f32
    %350 = vector.broadcast %cst_85 : f32 to vector<2x128xf32>
    %351 = arith.addf %350, %349 : vector<2x128xf32>
    %352 = arith.divf %350, %351 : vector<2x128xf32>
    %353 = math.tanh %347 : vector<2x128xf32>
    %354 = vector.extract_strided_slice %352 {offsets = [0, 0], sizes = [2, 32], strides = [1, 1]} : vector<2x128xf32> to vector<2x32xf32>
    %355 = vector.extract_strided_slice %352 {offsets = [0, 32], sizes = [2, 32], strides = [1, 1]} : vector<2x128xf32> to vector<2x32xf32>
    %356 = vector.extract_strided_slice %353 {offsets = [0, 64], sizes = [2, 32], strides = [1, 1]} : vector<2x128xf32> to vector<2x32xf32>
    %357 = vector.extract_strided_slice %352 {offsets = [0, 96], sizes = [2, 32], strides = [1, 1]} : vector<2x128xf32> to vector<2x32xf32>
    %358 = arith.mulf %355, %341 : vector<2x32xf32>
    %359 = arith.mulf %354, %356 : vector<2x32xf32>
    %360 = arith.addf %358, %359 : vector<2x32xf32>
    %361 = math.tanh %360 : vector<2x32xf32>
    %362 = arith.mulf %357, %361 : vector<2x32xf32>
    %c4_86 = arith.constant 4 : index
    %c32_87 = arith.constant 32 : index
    %363 = vector.load %arg13[%c4_86, %c32_87] : memref<16x64xf32, #tpu.memory_space<vmem>>, vector<2x32xf32>
    tpu.vector_store %arg13[%c4_86, %c32_87], %362 {strides = array<i32>} : memref<16x64xf32, #tpu.memory_space<vmem>>, vector<2x32xf32>,
    %364 = vector.extract_strided_slice %246 {offsets = [2, 0], sizes = [2, 128], strides = [1, 1]} : vector<16x128xf32> to vector<2x128xf32>
    %cst_88 = arith.constant dense<0.000000e+00> : vector<2x128xf32>
    %365 = tpu.matmul %362, %247, %cst_88 {dimension_numbers = #tpu.dot_dimension_numbers<[1], [0], [0], [1], [0, 0, 1, 1], [], []>} : vector<2x32xf32>, vector<32x128xf32>, vector<2x128xf32> -> vector<2x128xf32>
    %366 = arith.addf %364, %365 : vector<2x128xf32>
    %367 = arith.negf %366 : vector<2x128xf32>
    %368 = math.exp %367 : vector<2x128xf32>
    %cst_89 = arith.constant 1.000000e+00 : f32
    %369 = vector.broadcast %cst_89 : f32 to vector<2x128xf32>
    %370 = arith.addf %369, %368 : vector<2x128xf32>
    %371 = arith.divf %369, %370 : vector<2x128xf32>
    %372 = math.tanh %366 : vector<2x128xf32>
    %373 = vector.extract_strided_slice %371 {offsets = [0, 0], sizes = [2, 32], strides = [1, 1]} : vector<2x128xf32> to vector<2x32xf32>
    %374 = vector.extract_strided_slice %371 {offsets = [0, 32], sizes = [2, 32], strides = [1, 1]} : vector<2x128xf32> to vector<2x32xf32>
    %375 = vector.extract_strided_slice %372 {offsets = [0, 64], sizes = [2, 32], strides = [1, 1]} : vector<2x128xf32> to vector<2x32xf32>
    %376 = vector.extract_strided_slice %371 {offsets = [0, 96], sizes = [2, 32], strides = [1, 1]} : vector<2x128xf32> to vector<2x32xf32>
    %377 = arith.mulf %374, %360 : vector<2x32xf32>
    %378 = arith.mulf %373, %375 : vector<2x32xf32>
    %379 = arith.addf %377, %378 : vector<2x32xf32>
    %380 = math.tanh %379 : vector<2x32xf32>
    %381 = arith.mulf %376, %380 : vector<2x32xf32>
    %c2_90 = arith.constant 2 : index
    %c32_91 = arith.constant 32 : index
    %382 = vector.load %arg13[%c2_90, %c32_91] : memref<16x64xf32, #tpu.memory_space<vmem>>, vector<2x32xf32>
    tpu.vector_store %arg13[%c2_90, %c32_91], %381 {strides = array<i32>} : memref<16x64xf32, #tpu.memory_space<vmem>>, vector<2x32xf32>,
    %383 = vector.extract_strided_slice %246 {offsets = [0, 0], sizes = [2, 128], strides = [1, 1]} : vector<16x128xf32> to vector<2x128xf32>
    %cst_92 = arith.constant dense<0.000000e+00> : vector<2x128xf32>
    %384 = tpu.matmul %381, %247, %cst_92 {dimension_numbers = #tpu.dot_dimension_numbers<[1], [0], [0], [1], [0, 0, 1, 1], [], []>} : vector<2x32xf32>, vector<32x128xf32>, vector<2x128xf32> -> vector<2x128xf32>
    %385 = arith.addf %383, %384 : vector<2x128xf32>
    %386 = arith.negf %385 : vector<2x128xf32>
    %387 = math.exp %386 : vector<2x128xf32>
    %cst_93 = arith.constant 1.000000e+00 : f32
    %388 = vector.broadcast %cst_93 : f32 to vector<2x128xf32>
    %389 = arith.addf %388, %387 : vector<2x128xf32>
    %390 = arith.divf %388, %389 : vector<2x128xf32>
    %391 = math.tanh %385 : vector<2x128xf32>
    %392 = vector.extract_strided_slice %390 {offsets = [0, 0], sizes = [2, 32], strides = [1, 1]} : vector<2x128xf32> to vector<2x32xf32>
    %393 = vector.extract_strided_slice %390 {offsets = [0, 32], sizes = [2, 32], strides = [1, 1]} : vector<2x128xf32> to vector<2x32xf32>
    %394 = vector.extract_strided_slice %391 {offsets = [0, 64], sizes = [2, 32], strides = [1, 1]} : vector<2x128xf32> to vector<2x32xf32>
    %395 = vector.extract_strided_slice %390 {offsets = [0, 96], sizes = [2, 32], strides = [1, 1]} : vector<2x128xf32> to vector<2x32xf32>
    %396 = arith.mulf %393, %379 : vector<2x32xf32>
    %397 = arith.mulf %392, %394 : vector<2x32xf32>
    %398 = arith.addf %396, %397 : vector<2x32xf32>
    %399 = math.tanh %398 : vector<2x32xf32>
    %400 = arith.mulf %395, %399 : vector<2x32xf32>
    %c0_94 = arith.constant 0 : index
    %c32_95 = arith.constant 32 : index
    %401 = vector.load %arg13[%c0_94, %c32_95] : memref<16x64xf32, #tpu.memory_space<vmem>>, vector<2x32xf32>
    tpu.vector_store %arg13[%c0_94, %c32_95], %400 {strides = array<i32>} : memref<16x64xf32, #tpu.memory_space<vmem>>, vector<2x32xf32>,
    %c0_96 = arith.constant 0 : index
    %c0_97 = arith.constant 0 : index
    %402 = vector.load %arg13[%c0_96, %c0_97] : memref<16x64xf32, #tpu.memory_space<vmem>>, vector<16x64xf32>
    %c0_98 = arith.constant 0 : index
    %c0_99 = arith.constant 0 : index
    %403 = vector.load %arg6[%c0_98, %c0_99] : memref<64x256xf32, #tpu.memory_space<vmem>>, vector<64x256xf32>
    %cst_100 = arith.constant dense<0.000000e+00> : vector<16x256xf32>
    %404 = tpu.matmul %402, %403, %cst_100 {dimension_numbers = #tpu.dot_dimension_numbers<[1], [0], [0], [1], [0, 0, 1, 1], [], []>} : vector<16x64xf32>, vector<64x256xf32>, vector<16x256xf32> -> vector<16x256xf32>
    %c0_101 = arith.constant 0 : index
    %c0_102 = arith.constant 0 : index
    %405 = vector.load %arg7[%c0_101, %c0_102] : memref<1x256xf32, #tpu.memory_space<vmem>>, vector<1x256xf32>
    %406 = vector.broadcast %405 : vector<1x256xf32> to vector<16x256xf32>
    %407 = arith.addf %404, %406 : vector<16x256xf32>
    %408 = vector.extract_strided_slice %407 {offsets = [0, 0], sizes = [16, 128], strides = [1, 1]} : vector<16x256xf32> to vector<16x128xf32>
    %c0_103 = arith.constant 0 : index
    %c0_104 = arith.constant 0 : index
    %409 = vector.load %arg8[%c0_103, %c0_104] : memref<32x128xf32, #tpu.memory_space<vmem>>, vector<32x128xf32>
    %cst_105 = arith.constant 0.000000e+00 : f32
    %410 = vector.broadcast %cst_105 : f32 to vector<2x32xf32>
    %cst_106 = arith.constant 0.000000e+00 : f32
    %411 = vector.broadcast %cst_106 : f32 to vector<2x32xf32>
    %412 = vector.extract_strided_slice %408 {offsets = [0, 0], sizes = [2, 128], strides = [1, 1]} : vector<16x128xf32> to vector<2x128xf32>
    %cst_107 = arith.constant dense<0.000000e+00> : vector<2x128xf32>
    %413 = tpu.matmul %410, %409, %cst_107 {dimension_numbers = #tpu.dot_dimension_numbers<[1], [0], [0], [1], [0, 0, 1, 1], [], []>} : vector<2x32xf32>, vector<32x128xf32>, vector<2x128xf32> -> vector<2x128xf32>
    %414 = arith.addf %412, %413 : vector<2x128xf32>
    %415 = arith.negf %414 : vector<2x128xf32>
    %416 = math.exp %415 : vector<2x128xf32>
    %cst_108 = arith.constant 1.000000e+00 : f32
    %417 = vector.broadcast %cst_108 : f32 to vector<2x128xf32>
    %418 = arith.addf %417, %416 : vector<2x128xf32>
    %419 = arith.divf %417, %418 : vector<2x128xf32>
    %420 = math.tanh %414 : vector<2x128xf32>
    %421 = vector.extract_strided_slice %419 {offsets = [0, 0], sizes = [2, 32], strides = [1, 1]} : vector<2x128xf32> to vector<2x32xf32>
    %422 = vector.extract_strided_slice %419 {offsets = [0, 32], sizes = [2, 32], strides = [1, 1]} : vector<2x128xf32> to vector<2x32xf32>
    %423 = vector.extract_strided_slice %420 {offsets = [0, 64], sizes = [2, 32], strides = [1, 1]} : vector<2x128xf32> to vector<2x32xf32>
    %424 = vector.extract_strided_slice %419 {offsets = [0, 96], sizes = [2, 32], strides = [1, 1]} : vector<2x128xf32> to vector<2x32xf32>
    %425 = arith.mulf %422, %411 : vector<2x32xf32>
    %426 = arith.mulf %421, %423 : vector<2x32xf32>
    %427 = arith.addf %425, %426 : vector<2x32xf32>
    %428 = math.tanh %427 : vector<2x32xf32>
    %429 = arith.mulf %424, %428 : vector<2x32xf32>
    %430 = vector.extract_strided_slice %408 {offsets = [2, 0], sizes = [2, 128], strides = [1, 1]} : vector<16x128xf32> to vector<2x128xf32>
    %cst_109 = arith.constant dense<0.000000e+00> : vector<2x128xf32>
    %431 = tpu.matmul %429, %409, %cst_109 {dimension_numbers = #tpu.dot_dimension_numbers<[1], [0], [0], [1], [0, 0, 1, 1], [], []>} : vector<2x32xf32>, vector<32x128xf32>, vector<2x128xf32> -> vector<2x128xf32>
    %432 = arith.addf %430, %431 : vector<2x128xf32>
    %433 = arith.negf %432 : vector<2x128xf32>
    %434 = math.exp %433 : vector<2x128xf32>
    %cst_110 = arith.constant 1.000000e+00 : f32
    %435 = vector.broadcast %cst_110 : f32 to vector<2x128xf32>
    %436 = arith.addf %435, %434 : vector<2x128xf32>
    %437 = arith.divf %435, %436 : vector<2x128xf32>
    %438 = math.tanh %432 : vector<2x128xf32>
    %439 = vector.extract_strided_slice %437 {offsets = [0, 0], sizes = [2, 32], strides = [1, 1]} : vector<2x128xf32> to vector<2x32xf32>
    %440 = vector.extract_strided_slice %437 {offsets = [0, 32], sizes = [2, 32], strides = [1, 1]} : vector<2x128xf32> to vector<2x32xf32>
    %441 = vector.extract_strided_slice %438 {offsets = [0, 64], sizes = [2, 32], strides = [1, 1]} : vector<2x128xf32> to vector<2x32xf32>
    %442 = vector.extract_strided_slice %437 {offsets = [0, 96], sizes = [2, 32], strides = [1, 1]} : vector<2x128xf32> to vector<2x32xf32>
    %443 = arith.mulf %440, %427 : vector<2x32xf32>
    %444 = arith.mulf %439, %441 : vector<2x32xf32>
    %445 = arith.addf %443, %444 : vector<2x32xf32>
    %446 = math.tanh %445 : vector<2x32xf32>
    %447 = arith.mulf %442, %446 : vector<2x32xf32>
    %448 = vector.extract_strided_slice %408 {offsets = [4, 0], sizes = [2, 128], strides = [1, 1]} : vector<16x128xf32> to vector<2x128xf32>
    %cst_111 = arith.constant dense<0.000000e+00> : vector<2x128xf32>
    %449 = tpu.matmul %447, %409, %cst_111 {dimension_numbers = #tpu.dot_dimension_numbers<[1], [0], [0], [1], [0, 0, 1, 1], [], []>} : vector<2x32xf32>, vector<32x128xf32>, vector<2x128xf32> -> vector<2x128xf32>
    %450 = arith.addf %448, %449 : vector<2x128xf32>
    %451 = arith.negf %450 : vector<2x128xf32>
    %452 = math.exp %451 : vector<2x128xf32>
    %cst_112 = arith.constant 1.000000e+00 : f32
    %453 = vector.broadcast %cst_112 : f32 to vector<2x128xf32>
    %454 = arith.addf %453, %452 : vector<2x128xf32>
    %455 = arith.divf %453, %454 : vector<2x128xf32>
    %456 = math.tanh %450 : vector<2x128xf32>
    %457 = vector.extract_strided_slice %455 {offsets = [0, 0], sizes = [2, 32], strides = [1, 1]} : vector<2x128xf32> to vector<2x32xf32>
    %458 = vector.extract_strided_slice %455 {offsets = [0, 32], sizes = [2, 32], strides = [1, 1]} : vector<2x128xf32> to vector<2x32xf32>
    %459 = vector.extract_strided_slice %456 {offsets = [0, 64], sizes = [2, 32], strides = [1, 1]} : vector<2x128xf32> to vector<2x32xf32>
    %460 = vector.extract_strided_slice %455 {offsets = [0, 96], sizes = [2, 32], strides = [1, 1]} : vector<2x128xf32> to vector<2x32xf32>
    %461 = arith.mulf %458, %445 : vector<2x32xf32>
    %462 = arith.mulf %457, %459 : vector<2x32xf32>
    %463 = arith.addf %461, %462 : vector<2x32xf32>
    %464 = math.tanh %463 : vector<2x32xf32>
    %465 = arith.mulf %460, %464 : vector<2x32xf32>
    %466 = vector.extract_strided_slice %408 {offsets = [6, 0], sizes = [2, 128], strides = [1, 1]} : vector<16x128xf32> to vector<2x128xf32>
    %cst_113 = arith.constant dense<0.000000e+00> : vector<2x128xf32>
    %467 = tpu.matmul %465, %409, %cst_113 {dimension_numbers = #tpu.dot_dimension_numbers<[1], [0], [0], [1], [0, 0, 1, 1], [], []>} : vector<2x32xf32>, vector<32x128xf32>, vector<2x128xf32> -> vector<2x128xf32>
    %468 = arith.addf %466, %467 : vector<2x128xf32>
    %469 = arith.negf %468 : vector<2x128xf32>
    %470 = math.exp %469 : vector<2x128xf32>
    %cst_114 = arith.constant 1.000000e+00 : f32
    %471 = vector.broadcast %cst_114 : f32 to vector<2x128xf32>
    %472 = arith.addf %471, %470 : vector<2x128xf32>
    %473 = arith.divf %471, %472 : vector<2x128xf32>
    %474 = math.tanh %468 : vector<2x128xf32>
    %475 = vector.extract_strided_slice %473 {offsets = [0, 0], sizes = [2, 32], strides = [1, 1]} : vector<2x128xf32> to vector<2x32xf32>
    %476 = vector.extract_strided_slice %473 {offsets = [0, 32], sizes = [2, 32], strides = [1, 1]} : vector<2x128xf32> to vector<2x32xf32>
    %477 = vector.extract_strided_slice %474 {offsets = [0, 64], sizes = [2, 32], strides = [1, 1]} : vector<2x128xf32> to vector<2x32xf32>
    %478 = vector.extract_strided_slice %473 {offsets = [0, 96], sizes = [2, 32], strides = [1, 1]} : vector<2x128xf32> to vector<2x32xf32>
    %479 = arith.mulf %476, %463 : vector<2x32xf32>
    %480 = arith.mulf %475, %477 : vector<2x32xf32>
    %481 = arith.addf %479, %480 : vector<2x32xf32>
    %482 = math.tanh %481 : vector<2x32xf32>
    %483 = arith.mulf %478, %482 : vector<2x32xf32>
    %484 = vector.extract_strided_slice %408 {offsets = [8, 0], sizes = [2, 128], strides = [1, 1]} : vector<16x128xf32> to vector<2x128xf32>
    %cst_115 = arith.constant dense<0.000000e+00> : vector<2x128xf32>
    %485 = tpu.matmul %483, %409, %cst_115 {dimension_numbers = #tpu.dot_dimension_numbers<[1], [0], [0], [1], [0, 0, 1, 1], [], []>} : vector<2x32xf32>, vector<32x128xf32>, vector<2x128xf32> -> vector<2x128xf32>
    %486 = arith.addf %484, %485 : vector<2x128xf32>
    %487 = arith.negf %486 : vector<2x128xf32>
    %488 = math.exp %487 : vector<2x128xf32>
    %cst_116 = arith.constant 1.000000e+00 : f32
    %489 = vector.broadcast %cst_116 : f32 to vector<2x128xf32>
    %490 = arith.addf %489, %488 : vector<2x128xf32>
    %491 = arith.divf %489, %490 : vector<2x128xf32>
    %492 = math.tanh %486 : vector<2x128xf32>
    %493 = vector.extract_strided_slice %491 {offsets = [0, 0], sizes = [2, 32], strides = [1, 1]} : vector<2x128xf32> to vector<2x32xf32>
    %494 = vector.extract_strided_slice %491 {offsets = [0, 32], sizes = [2, 32], strides = [1, 1]} : vector<2x128xf32> to vector<2x32xf32>
    %495 = vector.extract_strided_slice %492 {offsets = [0, 64], sizes = [2, 32], strides = [1, 1]} : vector<2x128xf32> to vector<2x32xf32>
    %496 = vector.extract_strided_slice %491 {offsets = [0, 96], sizes = [2, 32], strides = [1, 1]} : vector<2x128xf32> to vector<2x32xf32>
    %497 = arith.mulf %494, %481 : vector<2x32xf32>
    %498 = arith.mulf %493, %495 : vector<2x32xf32>
    %499 = arith.addf %497, %498 : vector<2x32xf32>
    %500 = math.tanh %499 : vector<2x32xf32>
    %501 = arith.mulf %496, %500 : vector<2x32xf32>
    %502 = vector.extract_strided_slice %408 {offsets = [10, 0], sizes = [2, 128], strides = [1, 1]} : vector<16x128xf32> to vector<2x128xf32>
    %cst_117 = arith.constant dense<0.000000e+00> : vector<2x128xf32>
    %503 = tpu.matmul %501, %409, %cst_117 {dimension_numbers = #tpu.dot_dimension_numbers<[1], [0], [0], [1], [0, 0, 1, 1], [], []>} : vector<2x32xf32>, vector<32x128xf32>, vector<2x128xf32> -> vector<2x128xf32>
    %504 = arith.addf %502, %503 : vector<2x128xf32>
    %505 = arith.negf %504 : vector<2x128xf32>
    %506 = math.exp %505 : vector<2x128xf32>
    %cst_118 = arith.constant 1.000000e+00 : f32
    %507 = vector.broadcast %cst_118 : f32 to vector<2x128xf32>
    %508 = arith.addf %507, %506 : vector<2x128xf32>
    %509 = arith.divf %507, %508 : vector<2x128xf32>
    %510 = math.tanh %504 : vector<2x128xf32>
    %511 = vector.extract_strided_slice %509 {offsets = [0, 0], sizes = [2, 32], strides = [1, 1]} : vector<2x128xf32> to vector<2x32xf32>
    %512 = vector.extract_strided_slice %509 {offsets = [0, 32], sizes = [2, 32], strides = [1, 1]} : vector<2x128xf32> to vector<2x32xf32>
    %513 = vector.extract_strided_slice %510 {offsets = [0, 64], sizes = [2, 32], strides = [1, 1]} : vector<2x128xf32> to vector<2x32xf32>
    %514 = vector.extract_strided_slice %509 {offsets = [0, 96], sizes = [2, 32], strides = [1, 1]} : vector<2x128xf32> to vector<2x32xf32>
    %515 = arith.mulf %512, %499 : vector<2x32xf32>
    %516 = arith.mulf %511, %513 : vector<2x32xf32>
    %517 = arith.addf %515, %516 : vector<2x32xf32>
    %518 = math.tanh %517 : vector<2x32xf32>
    %519 = arith.mulf %514, %518 : vector<2x32xf32>
    %520 = vector.extract_strided_slice %408 {offsets = [12, 0], sizes = [2, 128], strides = [1, 1]} : vector<16x128xf32> to vector<2x128xf32>
    %cst_119 = arith.constant dense<0.000000e+00> : vector<2x128xf32>
    %521 = tpu.matmul %519, %409, %cst_119 {dimension_numbers = #tpu.dot_dimension_numbers<[1], [0], [0], [1], [0, 0, 1, 1], [], []>} : vector<2x32xf32>, vector<32x128xf32>, vector<2x128xf32> -> vector<2x128xf32>
    %522 = arith.addf %520, %521 : vector<2x128xf32>
    %523 = arith.negf %522 : vector<2x128xf32>
    %524 = math.exp %523 : vector<2x128xf32>
    %cst_120 = arith.constant 1.000000e+00 : f32
    %525 = vector.broadcast %cst_120 : f32 to vector<2x128xf32>
    %526 = arith.addf %525, %524 : vector<2x128xf32>
    %527 = arith.divf %525, %526 : vector<2x128xf32>
    %528 = math.tanh %522 : vector<2x128xf32>
    %529 = vector.extract_strided_slice %527 {offsets = [0, 0], sizes = [2, 32], strides = [1, 1]} : vector<2x128xf32> to vector<2x32xf32>
    %530 = vector.extract_strided_slice %527 {offsets = [0, 32], sizes = [2, 32], strides = [1, 1]} : vector<2x128xf32> to vector<2x32xf32>
    %531 = vector.extract_strided_slice %528 {offsets = [0, 64], sizes = [2, 32], strides = [1, 1]} : vector<2x128xf32> to vector<2x32xf32>
    %532 = vector.extract_strided_slice %527 {offsets = [0, 96], sizes = [2, 32], strides = [1, 1]} : vector<2x128xf32> to vector<2x32xf32>
    %533 = arith.mulf %530, %517 : vector<2x32xf32>
    %534 = arith.mulf %529, %531 : vector<2x32xf32>
    %535 = arith.addf %533, %534 : vector<2x32xf32>
    %536 = math.tanh %535 : vector<2x32xf32>
    %537 = arith.mulf %532, %536 : vector<2x32xf32>
    %538 = vector.extract_strided_slice %408 {offsets = [14, 0], sizes = [2, 128], strides = [1, 1]} : vector<16x128xf32> to vector<2x128xf32>
    %cst_121 = arith.constant dense<0.000000e+00> : vector<2x128xf32>
    %539 = tpu.matmul %537, %409, %cst_121 {dimension_numbers = #tpu.dot_dimension_numbers<[1], [0], [0], [1], [0, 0, 1, 1], [], []>} : vector<2x32xf32>, vector<32x128xf32>, vector<2x128xf32> -> vector<2x128xf32>
    %540 = arith.addf %538, %539 : vector<2x128xf32>
    %541 = arith.negf %540 : vector<2x128xf32>
    %542 = math.exp %541 : vector<2x128xf32>
    %cst_122 = arith.constant 1.000000e+00 : f32
    %543 = vector.broadcast %cst_122 : f32 to vector<2x128xf32>
    %544 = arith.addf %543, %542 : vector<2x128xf32>
    %545 = arith.divf %543, %544 : vector<2x128xf32>
    %546 = math.tanh %540 : vector<2x128xf32>
    %547 = vector.extract_strided_slice %545 {offsets = [0, 0], sizes = [2, 32], strides = [1, 1]} : vector<2x128xf32> to vector<2x32xf32>
    %548 = vector.extract_strided_slice %545 {offsets = [0, 32], sizes = [2, 32], strides = [1, 1]} : vector<2x128xf32> to vector<2x32xf32>
    %549 = vector.extract_strided_slice %546 {offsets = [0, 64], sizes = [2, 32], strides = [1, 1]} : vector<2x128xf32> to vector<2x32xf32>
    %550 = arith.mulf %548, %535 : vector<2x32xf32>
    %551 = arith.mulf %547, %549 : vector<2x32xf32>
    %552 = arith.addf %550, %551 : vector<2x32xf32>
    %553 = vector.extract_strided_slice %407 {offsets = [0, 128], sizes = [16, 128], strides = [1, 1]} : vector<16x256xf32> to vector<16x128xf32>
    %c0_123 = arith.constant 0 : index
    %c0_124 = arith.constant 0 : index
    %554 = vector.load %arg9[%c0_123, %c0_124] : memref<32x128xf32, #tpu.memory_space<vmem>>, vector<32x128xf32>
    %cst_125 = arith.constant 0.000000e+00 : f32
    %555 = vector.broadcast %cst_125 : f32 to vector<2x32xf32>
    %cst_126 = arith.constant 0.000000e+00 : f32
    %556 = vector.broadcast %cst_126 : f32 to vector<2x32xf32>
    %557 = vector.extract_strided_slice %553 {offsets = [14, 0], sizes = [2, 128], strides = [1, 1]} : vector<16x128xf32> to vector<2x128xf32>
    %cst_127 = arith.constant dense<0.000000e+00> : vector<2x128xf32>
    %558 = tpu.matmul %555, %554, %cst_127 {dimension_numbers = #tpu.dot_dimension_numbers<[1], [0], [0], [1], [0, 0, 1, 1], [], []>} : vector<2x32xf32>, vector<32x128xf32>, vector<2x128xf32> -> vector<2x128xf32>
    %559 = arith.addf %557, %558 : vector<2x128xf32>
    %560 = arith.negf %559 : vector<2x128xf32>
    %561 = math.exp %560 : vector<2x128xf32>
    %cst_128 = arith.constant 1.000000e+00 : f32
    %562 = vector.broadcast %cst_128 : f32 to vector<2x128xf32>
    %563 = arith.addf %562, %561 : vector<2x128xf32>
    %564 = arith.divf %562, %563 : vector<2x128xf32>
    %565 = math.tanh %559 : vector<2x128xf32>
    %566 = vector.extract_strided_slice %564 {offsets = [0, 0], sizes = [2, 32], strides = [1, 1]} : vector<2x128xf32> to vector<2x32xf32>
    %567 = vector.extract_strided_slice %564 {offsets = [0, 32], sizes = [2, 32], strides = [1, 1]} : vector<2x128xf32> to vector<2x32xf32>
    %568 = vector.extract_strided_slice %565 {offsets = [0, 64], sizes = [2, 32], strides = [1, 1]} : vector<2x128xf32> to vector<2x32xf32>
    %569 = vector.extract_strided_slice %564 {offsets = [0, 96], sizes = [2, 32], strides = [1, 1]} : vector<2x128xf32> to vector<2x32xf32>
    %570 = arith.mulf %567, %556 : vector<2x32xf32>
    %571 = arith.mulf %566, %568 : vector<2x32xf32>
    %572 = arith.addf %570, %571 : vector<2x32xf32>
    %573 = math.tanh %572 : vector<2x32xf32>
    %574 = arith.mulf %569, %573 : vector<2x32xf32>
    %575 = vector.extract_strided_slice %553 {offsets = [12, 0], sizes = [2, 128], strides = [1, 1]} : vector<16x128xf32> to vector<2x128xf32>
    %cst_129 = arith.constant dense<0.000000e+00> : vector<2x128xf32>
    %576 = tpu.matmul %574, %554, %cst_129 {dimension_numbers = #tpu.dot_dimension_numbers<[1], [0], [0], [1], [0, 0, 1, 1], [], []>} : vector<2x32xf32>, vector<32x128xf32>, vector<2x128xf32> -> vector<2x128xf32>
    %577 = arith.addf %575, %576 : vector<2x128xf32>
    %578 = arith.negf %577 : vector<2x128xf32>
    %579 = math.exp %578 : vector<2x128xf32>
    %cst_130 = arith.constant 1.000000e+00 : f32
    %580 = vector.broadcast %cst_130 : f32 to vector<2x128xf32>
    %581 = arith.addf %580, %579 : vector<2x128xf32>
    %582 = arith.divf %580, %581 : vector<2x128xf32>
    %583 = math.tanh %577 : vector<2x128xf32>
    %584 = vector.extract_strided_slice %582 {offsets = [0, 0], sizes = [2, 32], strides = [1, 1]} : vector<2x128xf32> to vector<2x32xf32>
    %585 = vector.extract_strided_slice %582 {offsets = [0, 32], sizes = [2, 32], strides = [1, 1]} : vector<2x128xf32> to vector<2x32xf32>
    %586 = vector.extract_strided_slice %583 {offsets = [0, 64], sizes = [2, 32], strides = [1, 1]} : vector<2x128xf32> to vector<2x32xf32>
    %587 = vector.extract_strided_slice %582 {offsets = [0, 96], sizes = [2, 32], strides = [1, 1]} : vector<2x128xf32> to vector<2x32xf32>
    %588 = arith.mulf %585, %572 : vector<2x32xf32>
    %589 = arith.mulf %584, %586 : vector<2x32xf32>
    %590 = arith.addf %588, %589 : vector<2x32xf32>
    %591 = math.tanh %590 : vector<2x32xf32>
    %592 = arith.mulf %587, %591 : vector<2x32xf32>
    %593 = vector.extract_strided_slice %553 {offsets = [10, 0], sizes = [2, 128], strides = [1, 1]} : vector<16x128xf32> to vector<2x128xf32>
    %cst_131 = arith.constant dense<0.000000e+00> : vector<2x128xf32>
    %594 = tpu.matmul %592, %554, %cst_131 {dimension_numbers = #tpu.dot_dimension_numbers<[1], [0], [0], [1], [0, 0, 1, 1], [], []>} : vector<2x32xf32>, vector<32x128xf32>, vector<2x128xf32> -> vector<2x128xf32>
    %595 = arith.addf %593, %594 : vector<2x128xf32>
    %596 = arith.negf %595 : vector<2x128xf32>
    %597 = math.exp %596 : vector<2x128xf32>
    %cst_132 = arith.constant 1.000000e+00 : f32
    %598 = vector.broadcast %cst_132 : f32 to vector<2x128xf32>
    %599 = arith.addf %598, %597 : vector<2x128xf32>
    %600 = arith.divf %598, %599 : vector<2x128xf32>
    %601 = math.tanh %595 : vector<2x128xf32>
    %602 = vector.extract_strided_slice %600 {offsets = [0, 0], sizes = [2, 32], strides = [1, 1]} : vector<2x128xf32> to vector<2x32xf32>
    %603 = vector.extract_strided_slice %600 {offsets = [0, 32], sizes = [2, 32], strides = [1, 1]} : vector<2x128xf32> to vector<2x32xf32>
    %604 = vector.extract_strided_slice %601 {offsets = [0, 64], sizes = [2, 32], strides = [1, 1]} : vector<2x128xf32> to vector<2x32xf32>
    %605 = vector.extract_strided_slice %600 {offsets = [0, 96], sizes = [2, 32], strides = [1, 1]} : vector<2x128xf32> to vector<2x32xf32>
    %606 = arith.mulf %603, %590 : vector<2x32xf32>
    %607 = arith.mulf %602, %604 : vector<2x32xf32>
    %608 = arith.addf %606, %607 : vector<2x32xf32>
    %609 = math.tanh %608 : vector<2x32xf32>
    %610 = arith.mulf %605, %609 : vector<2x32xf32>
    %611 = vector.extract_strided_slice %553 {offsets = [8, 0], sizes = [2, 128], strides = [1, 1]} : vector<16x128xf32> to vector<2x128xf32>
    %cst_133 = arith.constant dense<0.000000e+00> : vector<2x128xf32>
    %612 = tpu.matmul %610, %554, %cst_133 {dimension_numbers = #tpu.dot_dimension_numbers<[1], [0], [0], [1], [0, 0, 1, 1], [], []>} : vector<2x32xf32>, vector<32x128xf32>, vector<2x128xf32> -> vector<2x128xf32>
    %613 = arith.addf %611, %612 : vector<2x128xf32>
    %614 = arith.negf %613 : vector<2x128xf32>
    %615 = math.exp %614 : vector<2x128xf32>
    %cst_134 = arith.constant 1.000000e+00 : f32
    %616 = vector.broadcast %cst_134 : f32 to vector<2x128xf32>
    %617 = arith.addf %616, %615 : vector<2x128xf32>
    %618 = arith.divf %616, %617 : vector<2x128xf32>
    %619 = math.tanh %613 : vector<2x128xf32>
    %620 = vector.extract_strided_slice %618 {offsets = [0, 0], sizes = [2, 32], strides = [1, 1]} : vector<2x128xf32> to vector<2x32xf32>
    %621 = vector.extract_strided_slice %618 {offsets = [0, 32], sizes = [2, 32], strides = [1, 1]} : vector<2x128xf32> to vector<2x32xf32>
    %622 = vector.extract_strided_slice %619 {offsets = [0, 64], sizes = [2, 32], strides = [1, 1]} : vector<2x128xf32> to vector<2x32xf32>
    %623 = vector.extract_strided_slice %618 {offsets = [0, 96], sizes = [2, 32], strides = [1, 1]} : vector<2x128xf32> to vector<2x32xf32>
    %624 = arith.mulf %621, %608 : vector<2x32xf32>
    %625 = arith.mulf %620, %622 : vector<2x32xf32>
    %626 = arith.addf %624, %625 : vector<2x32xf32>
    %627 = math.tanh %626 : vector<2x32xf32>
    %628 = arith.mulf %623, %627 : vector<2x32xf32>
    %629 = vector.extract_strided_slice %553 {offsets = [6, 0], sizes = [2, 128], strides = [1, 1]} : vector<16x128xf32> to vector<2x128xf32>
    %cst_135 = arith.constant dense<0.000000e+00> : vector<2x128xf32>
    %630 = tpu.matmul %628, %554, %cst_135 {dimension_numbers = #tpu.dot_dimension_numbers<[1], [0], [0], [1], [0, 0, 1, 1], [], []>} : vector<2x32xf32>, vector<32x128xf32>, vector<2x128xf32> -> vector<2x128xf32>
    %631 = arith.addf %629, %630 : vector<2x128xf32>
    %632 = arith.negf %631 : vector<2x128xf32>
    %633 = math.exp %632 : vector<2x128xf32>
    %cst_136 = arith.constant 1.000000e+00 : f32
    %634 = vector.broadcast %cst_136 : f32 to vector<2x128xf32>
    %635 = arith.addf %634, %633 : vector<2x128xf32>
    %636 = arith.divf %634, %635 : vector<2x128xf32>
    %637 = math.tanh %631 : vector<2x128xf32>
    %638 = vector.extract_strided_slice %636 {offsets = [0, 0], sizes = [2, 32], strides = [1, 1]} : vector<2x128xf32> to vector<2x32xf32>
    %639 = vector.extract_strided_slice %636 {offsets = [0, 32], sizes = [2, 32], strides = [1, 1]} : vector<2x128xf32> to vector<2x32xf32>
    %640 = vector.extract_strided_slice %637 {offsets = [0, 64], sizes = [2, 32], strides = [1, 1]} : vector<2x128xf32> to vector<2x32xf32>
    %641 = vector.extract_strided_slice %636 {offsets = [0, 96], sizes = [2, 32], strides = [1, 1]} : vector<2x128xf32> to vector<2x32xf32>
    %642 = arith.mulf %639, %626 : vector<2x32xf32>
    %643 = arith.mulf %638, %640 : vector<2x32xf32>
    %644 = arith.addf %642, %643 : vector<2x32xf32>
    %645 = math.tanh %644 : vector<2x32xf32>
    %646 = arith.mulf %641, %645 : vector<2x32xf32>
    %647 = vector.extract_strided_slice %553 {offsets = [4, 0], sizes = [2, 128], strides = [1, 1]} : vector<16x128xf32> to vector<2x128xf32>
    %cst_137 = arith.constant dense<0.000000e+00> : vector<2x128xf32>
    %648 = tpu.matmul %646, %554, %cst_137 {dimension_numbers = #tpu.dot_dimension_numbers<[1], [0], [0], [1], [0, 0, 1, 1], [], []>} : vector<2x32xf32>, vector<32x128xf32>, vector<2x128xf32> -> vector<2x128xf32>
    %649 = arith.addf %647, %648 : vector<2x128xf32>
    %650 = arith.negf %649 : vector<2x128xf32>
    %651 = math.exp %650 : vector<2x128xf32>
    %cst_138 = arith.constant 1.000000e+00 : f32
    %652 = vector.broadcast %cst_138 : f32 to vector<2x128xf32>
    %653 = arith.addf %652, %651 : vector<2x128xf32>
    %654 = arith.divf %652, %653 : vector<2x128xf32>
    %655 = math.tanh %649 : vector<2x128xf32>
    %656 = vector.extract_strided_slice %654 {offsets = [0, 0], sizes = [2, 32], strides = [1, 1]} : vector<2x128xf32> to vector<2x32xf32>
    %657 = vector.extract_strided_slice %654 {offsets = [0, 32], sizes = [2, 32], strides = [1, 1]} : vector<2x128xf32> to vector<2x32xf32>
    %658 = vector.extract_strided_slice %655 {offsets = [0, 64], sizes = [2, 32], strides = [1, 1]} : vector<2x128xf32> to vector<2x32xf32>
    %659 = vector.extract_strided_slice %654 {offsets = [0, 96], sizes = [2, 32], strides = [1, 1]} : vector<2x128xf32> to vector<2x32xf32>
    %660 = arith.mulf %657, %644 : vector<2x32xf32>
    %661 = arith.mulf %656, %658 : vector<2x32xf32>
    %662 = arith.addf %660, %661 : vector<2x32xf32>
    %663 = math.tanh %662 : vector<2x32xf32>
    %664 = arith.mulf %659, %663 : vector<2x32xf32>
    %665 = vector.extract_strided_slice %553 {offsets = [2, 0], sizes = [2, 128], strides = [1, 1]} : vector<16x128xf32> to vector<2x128xf32>
    %cst_139 = arith.constant dense<0.000000e+00> : vector<2x128xf32>
    %666 = tpu.matmul %664, %554, %cst_139 {dimension_numbers = #tpu.dot_dimension_numbers<[1], [0], [0], [1], [0, 0, 1, 1], [], []>} : vector<2x32xf32>, vector<32x128xf32>, vector<2x128xf32> -> vector<2x128xf32>
    %667 = arith.addf %665, %666 : vector<2x128xf32>
    %668 = arith.negf %667 : vector<2x128xf32>
    %669 = math.exp %668 : vector<2x128xf32>
    %cst_140 = arith.constant 1.000000e+00 : f32
    %670 = vector.broadcast %cst_140 : f32 to vector<2x128xf32>
    %671 = arith.addf %670, %669 : vector<2x128xf32>
    %672 = arith.divf %670, %671 : vector<2x128xf32>
    %673 = math.tanh %667 : vector<2x128xf32>
    %674 = vector.extract_strided_slice %672 {offsets = [0, 0], sizes = [2, 32], strides = [1, 1]} : vector<2x128xf32> to vector<2x32xf32>
    %675 = vector.extract_strided_slice %672 {offsets = [0, 32], sizes = [2, 32], strides = [1, 1]} : vector<2x128xf32> to vector<2x32xf32>
    %676 = vector.extract_strided_slice %673 {offsets = [0, 64], sizes = [2, 32], strides = [1, 1]} : vector<2x128xf32> to vector<2x32xf32>
    %677 = vector.extract_strided_slice %672 {offsets = [0, 96], sizes = [2, 32], strides = [1, 1]} : vector<2x128xf32> to vector<2x32xf32>
    %678 = arith.mulf %675, %662 : vector<2x32xf32>
    %679 = arith.mulf %674, %676 : vector<2x32xf32>
    %680 = arith.addf %678, %679 : vector<2x32xf32>
    %681 = math.tanh %680 : vector<2x32xf32>
    %682 = arith.mulf %677, %681 : vector<2x32xf32>
    %683 = vector.extract_strided_slice %553 {offsets = [0, 0], sizes = [2, 128], strides = [1, 1]} : vector<16x128xf32> to vector<2x128xf32>
    %cst_141 = arith.constant dense<0.000000e+00> : vector<2x128xf32>
    %684 = tpu.matmul %682, %554, %cst_141 {dimension_numbers = #tpu.dot_dimension_numbers<[1], [0], [0], [1], [0, 0, 1, 1], [], []>} : vector<2x32xf32>, vector<32x128xf32>, vector<2x128xf32> -> vector<2x128xf32>
    %685 = arith.addf %683, %684 : vector<2x128xf32>
    %686 = arith.negf %685 : vector<2x128xf32>
    %687 = math.exp %686 : vector<2x128xf32>
    %cst_142 = arith.constant 1.000000e+00 : f32
    %688 = vector.broadcast %cst_142 : f32 to vector<2x128xf32>
    %689 = arith.addf %688, %687 : vector<2x128xf32>
    %690 = arith.divf %688, %689 : vector<2x128xf32>
    %691 = math.tanh %685 : vector<2x128xf32>
    %692 = vector.extract_strided_slice %690 {offsets = [0, 0], sizes = [2, 32], strides = [1, 1]} : vector<2x128xf32> to vector<2x32xf32>
    %693 = vector.extract_strided_slice %690 {offsets = [0, 32], sizes = [2, 32], strides = [1, 1]} : vector<2x128xf32> to vector<2x32xf32>
    %694 = vector.extract_strided_slice %691 {offsets = [0, 64], sizes = [2, 32], strides = [1, 1]} : vector<2x128xf32> to vector<2x32xf32>
    %695 = arith.mulf %693, %680 : vector<2x32xf32>
    %696 = arith.mulf %692, %694 : vector<2x32xf32>
    %697 = arith.addf %695, %696 : vector<2x32xf32>
    %698 = tpu.concatenate %242, %398, %552, %697 in 1 : vector<2x32xf32>, vector<2x32xf32>, vector<2x32xf32>, vector<2x32xf32> -> vector<2x128xf32>
    %c0_143 = arith.constant 0 : index
    %c0_144 = arith.constant 0 : index
    %699 = vector.load %arg10[%c0_143, %c0_144] : memref<128x6xf32, #tpu.memory_space<vmem>>, vector<128x6xf32>
    %cst_145 = arith.constant dense<0.000000e+00> : vector<2x6xf32>
    %700 = tpu.matmul %698, %699, %cst_145 {dimension_numbers = #tpu.dot_dimension_numbers<[1], [0], [0], [1], [0, 0, 1, 1], [], []>} : vector<2x128xf32>, vector<128x6xf32>, vector<2x6xf32> -> vector<2x6xf32>
    %c0_146 = arith.constant 0 : index
    %c0_147 = arith.constant 0 : index
    %701 = vector.load %arg11[%c0_146, %c0_147] : memref<1x6xf32, #tpu.memory_space<vmem>>, vector<1x6xf32>
    %702 = vector.broadcast %701 : vector<1x6xf32> to vector<2x6xf32>
    %703 = arith.addf %700, %702 : vector<2x6xf32>
    %704 = arith.negf %703 : vector<2x6xf32>
    %705 = math.exp %704 : vector<2x6xf32>
    %cst_148 = arith.constant 1.000000e+00 : f32
    %706 = vector.broadcast %cst_148 : f32 to vector<2x6xf32>
    %707 = arith.addf %706, %705 : vector<2x6xf32>
    %708 = arith.divf %706, %707 : vector<2x6xf32>
    %c0_149 = arith.constant 0 : index
    %c0_150 = arith.constant 0 : index
    %709 = vector.load %arg12[%c0_149, %c0_150] : memref<2x6xf32, #tpu.memory_space<vmem>>, vector<2x6xf32>
    tpu.vector_store %arg12[%c0_149, %c0_150], %708 {strides = array<i32>} : memref<2x6xf32, #tpu.memory_space<vmem>>, vector<2x6xf32>,
    return
  }
}

</mosaic_0001>

<bundles_post_ra>
// kernel: bilstm_forward.1
= control target key start
LH: loop header
LB: loop body
LE: loop exit
PB: predicated region body
PF: predicated region fallthrough
CT: control target
= control target key end

     0   :  { %17 = vsyncpa [#allocation4], 0  ;;  %s6363_s0 = inlined_call_operand.vmem [shape: s32[16,1], index: 0, kind: input, shape index: {}]   ;;  %s6364_s1 = inlined_call_operand.vmem [shape: f32[50,16], index: 1, kind: input, shape index: {}]   ;;  %s6365_s2 = inlined_call_operand.vmem [shape: f32[16,256], index: 2, kind: input, shape index: {}]   ;;  %s6366_s3 = inlined_call_operand.hbm [shape: f32[1,256], index: 3, kind: input, shape index: {}]   ;;  %s6367_s4 = inlined_call_operand.vmem [shape: f32[32,128], index: 4, kind: input, shape index: {}]   ;;  %s6368_s5 = inlined_call_operand.vmem [shape: f32[32,128], index: 5, kind: input, shape index: {}]   ;;  %s6369_s6 = inlined_call_operand.vmem [shape: f32[64,256], index: 6, kind: input, shape index: {}]   ;;  %s6370_s7 = inlined_call_operand.hbm [shape: f32[1,256], index: 7, kind: input, shape index: {}]   ;;  %s6371_s8 = inlined_call_operand.vmem [shape: f32[32,128], index: 8, kind: input, shape index: {}]   ;;  %s6372_s9 = inlined_call_operand.hbm [shape: f32[32,128], index: 9, kind: input, shape index: {}]   ;;  %s6373_s10 = inlined_call_operand.vmem [shape: f32[128,6], index: 10, kind: input, shape index: {}]   ;;  %s6374_s11 = inlined_call_operand.hbm [shape: f32[1,6], index: 11, kind: input, shape index: {}]   ;;  %s6375_s12 = inlined_call_operand.hbm [shape: f32[2,6], index: 12, kind: output, shape index: {}]  }
   0x1   :  { %18 = vsyncpa [#allocation7], 0 }
   0x2   :  { %19 = vsyncpa [#allocation10], 0 }
   0x3   :  { %20 = vsyncpa [#allocation5], 0  ;;  %s5404_s21 = smov [#allocation6]   ;;  %s5405_s23 = smov [#allocation3]  }
   0x4   :  { %s49_s22 = sshll.u32 %s5404_s21, 4  ;;  %s33_s24 = sshll.u32 %s5405_s23, 4  ;;  %s50_s22 = int_to_ptr.vmem [resolvable:$true] %s49_s22  ;;  %s34_s24 = int_to_ptr.vmem [resolvable:$true] %s33_s24 }
   0x5   :  { %s5286_s27 = scalar_lea.hbm %s6370_s7, 32 }
   0x6   :  { %p5287_p0 = scmp.ne.s32.totalorder %s6370_s7, %s5286_s27  ;;  %p5290_p1 = scmp.lt.u32.totalorder %s5286_s27, %s6370_s7 }
   0x8   :  { %p5292_p2 = pnand %p5290_p1, %p5287_p0 }
   0xa   :  { %5295 = shalt.err (!%p5292_p2)
}
   0xb   :  { %s5296_s14 = scalar_lea.vmem %s50_s22, 32  ;;  %p5301_p4 = scmp.lt.s32.totalorder %s50_s22, %s50_s22 }
   0xc   :  { %p5297_p3 = scmp.ne.s32.totalorder %s50_s22, %s5296_s14  ;;  %p5302_p5 = scmp.lt.s32.totalorder %s5296_s14, %s5296_s14 }
   0xe   :  { %p5303_p6 = por %p5302_p5, %p5301_p4 }
  0x10   :  { %p5304_p7 = pnand %p5303_p6, %p5297_p3 }
  0x12   :  { %5307 = shalt.err (!%p5304_p7)
}
  0x13   :  { %52 = dma.hbm_to_vmem [thread:$0]  %s6370_s7, 32, %s50_s22, [#allocation7]  }
  0x14   :  { %s5308_s19 = scalar_lea.hbm %s6366_s3, 32 }
  0x15   :  { %p5309_p8 = scmp.ne.s32.totalorder %s6366_s3, %s5308_s19  ;;  %p5312_p9 = scmp.lt.u32.totalorder %s5308_s19, %s6366_s3 }
  0x17   :  { %p5314_p10 = pnand %p5312_p9, %p5309_p8 }
  0x19   :  { %5317 = shalt.err (!%p5314_p10)
}
  0x1a   :  { %s5318_s26 = scalar_lea.vmem %s34_s24, 32  ;;  %p5323_p12 = scmp.lt.s32.totalorder %s34_s24, %s34_s24 }
  0x1b   :  { %p5319_p11 = scmp.ne.s32.totalorder %s34_s24, %s5318_s26  ;;  %p5324_p13 = scmp.lt.s32.totalorder %s5318_s26, %s5318_s26 }
  0x1d   :  { %p5325_p0 = por %p5324_p13, %p5323_p12 }
  0x1f   :  { %p5326_p1 = pnand %p5325_p0, %p5319_p11 }
  0x21   :  { %5329 = shalt.err (!%p5326_p1)
}
  0x22   :  { %36 = dma.hbm_to_vmem [thread:$0]  %s6366_s3, 32, %s34_s24, [#allocation4]  }
  0x23   :  { %s5406_s27 = smov [#allocation8]   ;;  %s5330_s13 = scalar_lea.hbm %s6372_s9, 512 }
  0x24   :  { %s60_s28 = sshll.u32 %s5406_s27, 4  ;;  %p5331_p2 = scmp.ne.s32.totalorder %s6372_s9, %s5330_s13  ;;  %s61_s28 = int_to_ptr.vmem [resolvable:$true] %s60_s28 }
  0x25   :  { %p5334_p3 = scmp.lt.u32.totalorder %s5330_s13, %s6372_s9 }
  0x27   :  { %p5336_p4 = pnand %p5334_p3, %p5331_p2 }
  0x29   :  { %5339 = shalt.err (!%p5336_p4)
}
  0x2a   :  { %s5340_s18 = scalar_lea.vmem %s61_s28, 512  ;;  %p5345_p6 = scmp.lt.s32.totalorder %s61_s28, %s61_s28 }
  0x2b   :  { %p5341_p5 = scmp.ne.s32.totalorder %s61_s28, %s5340_s18  ;;  %p5346_p7 = scmp.lt.s32.totalorder %s5340_s18, %s5340_s18 }
  0x2d   :  { %p5347_p8 = por %p5346_p7, %p5345_p6 }
  0x2f   :  { %p5348_p9 = pnand %p5347_p8, %p5341_p5 }
  0x31   :  { %5351 = shalt.err (!%p5348_p9)
}
  0x32   :  { %s5407_s3 = smov 128   ;;  %s5408_s24 = smov 8  }
  0x33   :  { %66 = dma.hbm_to_vmem [thread:$0]  %s6372_s9, 512, %s61_s28, [#allocation7], %s5407_s3, %s5407_s3, %s5408_s24  }
  0x34   :  { %s5409_s21 = smov [#allocation9]   ;;  %s5352_s7 = scalar_lea.hbm %s6374_s11, 16 }
  0x35   :  { %s75_s23 = sshll.u32 %s5409_s21, 4  ;;  %p5353_p10 = scmp.ne.s32.totalorder %s6374_s11, %s5352_s7  ;;  %s76_s23 = int_to_ptr.vmem [resolvable:$true] %s75_s23 }
  0x36   :  { %p5356_p11 = scmp.lt.u32.totalorder %s5352_s7, %s6374_s11 }
  0x38   :  { %p5358_p12 = pnand %p5356_p11, %p5353_p10 }
  0x3a   :  { %5361 = shalt.err (!%p5358_p12)
}
  0x3b   :  { %s5362_s13 = scalar_lea.vmem %s76_s23, 16  ;;  %s5366_s9 = scalar_lea.vmem %s76_s23, 32 }
  0x3c   :  { %p5363_p13 = scmp.ne.s32.totalorder %s76_s23, %s5362_s13  ;;  %p5367_p0 = scmp.lt.s32.totalorder %s76_s23, %s76_s23 }
  0x3d   :  { %p5368_p1 = scmp.lt.s32.totalorder %s5366_s9, %s5362_s13 }
  0x3f   :  { %p5369_p2 = por %p5368_p1, %p5367_p0 }
  0x41   :  { %p5370_p3 = pnand %p5369_p2, %p5363_p13 }
  0x43   :  { %5373 = shalt.err (!%p5370_p3)
}
  0x44   :  { %78 = dma.hbm_to_vmem [thread:$0]  %s6374_s11, 16, %s76_s23, [#allocation10]  }
  0x45   :  { %5396 = dma.done.wait [#allocation4], 32  }
  0x46   :  { %5397 = vsyncadd [#allocation4], 4294967264 }
  0x47   :  { %5398 = dma.done.wait [#allocation7], 544  }
  0x48   :  { %5399 = vsyncadd [#allocation7], 4294966752 }
  0x49   :  { %5400 = dma.done.wait [#allocation10], 16  }
  0x4a   :  { %5401 = vsyncadd [#allocation10], 4294967280  ;;  %v5410_v0 = vmov 0   ;;  %v91_v1 = vld [vmem:[%s6363_s0] sm:$0xff]  ;;  %v108_v3 = vld [vmem:[%s6364_s1 + $0x8] sm:$0xff]  ;;  %vm121_vm0 = vcmask 1041408   ;;  %v93_v13 = vlaneseq }
  0x4b   :  { %5025 = vset.pattern.permute.xlu0 %v5410_v0  ;;  %v107_v2 = vld [vmem:[%s6364_s1] sm:$0xff]  ;;  %v109_v4 = vld [vmem:[%s6364_s1 + $0x10] sm:$0xff]  ;;  %v110_v5 = vld [vmem:[%s6364_s1 + $0x18] sm:$0xff]  ;;  %vm114_vm1 = vcmask 408576   ;;  %v5411_v16 = vmov 0.0   ;;  %vm227_vm4 = vcmask 130048  }
  0x4c   :  { %96 = vperm.xlu0 %5025, %v91_v1   ;;  %v92_v6 = vld [vmem:[%s6363_s0 + $0x8] sm:$0xff]  ;;  %v4763_v7 = vpack.c.bf16 %v108_v3, %v107_v2  ;;  %v4767_v8 = vpack.c.bf16 %v110_v5, %v109_v4  ;;  %v111_v9 = vld [vmem:[%s6364_s1 + $0x20] sm:$0xff]  ;;  %v113_v12 = vld [vmem:[%s6364_s1 + $0x30] sm:$0x3]  ;;  %v94_v14 = vand.u32 127, %v93_v13  ;;  %v5412_v33 = vmov 0.0|0.0  }
  0x4d   :  { %v112_v10 = vld [vmem:[%s6364_s1 + $0x28] sm:$0xff]  ;;  %v315_v29 = vld [vmem:[%s6365_s2 + $0x18] sm:$0xff]  ;;  %v312_v30 = vld [vmem:[%s6365_s2] sm:$0xff]  ;;  %4791 = vmatprep.subr.bf16.mxu0 %v5412_v33  ;;  %vm5413_vm5 = vmmov 0   ;;  %v5611_v41 = vshrl.u32 %v93_v13, 7  ;;  %s5415_s21 = smov 32  }
  0x4e   :  { %4764 = vmatprep.subr.bf16.mxu1 %v4763_v7  ;;  %v4771_v11 = vpack.c.bf16 %v112_v10, %v111_v9  ;;  %v313_v28 = vld [vmem:[%s6365_s2 + $0x8] sm:$0xff]  ;;  %v314_v32 = vld [vmem:[%s6365_s2 + $0x10] sm:$0xff]  ;;  %v411_v35 = vld [vmem:[%s6367_s4] sm:$0xff]  ;;  %4406 = vmatprep.mubr.msk.f32.mxu0 %vm5413_vm5, %v5411_v16  ;;  %vm518_vm10 = vcmask 254976   ;;  %vm415_vm11 = vcmask 261120   ;;  %vm627_vm12 = vcmask 257026  }
  0x4f   :  { %4766 = vmatpush3.bf16.msra.mxu1 %v4763_v7  ;;  %v4775_v31 = vpack.c.bf16 %v315_v29, %v313_v28  ;;  %v4777_v34 = vpack.c.bf16 %v314_v32, %v312_v30  ;;  %v412_v36 = vld [vmem:[%s6367_s4 + $0x8] sm:$0xff]  ;;  %v413_v38 = vld [vmem:[%s6367_s4 + $0x10] sm:$0xff]  ;;  %v414_v39 = vld [vmem:[%s6367_s4 + $0x18] sm:$0xff]  ;;  %v202_v42 = vadd.s32 8, %v5611_v41  ;;  %v207_v45 = vand.u32 1, %v5611_v41  ;;  %s5414_s4 = smov 64  }
  0x50   :  { %99 = vperm.xlu0 %5025, %v92_v6   ;;  %4768 = vmatprep.subr.bf16.mxu1 %v4767_v8  ;;  %v5595_v37 = vpack.c.bf16 %v412_v36, %v411_v35  ;;  %v5605_v40 = vpack.c.bf16 %v414_v39, %v413_v38  ;;  %vm851_vm13 = vcmask 261126   ;;  %vm739_vm14 = vcmask 259076   ;;  %s5416_s16 = smov 96  }
  0x51   :  { %v214_v43 = vand.u32 1, %v202_v42  ;;  %vm5623_vm8 = vcmp.eq.s32.totalorder %v207_v45, 0  ;;  %vm5627_vm9 = vcmp.eq.s32.totalorder %v207_v45, 1  ;;  %vm1509_vm15 = vcmask 521476  }
  0x52   :  { %4793 = vmatpush3.bf16.msra.mxu0 %v5595_v37 }
  0x53   :  { %4770 = vmatpush3.bf16.msra.mxu1 %v4767_v8  ;;  %4794 = vmatprep.subr.bf16.mxu0 %v5412_v33  ;;  %vm5615_vm6 = vcmp.eq.s32.totalorder %v214_v43, 0  ;;  %vm5619_vm7 = vcmp.eq.s32.totalorder %v214_v43, 1 }
  0x54   :  { %4772 = vmatprep.subr.bf16.mxu1 %v4771_v11 }
  0x56   :  { %4796 = vmatpush3.bf16.msra.mxu0 %v5605_v40 }
  0x57   :  { %4774 = vmatpush3.bf16.msra.mxu1 %v4771_v11  ;;  %4803 = vmatprep.subr.bf16.mxu0 %v5412_v33 }
  0x58   :  { %4371 = vmatprep.subr.msk.mxu1 %vm121_vm0, %v113_v12 }
  0x5b   :  { %4372 = vmatpush3.msk.msra.mxu1 %vm121_vm0, %v113_v12  ;;  %vm1397_vm0 = vcmask 523526  }
  0x5c   :  { %4776 = vmatprep.subr.bf16.mxu1 %v4775_v31 }
  0xcb   :  { %v97_v15 = vpop.permute.xlu0 %96 }
  0xcc   :  { %vm101_vm2 = vcmp.eq.s32.totalorder %v97_v15, %v94_v14 }
  0xcd   :  { %v4102_v17 = vsel %vm101_vm2, 1.0, %v5411_v16  ;;  %vm1730_vm2 = vcmask 517376  }
  0xce   :  { %4373 = vmatprep.mubr.msk.f32.mxu1 %vm114_vm1, %v4102_v17 }
  0xcf   :  { %v100_v18 = vpop.permute.xlu0 %99 }
  0xd0   :  { %vm102_vm3 = vcmp.eq.s32.totalorder %v100_v18, %v94_v14 }
  0xd1   :  { %v4103_v19 = vsel %vm102_vm3, 1.0, %v5411_v16  ;;  %vm2202_vm3 = vcmask 523264  }
  0xd2   :  { %4374 = vmatmul.mubr.msk.f32.vlgmr.msra.gmra.mrb[0].mxu1 %vm114_vm1, %v4103_v19  ;;  %vm1621_vm1 = vcmask 519426  }
  0xd3   :  { %398 = vmatprep.mubr.f32.mxu1 %v5411_v16  ;;  %4778 = vmatpush1.bf16.msra.mxu1 %v4777_v34 }
  0xd4   :  { %4779 = vmatprep.subr.bf16.mxu1 %v5412_v33 }
 0x1a5   :  { %v5561_v20 = vpop.f32.mrb[0].mxu1 }
 0x1a6   :  { %v5563_v21 = vpop.f32.mrb[1].mxu1  ;;  %v231_v22 = vsel %vm227_vm4, %v5561_v20, 0.0  ;;  %v238_v26 = vmul.f32 %v5561_v20, %v5561_v20 }
 0x1a7   :  { %232 = vadd.xlane.f32.xlu1 %v231_v22  ;;  %v237_v23 = vmul.f32 %v5563_v21, %v5563_v21  ;;  %v228_v25 = vsel %vm227_vm4, %v5563_v21, 0.0 }
 0x1a8   :  { %v242_v27 = vsel %vm227_vm4, %v238_v26, 0.0 }
 0x1a9   :  { %v239_v24 = vsel %vm227_vm4, %v237_v23, 0.0 }
 0x1aa   :  { %240 = vadd.xlane.f32.xlu0 %v239_v24 }
 0x1ab   :  { %229 = vadd.xlane.f32.xlu1 %v228_v25 }
 0x1af   :  { %243 = vadd.xlane.f32.xlu1 %v242_v27 }
 0x234   :  { %v233_v44 = vpop.xlane.xlu1 %232 }
 0x235   :  { %v236_v46 = vmul.f32 0.0625, %v233_v44 }
 0x237   :  { %v241_v51 = vpop.xlane.xlu0 %240  ;;  %v250_v54 = vsel %vm5615_vm6, %v236_v46, 0.0  ;;  %v277_v55 = vsel %vm5619_vm7, %v236_v46, 0.0 }
 0x238   :  { %v230_v52 = vpop.xlane.xlu1 %229  ;;  %v245_v56 = vmul.f32 0.0625, %v241_v51 }
 0x239   :  { %v235_v53 = vmul.f32 0.0625, %v230_v52 }
 0x23a   :  { %v260_v1 = vsel %vm5623_vm8, %v245_v56, 0.0  ;;  %v286_v2 = vsel %vm5627_vm9, %v245_v56, 0.0 }
 0x23b   :  { %v249_v57 = vsel %vm5623_vm8, %v235_v53, 0.0  ;;  %v276_v58 = vsel %vm5627_vm9, %v235_v53, 0.0 }
 0x23c   :  { %v251_v59 = vadd.f32 %v250_v54, %v249_v57  ;;  %v278_v60 = vadd.f32 %v277_v55, %v276_v58  ;;  %v244_v61 = vpop.xlane.xlu1 %243 }
 0x23d   :  { %v246_v62 = vmul.f32 0.0625, %v244_v61  ;;  %v320_v61 = vsub.s32 0, %v5611_v41 }
 0x23e   :  { %v252_v63 = vrot.slane %v251_v59, 4  ;;  %v279_v0 = vrot.slane %v278_v60, 4 }
 0x23f   :  { %v261_v3 = vsel %vm5615_vm6, %v246_v62, 0.0  ;;  %v287_v4 = vsel %vm5619_vm7, %v246_v62, 0.0 }
 0x240   :  { %v253_v5 = vadd.f32 %v252_v63, %v251_v59  ;;  %v280_v6 = vadd.f32 %v279_v0, %v278_v60  ;;  %v262_v7 = vadd.f32 %v261_v3, %v260_v1  ;;  %v288_v8 = vadd.f32 %v287_v4, %v286_v2 }
 0x242   :  { %v254_v9 = vrot.slane %v253_v5, 2  ;;  %v281_v10 = vrot.slane %v280_v6, 2  ;;  %v263_v11 = vrot.slane %v262_v7, 4  ;;  %v289_v12 = vrot.slane %v288_v8, 4 }
 0x244   :  { %v255_v13 = vadd.f32 %v254_v9, %v253_v5  ;;  %v282_v14 = vadd.f32 %v281_v10, %v280_v6  ;;  %v264_v15 = vadd.f32 %v263_v11, %v262_v7  ;;  %v290_v17 = vadd.f32 %v289_v12, %v288_v8 }
 0x246   :  { %v256_v18 = vrot.slane %v255_v13, 1  ;;  %v283_v19 = vrot.slane %v282_v14, 1  ;;  %v265_v22 = vrot.slane %v264_v15, 2  ;;  %v291_v23 = vrot.slane %v290_v17, 2 }
 0x248   :  { %v257_v24 = vadd.f32 %v256_v18, %v255_v13  ;;  %v284_v25 = vadd.f32 %v283_v19, %v282_v14  ;;  %v266_v26 = vadd.f32 %v265_v22, %v264_v15  ;;  %v292_v27 = vadd.f32 %v291_v23, %v290_v17 }
 0x24a   :  { %v259_v28 = vmul.f32 0.125, %v257_v24  ;;  %v285_v29 = vmul.f32 0.125, %v284_v25  ;;  %v267_v30 = vrot.slane %v266_v26, 1  ;;  %v293_v31 = vrot.slane %v292_v27, 1 }
 0x24c   :  { %v270_v32 = vsel %vm5623_vm8, %v259_v28, 0.0  ;;  %v268_v34 = vadd.f32 %v267_v30, %v266_v26  ;;  %v294_v35 = vadd.f32 %v293_v31, %v292_v27  ;;  %v271_v36 = vsel %vm5615_vm6, %v259_v28, 0.0 }
 0x24d   :  { %v296_v38 = vsel %vm5627_vm9, %v285_v29, %v270_v32  ;;  %v297_v39 = vsel %vm5619_vm7, %v285_v29, %v271_v36 }
 0x24e   :  { %v269_v42 = vmul.f32 0.125, %v268_v34  ;;  %v295_v43 = vmul.f32 0.125, %v294_v35  ;;  %v300_v46 = vmul.f32 %v296_v38, %v296_v38  ;;  %v301_v51 = vmul.f32 %v297_v39, %v297_v39 }
 0x24f   :  { %v304_v49 = vsub.f32 %v5563_v21, %v296_v38  ;;  %v305_v60 = vsub.f32 %v5561_v20, %v297_v39  ;;  %v324_v20 = vsub.s32 1, %v5611_v41  ;;  %v316_v21 = vld [vmem:[#allocation3] sm:$0x3] }
 0x250   :  { %v272_v44 = vsel %vm5623_vm8, %v269_v42, 0.0  ;;  %v273_v45 = vsel %vm5615_vm6, %v269_v42, 0.0  ;;  %v321_v1 = vrot.slane %v316_v21, %v320_v61 }
 0x251   :  { %v298_v52 = vsel %vm5627_vm9, %v295_v43, %v272_v44  ;;  %v299_v53 = vsel %vm5619_vm7, %v295_v43, %v273_v45  ;;  %v5684_v50 = vrot.slane %v316_v21, %v324_v20 }
 0x252   :  { %v302_v54 = vsub.f32 %v298_v52, %v300_v46  ;;  %v303_v55 = vsub.f32 %v299_v53, %v301_v51 }
 0x254   :  { %v306_v56 = vadd.f32 1e-05, %v302_v54  ;;  %v307_v57 = vadd.f32 1e-05, %v303_v55 }
 0x256   :  { %5026 = vrsqrt.f32 %v306_v56 }
 0x257   :  { %5028 = vrsqrt.f32 %v307_v57 }
 0x260   :  { %v5027_v58 = vpop.eup %5026 }
 0x261   :  { %v310_v59 = vmul.f32 %v5027_v58, %v304_v49  ;;  %v5029_v47 = vpop.eup %5028 }
 0x262   :  { %v311_v48 = vmul.f32 %v5029_v47, %v305_v60 }
 0x263   :  { %4107 = vmatmul.mubr.msk.f32.vlgmr.msra.gmra.mrb[2].mxu1 %vm227_vm4, %v310_v59 }
 0x264   :  { %4781 = vmatpush3.bf16.msra.mxu1 %v5595_v37  ;;  %404 = vmatprep.mubr.f32.mxu1 %v5411_v16 }
 0x265   :  { %4782 = vmatprep.subr.bf16.mxu1 %v5412_v33 }
 0x267   :  { %4108 = vmatmul.mubr.msk.f32.gmra.mrb[4].mxu1 %vm227_vm4, %v311_v48  ;;  %vm3979_vm4 = vcmask 785408  }
 0x268   :  { %4784 = vmatpush3.bf16.msra.mxu1 %v5605_v40  ;;  %4384 = vmatprep.mubr.msk.f32.mxu1 %vm5413_vm5, %v5411_v16 }
 0x269   :  { %4785 = vmatprep.subr.bf16.mxu1 %v5412_v33 }
 0x26b   :  { %4385 = vmatmul.mubr.f32.vlgmr.msra.gmra.mrb[6].mxu1 %v5411_v16 }
 0x26c   :  { %4787 = vmatpush3.bf16.msra.mxu1 %v5595_v37  ;;  %4395 = vmatprep.mubr.msk.f32.mxu1 %vm5413_vm5, %v5411_v16 }
 0x26d   :  { %4788 = vmatprep.subr.bf16.mxu1 %v5412_v33 }
 0x270   :  { %4790 = vmatpush3.bf16.msra.mxu1 %v5605_v40 }
 0x271   :  { %4797 = vmatprep.subr.bf16.mxu1 %v5412_v33 }
 0x336   :  { %v400_v62 = vpop.f32.mrb[2].mxu1 }
 0x337   :  { %v402_v63 = vpop.f32.mrb[3].mxu1  ;;  %v5696_v5 = vadd.f32 %v400_v62, %v321_v1 }
 0x338   :  { %v5688_v0 = vadd.f32 %v402_v63, %v5684_v50 }
 0x33a   :  { %v406_v2 = vpop.f32.mrb[4].mxu1 }
 0x33b   :  { %v5692_v3 = vadd.f32 %v406_v2, %v321_v1  ;;  %v5694_v4 = vpop.f32.mrb[5].mxu1 }
 0x33e   :  { %v485_v6 = vpop.f32.mrb[6].mxu1 }
 0x33f   :  { %v489_v7 = vadd.f32 %v485_v6, %v5696_v5  ;;  %v4386_v8 = vpop.f32.mrb[7].mxu1 }
 0x341   :  { %5030 = vtanh.f32 %v489_v7  ;;  %v4109_v10 = vmul.f32 -1.442695, %v489_v7 }
 0x343   :  { %5032 = vpow2.f32 %v4109_v10 }
 0x34b   :  { %v5031_v9 = vpop.eup %5030 }
 0x34c   :  { %499 = vrot.lane.b32.xlu1 %v5031_v9, %s5414_s4 }
 0x34d   :  { %v5033_v11 = vpop.eup %5032 }
 0x34e   :  { %v493_v12 = vadd.f32 1.0, %v5033_v11 }
 0x350   :  { %5034 = vrcp.f32 %v493_v12 }
 0x35a   :  { %v5035_v13 = vpop.eup %5034 }
 0x35b   :  { %v497_v17 = vmul.f32 0.0, %v5035_v13 }
 0x3be   :  { %v500_v14 = vpop.permute.xlu1 %499 }
 0x3bf   :  { %v502_v15 = vmul.f32 %v5035_v13, %v500_v14 }
 0x3c1   :  { %504 = vrot.lane.b32.xlu1 %v502_v15, %s5415_s21 }
 0x433   :  { %v505_v18 = vpop.permute.xlu1 %504 }
 0x434   :  { %v507_v19 = vadd.f32 %v505_v18, %v497_v17 }
 0x436   :  { %5036 = vtanh.f32 %v507_v19  ;;  %v604_v39 = vrot.slane %v507_v19, 6 }
 0x440   :  { %v5037_v22 = vpop.eup %5036 }
 0x441   :  { %510 = vrot.lane.b32.xlu1 %v5037_v22, %s5414_s4 }
 0x4b3   :  { %v511_v23 = vpop.permute.xlu1 %510 }
 0x4b4   :  { %v513_v24 = vmul.f32 %v5035_v13, %v511_v23 }
 0x4b6   :  { %515 = vrot.lane.b32.xlu1 %v513_v24, %s5415_s21 }
 0x528   :  { %v516_v25 = vpop.permute.xlu1 %515 }
 0x529   :  { %519 = vst.msk [vmem:[#allocation2] sm:$0x3] %vm518_vm10, %v516_v25  ;;  %4396 = vmatmul.mubr.msk.f32.vlgmr.msra.gmra.mrb[8].mxu1 %vm415_vm11, %v516_v25 }
 0x52a   :  { %4799 = vmatpush3.bf16.msra.mxu1 %v5595_v37  ;;  %4417 = vmatprep.mubr.msk.f32.mxu1 %vm5413_vm5, %v5411_v16 }
 0x52b   :  { %4800 = vmatprep.subr.bf16.mxu1 %v5412_v33 }
 0x52e   :  { %4802 = vmatpush3.bf16.msra.mxu1 %v5605_v40 }
 0x52f   :  { %4809 = vmatprep.subr.bf16.mxu1 %v5412_v33 }
 0x5fc   :  { %v588_v26 = vpop.f32.mrb[8].mxu1 }
 0x5fd   :  { %v593_v27 = vrot.slane %v588_v26, 6  ;;  %v4397_v28 = vpop.f32.mrb[9].mxu1 }
 0x5ff   :  { %v595_v29 = vadd.f32 %v593_v27, %v5696_v5 }
 0x601   :  { %5038 = vtanh.f32 %v595_v29  ;;  %v4111_v31 = vmul.f32 -1.442695, %v595_v29 }
 0x603   :  { %5040 = vpow2.f32 %v4111_v31 }
 0x60b   :  { %v5039_v30 = vpop.eup %5038 }
 0x60c   :  { %608 = vrot.lane.b32.xlu0 %v5039_v30, %s5414_s4 }
 0x60d   :  { %v5041_v32 = vpop.eup %5040 }
 0x60e   :  { %v599_v34 = vadd.f32 1.0, %v5041_v32 }
 0x610   :  { %5042 = vrcp.f32 %v599_v34 }
 0x61a   :  { %v5043_v35 = vpop.eup %5042 }
 0x61b   :  { %v606_v42 = vmul.f32 %v5043_v35, %v604_v39 }
 0x67e   :  { %v609_v36 = vpop.permute.xlu0 %608 }
 0x67f   :  { %v611_v38 = vmul.f32 %v5043_v35, %v609_v36 }
 0x681   :  { %613 = vrot.lane.b32.xlu1 %v611_v38, %s5415_s21 }
 0x6f3   :  { %v614_v43 = vpop.permute.xlu1 %613 }
 0x6f4   :  { %v616_v44 = vadd.f32 %v614_v43, %v606_v42 }
 0x6f6   :  { %5044 = vtanh.f32 %v616_v44  ;;  %v716_v62 = vrot.slane %v616_v44, 6 }
 0x700   :  { %v5045_v45 = vpop.eup %5044 }
 0x701   :  { %619 = vrot.lane.b32.xlu1 %v5045_v45, %s5414_s4 }
 0x773   :  { %v620_v46 = vpop.permute.xlu1 %619 }
 0x774   :  { %v5715_v51 = vmul.f32 %v5043_v35, %v620_v46 }
 0x776   :  { %v629_v52 = vrot.slane %v5715_v51, 2 }
 0x778   :  { %630 = vrot.lane.b32.xlu1 %v629_v52, %s5415_s21 }
 0x7ea   :  { %v631_v53 = vpop.permute.xlu1 %630 }
 0x7eb   :  { %4407 = vmatmul.mubr.msk.f32.vlgmr.msra.gmra.mrb[0].mxu0 %vm415_vm11, %v631_v53 }
 0x7ec   :  { %4805 = vmatpush3.bf16.msra.mxu0 %v5595_v37  ;;  %4428 = vmatprep.mubr.msk.f32.mxu0 %vm5413_vm5, %v5411_v16 }
 0x7ed   :  { %4806 = vmatprep.subr.bf16.mxu0 %v5412_v33 }
 0x7f0   :  { %4808 = vmatpush3.bf16.msra.mxu0 %v5605_v40 }
 0x7f1   :  { %4815 = vmatprep.subr.bf16.mxu0 %v5412_v33 }
 0x8be   :  { %v700_v54 = vpop.f32.mrb[0].mxu0 }
 0x8bf   :  { %v705_v55 = vrot.slane %v700_v54, 4  ;;  %v4408_v56 = vpop.f32.mrb[1].mxu0 }
 0x8c1   :  { %v707_v57 = vadd.f32 %v705_v55, %v5696_v5 }
 0x8c3   :  { %5046 = vtanh.f32 %v707_v57  ;;  %v4113_v58 = vmul.f32 -1.442695, %v707_v57 }
 0x8c5   :  { %5048 = vpow2.f32 %v4113_v58 }
 0x8cd   :  { %v5047_v49 = vpop.eup %5046 }
 0x8ce   :  { %720 = vrot.lane.b32.xlu1 %v5047_v49, %s5414_s4 }
 0x8cf   :  { %v5049_v59 = vpop.eup %5048 }
 0x8d0   :  { %v711_v47 = vadd.f32 1.0, %v5049_v59 }
 0x8d2   :  { %5050 = vrcp.f32 %v711_v47 }
 0x8dc   :  { %v5051_v60 = vpop.eup %5050 }
 0x8dd   :  { %v718_v63 = vmul.f32 %v5051_v60, %v716_v62 }
 0x940   :  { %v721_v48 = vpop.permute.xlu1 %720 }
 0x941   :  { %v723_v21 = vmul.f32 %v5051_v60, %v721_v48 }
 0x943   :  { %725 = vrot.lane.b32.xlu1 %v723_v21, %s5415_s21 }
 0x9b5   :  { %v726_v1 = vpop.permute.xlu1 %725 }
 0x9b6   :  { %v728_v2 = vadd.f32 %v726_v1, %v718_v63 }
 0x9b8   :  { %5052 = vtanh.f32 %v728_v2  ;;  %v828_v25 = vrot.slane %v728_v2, 6 }
 0x9c2   :  { %v5053_v6 = vpop.eup %5052 }
 0x9c3   :  { %731 = vrot.lane.b32.xlu0 %v5053_v6, %s5414_s4 }
 0xa35   :  { %v732_v7 = vpop.permute.xlu0 %731 }
 0xa36   :  { %v5730_v8 = vmul.f32 %v5051_v60, %v732_v7 }
 0xa38   :  { %v741_v9 = vrot.slane %v5730_v8, 4 }
 0xa3a   :  { %742 = vrot.lane.b32.xlu1 %v741_v9, %s5415_s21 }
 0xaac   :  { %v743_v10 = vpop.permute.xlu1 %742 }
 0xaad   :  { %4418 = vmatmul.mubr.msk.f32.vlgmr.msra.gmra.mrb[10].mxu1 %vm415_vm11, %v743_v10 }
 0xaae   :  { %4811 = vmatpush3.bf16.msra.mxu1 %v5595_v37  ;;  %4439 = vmatprep.mubr.msk.f32.mxu1 %vm5413_vm5, %v5411_v16 }
 0xaaf   :  { %4812 = vmatprep.subr.bf16.mxu1 %v5412_v33 }
 0xab2   :  { %4814 = vmatpush3.bf16.msra.mxu1 %v5605_v40 }
 0xab3   :  { %4821 = vmatprep.subr.bf16.mxu1 %v5412_v33 }
 0xb80   :  { %v812_v11 = vpop.f32.mrb[10].mxu1 }
 0xb81   :  { %v817_v12 = vrot.slane %v812_v11, 2  ;;  %v4419_v13 = vpop.f32.mrb[11].mxu1 }
 0xb83   :  { %v819_v14 = vadd.f32 %v817_v12, %v5696_v5 }
 0xb85   :  { %5054 = vtanh.f32 %v819_v14  ;;  %v4115_v17 = vmul.f32 -1.442695, %v819_v14 }
 0xb87   :  { %5056 = vpow2.f32 %v4115_v17  ;;  %v1292_v17 = vld [vmem:[%s6368_s5 + $0x8] sm:$0xff] }
 0xb8f   :  { %v5055_v15 = vpop.eup %5054 }
 0xb90   :  { %832 = vrot.lane.b32.xlu0 %v5055_v15, %s5414_s4  ;;  %v1291_v15 = vld [vmem:[%s6368_s5] sm:$0xff] }
 0xb91   :  { %v5057_v18 = vpop.eup %5056 }
 0xb92   :  { %v823_v19 = vadd.f32 1.0, %v5057_v18  ;;  %v5783_v18 = vpack.c.bf16 %v1292_v17, %v1291_v15 }
 0xb94   :  { %5058 = vrcp.f32 %v823_v19  ;;  %v1293_v19 = vld [vmem:[%s6368_s5 + $0x10] sm:$0xff] }
 0xb9e   :  { %v5059_v22 = vpop.eup %5058 }
 0xb9f   :  { %v830_v26 = vmul.f32 %v5059_v22, %v828_v25 }
 0xc02   :  { %v833_v23 = vpop.permute.xlu0 %832 }
 0xc03   :  { %v835_v24 = vmul.f32 %v5059_v22, %v833_v23 }
 0xc05   :  { %837 = vrot.lane.b32.xlu1 %v835_v24, %s5415_s21 }
 0xc77   :  { %v838_v27 = vpop.permute.xlu1 %837 }
 0xc78   :  { %v840_v28 = vadd.f32 %v838_v27, %v830_v26 }
 0xc7a   :  { %5060 = vtanh.f32 %v840_v28  ;;  %v937_v52 = vrot.slane %v840_v28, 6 }
 0xc84   :  { %v5061_v5 = vpop.eup %5060 }
 0xc85   :  { %843 = vrot.lane.b32.xlu0 %v5061_v5, %s5414_s4 }
 0xcf7   :  { %v844_v29 = vpop.permute.xlu0 %843 }
 0xcf8   :  { %v5745_v30 = vmul.f32 %v5059_v22, %v844_v29  ;;  %v1294_v22 = vld [vmem:[%s6368_s5 + $0x18] sm:$0xff]  ;;  %v5810_v29 = vadd.f32 %v5694_v4, %v5684_v50 }
 0xcf9   :  { %v5793_v24 = vpack.c.bf16 %v1294_v22, %v1293_v19 }
 0xcfa   :  { %v853_v31 = vrot.slane %v5745_v30, 6 }
 0xcfc   :  { %854 = vrot.lane.b32.xlu1 %v853_v31, %s5415_s21 }
 0xd6e   :  { %v855_v32 = vpop.permute.xlu1 %854 }
 0xd6f   :  { %4429 = vmatmul.mubr.msk.f32.vlgmr.msra.gmra.mrb[2].mxu0 %vm415_vm11, %v855_v32 }
 0xd70   :  { %4817 = vmatpush3.bf16.msra.mxu0 %v5595_v37  ;;  %4450 = vmatprep.mubr.msk.f32.mxu0 %vm5413_vm5, %v5411_v16 }
 0xd71   :  { %4818 = vmatprep.subr.bf16.mxu0 %v5412_v33 }
 0xd74   :  { %4820 = vmatpush3.bf16.msra.mxu0 %v5605_v40 }
 0xd75   :  { %4827 = vmatprep.subr.bf16.mxu0 %v5412_v33 }
 0xe42   :  { %v924_v34 = vpop.f32.mrb[2].mxu0 }
 0xe43   :  { %v928_v35 = vadd.f32 %v924_v34, %v5692_v3  ;;  %v4430_v36 = vpop.f32.mrb[3].mxu0 }
 0xe45   :  { %5062 = vtanh.f32 %v928_v35  ;;  %v4117_v39 = vmul.f32 -1.442695, %v928_v35 }
 0xe47   :  { %5064 = vpow2.f32 %v4117_v39 }
 0xe4f   :  { %v5063_v38 = vpop.eup %5062 }
 0xe50   :  { %941 = vrot.lane.b32.xlu0 %v5063_v38, %s5414_s4 }
 0xe51   :  { %v5065_v42 = vpop.eup %5064 }
 0xe52   :  { %v932_v43 = vadd.f32 1.0, %v5065_v42 }
 0xe54   :  { %5066 = vrcp.f32 %v932_v43 }
 0xe5e   :  { %v5067_v44 = vpop.eup %5066 }
 0xe5f   :  { %v939_v53 = vmul.f32 %v5067_v44, %v937_v52 }
 0xec2   :  { %v942_v45 = vpop.permute.xlu0 %941 }
 0xec3   :  { %v944_v46 = vmul.f32 %v5067_v44, %v942_v45 }
 0xec5   :  { %946 = vrot.lane.b32.xlu1 %v944_v46, %s5415_s21 }
 0xf37   :  { %v947_v54 = vpop.permute.xlu1 %946 }
 0xf38   :  { %v949_v55 = vadd.f32 %v947_v54, %v939_v53 }
 0xf3a   :  { %5068 = vtanh.f32 %v949_v55 }
 0xf44   :  { %v5069_v56 = vpop.eup %5068 }
 0xf45   :  { %952 = vrot.lane.b32.xlu0 %v5069_v56, %s5414_s4 }
 0xfb7   :  { %v953_v57 = vpop.permute.xlu0 %952 }
 0xfb8   :  { %v955_v49 = vmul.f32 %v5067_v44, %v953_v57 }
 0xfba   :  { %957 = vrot.lane.b32.xlu1 %v955_v49, %s5415_s21 }
0x102c   :  { %v958_v58 = vpop.permute.xlu1 %957 }
0x102d   :  { %960 = vst.msk [vmem:[#allocation2 + $0x8] sm:$0x3] %vm518_vm10, %v958_v58  ;;  %4440 = vmatmul.mubr.msk.f32.vlgmr.msra.gmra.mrb[12].mxu1 %vm415_vm11, %v958_v58 }
0x102e   :  { %4823 = vmatpush3.bf16.msra.mxu1 %v5595_v37  ;;  %4461 = vmatprep.mubr.msk.f32.mxu1 %vm5413_vm5, %v5411_v16 }
0x102f   :  { %4824 = vmatprep.subr.bf16.mxu1 %v5412_v33 }
0x1032   :  { %4826 = vmatpush3.bf16.msra.mxu1 %v5605_v40  ;;  %v1045_v40 = vrot.slane %v949_v55, 6 }
0x1033   :  { %4833 = vmatprep.subr.bf16.mxu1 %v5412_v33 }
0x1100   :  { %v1029_v59 = vpop.f32.mrb[12].mxu1 }
0x1101   :  { %v1034_v47 = vrot.slane %v1029_v59, 6  ;;  %v4441_v60 = vpop.f32.mrb[13].mxu1 }
0x1103   :  { %v1036_v48 = vadd.f32 %v1034_v47, %v5692_v3 }
0x1105   :  { %5070 = vtanh.f32 %v1036_v48  ;;  %v4119_v62 = vmul.f32 -1.442695, %v1036_v48 }
0x1107   :  { %5072 = vpow2.f32 %v4119_v62 }
0x110f   :  { %v5071_v21 = vpop.eup %5070 }
0x1110   :  { %1049 = vrot.lane.b32.xlu0 %v5071_v21, %s5414_s4 }
0x1111   :  { %v5073_v37 = vpop.eup %5072 }
0x1112   :  { %v1040_v63 = vadd.f32 1.0, %v5073_v37 }
0x1114   :  { %5074 = vrcp.f32 %v1040_v63 }
0x111e   :  { %v5075_v1 = vpop.eup %5074 }
0x111f   :  { %v1047_v7 = vmul.f32 %v5075_v1, %v1045_v40 }
0x1182   :  { %v1050_v2 = vpop.permute.xlu0 %1049 }
0x1183   :  { %v1052_v6 = vmul.f32 %v5075_v1, %v1050_v2 }
0x1185   :  { %1054 = vrot.lane.b32.xlu1 %v1052_v6, %s5415_s21 }
0x11f7   :  { %v1055_v9 = vpop.permute.xlu1 %1054 }
0x11f8   :  { %v1057_v10 = vadd.f32 %v1055_v9, %v1047_v7 }
0x11fa   :  { %5076 = vtanh.f32 %v1057_v10  ;;  %v1156_v55 = vrot.slane %v1057_v10, 6 }
0x1204   :  { %v5077_v11 = vpop.eup %5076 }
0x1205   :  { %1060 = vrot.lane.b32.xlu0 %v5077_v11, %s5414_s4 }
0x1277   :  { %v1061_v12 = vpop.permute.xlu0 %1060 }
0x1278   :  { %v5773_v13 = vmul.f32 %v5075_v1, %v1061_v12 }
0x127a   :  { %v1069_v14 = vrot.slane %v5773_v13, 2 }
0x127c   :  { %1070 = vrot.lane.b32.xlu1 %v1069_v14, %s5415_s21 }
0x12ee   :  { %v1071_v23 = vpop.permute.xlu1 %1070 }
0x12ef   :  { %4451 = vmatmul.mubr.msk.f32.vlgmr.msra.gmra.mrb[4].mxu0 %vm415_vm11, %v1071_v23 }
0x12f0   :  { %4829 = vmatpush3.bf16.msra.mxu0 %v5783_v18  ;;  %4472 = vmatprep.mubr.msk.f32.mxu0 %vm5413_vm5, %v5411_v16 }
0x12f1   :  { %4830 = vmatprep.subr.bf16.mxu0 %v5412_v33 }
0x12f4   :  { %4832 = vmatpush3.bf16.msra.mxu0 %v5793_v24 }
0x12f5   :  { %4839 = vmatprep.subr.bf16.mxu0 %v5412_v33 }
0x12f7   :  { %4473 = vmatmul.mubr.f32.vlgmr.msra.gmra.mrb[6].mxu0 %v5411_v16 }
0x12f8   :  { %4841 = vmatpush3.bf16.msra.mxu0 %v5783_v18  ;;  %4494 = vmatprep.mubr.msk.f32.mxu0 %vm5413_vm5, %v5411_v16 }
0x12f9   :  { %4842 = vmatprep.subr.bf16.mxu0 %v5412_v33 }
0x12fc   :  { %4844 = vmatpush3.bf16.msra.mxu0 %v5793_v24 }
0x12fd   :  { %4851 = vmatprep.subr.bf16.mxu0 %v5412_v33 }
0x13c2   :  { %v1140_v25 = vpop.f32.mrb[4].mxu0 }
0x13c3   :  { %v1145_v26 = vrot.slane %v1140_v25, 4  ;;  %v4452_v27 = vpop.f32.mrb[5].mxu0 }
0x13c5   :  { %v1147_v28 = vadd.f32 %v1145_v26, %v5692_v3 }
0x13c7   :  { %5078 = vtanh.f32 %v1147_v28  ;;  %v4121_v38 = vmul.f32 -1.442695, %v1147_v28 }
0x13ca   :  { %v1361_v5 = vpop.f32.mrb[6].mxu0 }
0x13cb   :  { %v1366_v31 = vrot.slane %v1361_v5, 2  ;;  %v4474_v32 = vpop.f32.mrb[7].mxu0 }
0x13cd   :  { %v1368_v34 = vadd.f32 %v1366_v31, %v5810_v29 }
0x13cf   :  { %5080 = vtanh.f32 %v1368_v34  ;;  %v4124_v39 = vmul.f32 -1.442695, %v1368_v34 }
0x13d0   :  { %5082 = vpow2.f32 %v4121_v38 }
0x13d1   :  { %v5079_v35 = vpop.eup %5078  ;;  %5084 = vpow2.f32 %v4124_v39 }
0x13d2   :  { %1160 = vrot.lane.b32.xlu0 %v5079_v35, %s5414_s4 }
0x13d9   :  { %v5081_v36 = vpop.eup %5080 }
0x13da   :  { %1378 = vrot.lane.b32.xlu1 %v5081_v36, %s5414_s4  ;;  %v5083_v42 = vpop.eup %5082 }
0x13db   :  { %v1151_v43 = vadd.f32 1.0, %v5083_v42  ;;  %v5085_v50 = vpop.eup %5084 }
0x13dc   :  { %v1372_v4 = vadd.f32 1.0, %v5085_v50 }
0x13dd   :  { %5086 = vrcp.f32 %v1151_v43 }
0x13de   :  { %5088 = vrcp.f32 %v1372_v4 }
0x13e7   :  { %v5087_v44 = vpop.eup %5086 }
0x13e8   :  { %v5089_v52 = vpop.eup %5088  ;;  %v1158_v56 = vmul.f32 %v5087_v44, %v1156_v55 }
0x13e9   :  { %v1376_v58 = vmul.f32 0.0, %v5089_v52 }
0x1444   :  { %v1161_v45 = vpop.permute.xlu0 %1160 }
0x1445   :  { %v1163_v46 = vmul.f32 %v5087_v44, %v1161_v45 }
0x1447   :  { %1165 = vrot.lane.b32.xlu0 %v1163_v46, %s5415_s21 }
0x144c   :  { %v1379_v53 = vpop.permute.xlu1 %1378 }
0x144d   :  { %v1381_v54 = vmul.f32 %v5089_v52, %v1379_v53 }
0x144f   :  { %1383 = vrot.lane.b32.xlu1 %v1381_v54, %s5415_s21 }
0x14b9   :  { %v1166_v57 = vpop.permute.xlu0 %1165 }
0x14ba   :  { %v5817_v49 = vadd.f32 %v1166_v57, %v1158_v56 }
0x14bc   :  { %5090 = vtanh.f32 %v5817_v49 }
0x14c1   :  { %v1384_v59 = vpop.permute.xlu1 %1383 }
0x14c2   :  { %v1386_v47 = vadd.f32 %v1384_v59, %v1376_v58 }
0x14c4   :  { %5092 = vtanh.f32 %v1386_v47  ;;  %v1486_v27 = vrot.slane %v1386_v47, 2 }
0x14c6   :  { %v5091_v60 = vpop.eup %5090 }
0x14c7   :  { %1171 = vrot.lane.b32.xlu0 %v5091_v60, %s5414_s4 }
0x14ce   :  { %v5093_v48 = vpop.eup %5092 }
0x14cf   :  { %1389 = vrot.lane.b32.xlu1 %v5093_v48, %s5414_s4 }
0x1539   :  { %v1172_v21 = vpop.permute.xlu0 %1171 }
0x153a   :  { %v5822_v62 = vmul.f32 %v5087_v44, %v1172_v21 }
0x153c   :  { %v1180_v37 = vrot.slane %v5822_v62, 4 }
0x153e   :  { %1181 = vrot.lane.b32.xlu0 %v1180_v37, %s5415_s21 }
0x1541   :  { %v1390_v63 = vpop.permute.xlu1 %1389 }
0x1542   :  { %v5826_v1 = vmul.f32 %v5089_v52, %v1390_v63 }
0x1544   :  { %v1399_v2 = vrot.slane %v5826_v1, 6 }
0x1546   :  { %1400 = vrot.lane.b32.xlu1 %v1399_v2, %s5415_s21 }
0x15b0   :  { %v1182_v6 = vpop.permute.xlu0 %1181 }
0x15b1   :  { %4462 = vmatmul.mubr.msk.f32.vlgmr.msra.gmra.mrb[14].mxu1 %vm415_vm11, %v1182_v6 }
0x15b2   :  { %4835 = vmatpush3.bf16.msra.mxu1 %v5783_v18  ;;  %4483 = vmatprep.mubr.msk.f32.mxu1 %vm5413_vm5, %v5411_v16 }
0x15b3   :  { %4836 = vmatprep.subr.bf16.mxu1 %v5412_v33 }
0x15b6   :  { %4838 = vmatpush3.bf16.msra.mxu1 %v5793_v24 }
0x15b7   :  { %4845 = vmatprep.subr.bf16.mxu1 %v5412_v33 }
0x15b8   :  { %v1401_v40 = vpop.permute.xlu1 %1400 }
0x15b9   :  { %4484 = vmatmul.mubr.msk.f32.vlgmr.msra.gmra.mrb[16].mxu1 %vm415_vm11, %v1401_v40 }
0x15ba   :  { %4847 = vmatpush3.bf16.msra.mxu1 %v5783_v18  ;;  %4505 = vmatprep.mubr.msk.f32.mxu1 %vm5413_vm5, %v5411_v16 }
0x15bb   :  { %4848 = vmatprep.subr.bf16.mxu1 %v5412_v33 }
0x15be   :  { %4850 = vmatpush3.bf16.msra.mxu1 %v5793_v24 }
0x15bf   :  { %4857 = vmatprep.subr.bf16.mxu1 %v5412_v33 }
0x1684   :  { %v5844_v7 = vpop.f32.mrb[14].mxu1 }
0x1685   :  { %v4463_v9 = vpop.f32.mrb[15].mxu1 }
0x168c   :  { %v1470_v10 = vpop.f32.mrb[16].mxu1 }
0x168d   :  { %v1475_v11 = vrot.slane %v1470_v10, 4  ;;  %v4485_v12 = vpop.f32.mrb[17].mxu1 }
0x168f   :  { %v1477_v14 = vadd.f32 %v1475_v11, %v5810_v29 }
0x1691   :  { %5094 = vtanh.f32 %v1477_v14  ;;  %v4126_v17 = vmul.f32 -1.442695, %v1477_v14 }
0x1693   :  { %5096 = vpow2.f32 %v4126_v17 }
0x169b   :  { %v5095_v15 = vpop.eup %5094 }
0x169c   :  { %1490 = vrot.lane.b32.xlu0 %v5095_v15, %s5414_s4 }
0x169d   :  { %v5097_v19 = vpop.eup %5096 }
0x169e   :  { %v1481_v22 = vadd.f32 1.0, %v5097_v19 }
0x16a0   :  { %5098 = vrcp.f32 %v1481_v22 }
0x16aa   :  { %v5099_v23 = vpop.eup %5098 }
0x16ab   :  { %v1488_v28 = vmul.f32 %v5099_v23, %v1486_v27 }
0x170e   :  { %v1491_v25 = vpop.permute.xlu0 %1490 }
0x170f   :  { %v1493_v26 = vmul.f32 %v5099_v23, %v1491_v25 }
0x1711   :  { %1495 = vrot.lane.b32.xlu1 %v1493_v26, %s5415_s21 }
0x1783   :  { %v1496_v5 = vpop.permute.xlu1 %1495 }
0x1784   :  { %v1498_v31 = vadd.f32 %v1496_v5, %v1488_v28 }
0x1786   :  { %5100 = vtanh.f32 %v1498_v31  ;;  %v1598_v55 = vrot.slane %v1498_v31, 2 }
0x1790   :  { %v5101_v32 = vpop.eup %5100 }
0x1791   :  { %1501 = vrot.lane.b32.xlu0 %v5101_v32, %s5414_s4 }
0x1803   :  { %v1502_v34 = vpop.permute.xlu0 %1501 }
0x1804   :  { %v5850_v35 = vmul.f32 %v5099_v23, %v1502_v34 }
0x1806   :  { %v1511_v36 = vrot.slane %v5850_v35, 4 }
0x1808   :  { %1512 = vrot.lane.b32.xlu1 %v1511_v36, %s5415_s21 }
0x187a   :  { %v1513_v38 = vpop.permute.xlu1 %1512 }
0x187b   :  { %4495 = vmatmul.mubr.msk.f32.vlgmr.msra.gmra.mrb[8].mxu0 %vm415_vm11, %v1513_v38 }
0x187c   :  { %4853 = vmatpush3.bf16.msra.mxu0 %v5783_v18  ;;  %4516 = vmatprep.mubr.msk.f32.mxu0 %vm5413_vm5, %v5411_v16 }
0x187d   :  { %4854 = vmatprep.subr.bf16.mxu0 %v5412_v33 }
0x1880   :  { %4856 = vmatpush3.bf16.msra.mxu0 %v5793_v24 }
0x1881   :  { %4863 = vmatprep.subr.bf16.mxu0 %v5412_v33 }
0x194e   :  { %v1582_v39 = vpop.f32.mrb[8].mxu0 }
0x194f   :  { %v1587_v42 = vrot.slane %v1582_v39, 6  ;;  %v4496_v43 = vpop.f32.mrb[9].mxu0 }
0x1951   :  { %v1589_v50 = vadd.f32 %v1587_v42, %v5810_v29 }
0x1953   :  { %5102 = vtanh.f32 %v1589_v50  ;;  %v4128_v44 = vmul.f32 -1.442695, %v1589_v50 }
0x1955   :  { %5104 = vpow2.f32 %v4128_v44 }
0x195d   :  { %v5103_v4 = vpop.eup %5102 }
0x195e   :  { %1602 = vrot.lane.b32.xlu0 %v5103_v4, %s5414_s4 }
0x195f   :  { %v5105_v45 = vpop.eup %5104 }
0x1960   :  { %v1593_v46 = vadd.f32 1.0, %v5105_v45 }
0x1962   :  { %5106 = vrcp.f32 %v1593_v46 }
0x196c   :  { %v5107_v52 = vpop.eup %5106 }
0x196d   :  { %v1600_v56 = vmul.f32 %v5107_v52, %v1598_v55 }
0x19d0   :  { %v1603_v53 = vpop.permute.xlu0 %1602 }
0x19d1   :  { %v1605_v54 = vmul.f32 %v5107_v52, %v1603_v53 }
0x19d3   :  { %1607 = vrot.lane.b32.xlu1 %v1605_v54, %s5415_s21 }
0x1a45   :  { %v1608_v57 = vpop.permute.xlu1 %1607 }
0x1a46   :  { %v1610_v58 = vadd.f32 %v1608_v57, %v1600_v56 }
0x1a48   :  { %5108 = vtanh.f32 %v1610_v58  ;;  %v1707_v15 = vrot.slane %v1610_v58, 2 }
0x1a52   :  { %v5109_v59 = vpop.eup %5108 }
0x1a53   :  { %1613 = vrot.lane.b32.xlu0 %v5109_v59, %s5414_s4 }
0x1ac5   :  { %v1614_v47 = vpop.permute.xlu0 %1613 }
0x1ac6   :  { %v5865_v60 = vmul.f32 %v5107_v52, %v1614_v47 }
0x1ac8   :  { %v1623_v48 = vrot.slane %v5865_v60, 2 }
0x1aca   :  { %1624 = vrot.lane.b32.xlu1 %v1623_v48, %s5415_s21 }
0x1b3c   :  { %v1625_v21 = vpop.permute.xlu1 %1624 }
0x1b3d   :  { %4506 = vmatmul.mubr.msk.f32.vlgmr.msra.gmra.mrb[18].mxu1 %vm415_vm11, %v1625_v21 }
0x1b3e   :  { %4859 = vmatpush3.bf16.msra.mxu1 %v5783_v18  ;;  %4527 = vmatprep.mubr.msk.f32.mxu1 %vm5413_vm5, %v5411_v16 }
0x1b3f   :  { %4860 = vmatprep.subr.bf16.mxu1 %v5412_v33 }
0x1b42   :  { %4862 = vmatpush3.bf16.msra.mxu1 %v5793_v24 }
0x1b43   :  { %4869 = vmatprep.subr.bf16.mxu1 %v5412_v33 }
0x1c10   :  { %v1694_v37 = vpop.f32.mrb[18].mxu1 }
0x1c11   :  { %v1698_v63 = vadd.f32 %v1694_v37, %v5810_v29  ;;  %v4507_v2 = vpop.f32.mrb[19].mxu1 }
0x1c13   :  { %5110 = vtanh.f32 %v1698_v63  ;;  %v4130_v40 = vmul.f32 -1.442695, %v1698_v63 }
0x1c15   :  { %5112 = vpow2.f32 %v4130_v40 }
0x1c1d   :  { %v5111_v6 = vpop.eup %5110 }
0x1c1e   :  { %1711 = vrot.lane.b32.xlu0 %v5111_v6, %s5414_s4 }
0x1c1f   :  { %v5113_v9 = vpop.eup %5112 }
0x1c20   :  { %v1702_v10 = vadd.f32 1.0, %v5113_v9 }
0x1c22   :  { %5114 = vrcp.f32 %v1702_v10 }
0x1c2c   :  { %v5115_v11 = vpop.eup %5114 }
0x1c2d   :  { %v1709_v17 = vmul.f32 %v5115_v11, %v1707_v15 }
0x1c90   :  { %v1712_v12 = vpop.permute.xlu0 %1711 }
0x1c91   :  { %v1714_v14 = vmul.f32 %v5115_v11, %v1712_v12 }
0x1c93   :  { %1716 = vrot.lane.b32.xlu1 %v1714_v14, %s5415_s21 }
0x1d05   :  { %v1717_v19 = vpop.permute.xlu1 %1716 }
0x1d06   :  { %v1719_v22 = vadd.f32 %v1717_v19, %v1709_v17 }
0x1d08   :  { %5116 = vtanh.f32 %v1719_v22  ;;  %v1818_v50 = vrot.slane %v1719_v22, 2 }
0x1d12   :  { %v5117_v29 = vpop.eup %5116 }
0x1d13   :  { %1722 = vrot.lane.b32.xlu0 %v5117_v29, %s5414_s4 }
0x1d85   :  { %v1723_v23 = vpop.permute.xlu0 %1722 }
0x1d86   :  { %v5880_v25 = vmul.f32 %v5115_v11, %v1723_v23 }
0x1d88   :  { %1732 = vrot.lane.b32.xlu1 %v5880_v25, %s5415_s21 }
0x1dfa   :  { %v1733_v26 = vpop.permute.xlu1 %1732 }
0x1dfb   :  { %4517 = vmatmul.mubr.msk.f32.vlgmr.msra.gmra.mrb[10].mxu0 %vm415_vm11, %v1733_v26 }
0x1dfc   :  { %4865 = vmatpush3.bf16.msra.mxu0 %v5783_v18  ;;  %4538 = vmatprep.mubr.msk.f32.mxu0 %vm5413_vm5, %v5411_v16 }
0x1dfd   :  { %4866 = vmatprep.subr.bf16.mxu0 %v5412_v33 }
0x1e00   :  { %4868 = vmatpush3.bf16.msra.mxu0 %v5793_v24 }
0x1ece   :  { %v1802_v27 = vpop.f32.mrb[10].mxu0 }
0x1ecf   :  { %v1807_v28 = vrot.slane %v1802_v27, 2  ;;  %v4518_v5 = vpop.f32.mrb[11].mxu0 }
0x1ed1   :  { %v1809_v31 = vadd.f32 %v1807_v28, %v5688_v0 }
0x1ed3   :  { %5118 = vtanh.f32 %v1809_v31  ;;  %v4132_v34 = vmul.f32 -1.442695, %v1809_v31 }
0x1ed5   :  { %5120 = vpow2.f32 %v4132_v34 }
0x1edd   :  { %v5119_v32 = vpop.eup %5118 }
0x1ede   :  { %1822 = vrot.lane.b32.xlu0 %v5119_v32, %s5414_s4 }
0x1edf   :  { %v5121_v36 = vpop.eup %5120 }
0x1ee0   :  { %v1813_v38 = vadd.f32 1.0, %v5121_v36 }
0x1ee2   :  { %5122 = vrcp.f32 %v1813_v38 }
0x1eec   :  { %v5123_v39 = vpop.eup %5122 }
0x1eed   :  { %v1820_v4 = vmul.f32 %v5123_v39, %v1818_v50 }
0x1f50   :  { %v1823_v42 = vpop.permute.xlu0 %1822 }
0x1f51   :  { %v1825_v43 = vmul.f32 %v5123_v39, %v1823_v42 }
0x1f53   :  { %1827 = vrot.lane.b32.xlu1 %v1825_v43, %s5415_s21 }
0x1fc5   :  { %v1828_v44 = vpop.permute.xlu1 %1827 }
0x1fc6   :  { %v1830_v45 = vadd.f32 %v1828_v44, %v1820_v4 }
0x1fc8   :  { %5124 = vtanh.f32 %v1830_v45 }
0x1fd2   :  { %v5125_v46 = vpop.eup %5124 }
0x1fd3   :  { %1833 = vrot.lane.b32.xlu0 %v5125_v46, %s5414_s4 }
0x2045   :  { %v1834_v52 = vpop.permute.xlu0 %1833 }
0x2046   :  { %v5894_v53 = vmul.f32 %v5123_v39, %v1834_v52 }
0x2048   :  { %v1842_v54 = vrot.slane %v5894_v53, 6 }
0x204a   :  { %1843 = vrot.lane.b32.xlu1 %v1842_v54, %s5415_s21 }
0x20bc   :  { %v1844_v55 = vpop.permute.xlu1 %1843 }
0x20bd   :  { %4528 = vmatmul.mubr.msk.f32.vlgmr.msra.gmra.mrb[20].mxu1 %vm415_vm11, %v1844_v55 }
0x20be   :  { %4871 = vmatpush3.bf16.msra.mxu1 %v5783_v18  ;;  %4549 = vmatprep.mubr.msk.f32.mxu1 %vm5413_vm5, %v5411_v16 }
0x20bf   :  { %4872 = vmatprep.subr.bf16.mxu1 %v5412_v33 }
0x20c2   :  { %4874 = vmatpush3.bf16.msra.mxu1 %v5793_v24  ;;  %v1929_v24 = vrot.slane %v1830_v45, 2 }
0x20c3   :  { %4891 = vmatprep.subr.bf16.mxu1 %v5412_v33 }
0x2190   :  { %v1913_v56 = vpop.f32.mrb[20].mxu1 }
0x2191   :  { %v1918_v57 = vrot.slane %v1913_v56, 4  ;;  %v4529_v58 = vpop.f32.mrb[21].mxu1 }
0x2193   :  { %v1920_v59 = vadd.f32 %v1918_v57, %v5688_v0 }
0x2195   :  { %5126 = vtanh.f32 %v1920_v59  ;;  %v4134_v48 = vmul.f32 -1.442695, %v1920_v59 }
0x2197   :  { %5128 = vpow2.f32 %v4134_v48 }
0x219f   :  { %v5127_v47 = vpop.eup %5126 }
0x21a0   :  { %1933 = vrot.lane.b32.xlu0 %v5127_v47, %s5414_s4 }
0x21a1   :  { %v5129_v18 = vpop.eup %5128 }
0x21a2   :  { %v1924_v21 = vadd.f32 1.0, %v5129_v18 }
0x21a4   :  { %5130 = vrcp.f32 %v1924_v21 }
0x21ae   :  { %v5131_v37 = vpop.eup %5130 }
0x21af   :  { %v1931_v6 = vmul.f32 %v5131_v37, %v1929_v24  ;;  %v2174_v24 = vld [vmem:[%s6369_s6] sm:$0xff] }
0x2212   :  { %v1934_v63 = vpop.permute.xlu0 %1933 }
0x2213   :  { %v1936_v2 = vmul.f32 %v5131_v37, %v1934_v63 }
0x2215   :  { %1938 = vrot.lane.b32.xlu1 %v1936_v2, %s5415_s21  ;;  %v2177_v2 = vld [vmem:[%s6369_s6 + $0x18] sm:$0xff] }
0x2287   :  { %v1939_v40 = vpop.permute.xlu1 %1938 }
0x2288   :  { %v1941_v9 = vadd.f32 %v1939_v40, %v1931_v6  ;;  %v2176_v40 = vld [vmem:[%s6369_s6 + $0x10] sm:$0xff] }
0x228a   :  { %5132 = vtanh.f32 %v1941_v9  ;;  %v2040_v34 = vrot.slane %v1941_v9, 2  ;;  %v2179_v9 = vld [vmem:[%s6369_s6 + $0x28] sm:$0xff] }
0x2294   :  { %v5133_v10 = vpop.eup %5132 }
0x2295   :  { %1944 = vrot.lane.b32.xlu0 %v5133_v10, %s5414_s4  ;;  %v2181_v10 = vld [vmem:[%s6369_s6 + $0x38] sm:$0xff] }
0x2307   :  { %v1945_v11 = vpop.permute.xlu0 %1944 }
0x2308   :  { %v1947_v12 = vmul.f32 %v5131_v37, %v1945_v11  ;;  %v4877_v11 = vpack.c.bf16 %v2176_v40, %v2174_v24 }
0x230a   :  { %v1953_v14 = vrot.slane %v1947_v12, 4 }
0x230c   :  { %1954 = vrot.lane.b32.xlu1 %v1953_v14, %s5415_s21  ;;  %v2178_v14 = vld [vmem:[%s6369_s6 + $0x20] sm:$0xff] }
0x237e   :  { %v1955_v15 = vpop.permute.xlu1 %1954 }
0x237f   :  { %4539 = vmatmul.mubr.msk.f32.vlgmr.msra.gmra.mrb[12].mxu0 %vm415_vm11, %v1955_v15  ;;  %v2180_v15 = vld [vmem:[%s6369_s6 + $0x30] sm:$0xff] }
0x2380   :  { %2273 = vmatprep.mubr.f32.mxu0 %v5411_v16 }
0x2452   :  { %v2024_v17 = vpop.f32.mrb[12].mxu0 }
0x2453   :  { %v2029_v19 = vrot.slane %v2024_v17, 6  ;;  %v4540_v22 = vpop.f32.mrb[13].mxu0  ;;  %v4881_v17 = vpack.c.bf16 %v2180_v15, %v2178_v14 }
0x2454   :  { %v2185_v22 = vld [vmem:[%s6369_s6 + $0x58] sm:$0xff] }
0x2455   :  { %v2031_v29 = vadd.f32 %v2029_v19, %v5688_v0  ;;  %v2183_v19 = vld [vmem:[%s6369_s6 + $0x48] sm:$0xff] }
0x2457   :  { %5134 = vtanh.f32 %v2031_v29  ;;  %v4136_v26 = vmul.f32 -1.442695, %v2031_v29  ;;  %v4883_v29 = vpack.c.bf16 %v2185_v22, %v2183_v19 }
0x2459   :  { %5136 = vpow2.f32 %v4136_v26  ;;  %v2286_v26 = vld [vmem:[%s6371_s8] sm:$0xff] }
0x2461   :  { %v5135_v23 = vpop.eup %5134 }
0x2462   :  { %2044 = vrot.lane.b32.xlu0 %v5135_v23, %s5414_s4  ;;  %v2184_v23 = vld [vmem:[%s6369_s6 + $0x50] sm:$0xff] }
0x2463   :  { %v5137_v27 = vpop.eup %5136 }
0x2464   :  { %v2035_v28 = vadd.f32 1.0, %v5137_v27  ;;  %v2287_v27 = vld [vmem:[%s6371_s8 + $0x8] sm:$0xff] }
0x2466   :  { %5138 = vrcp.f32 %v2035_v28  ;;  %v5985_v28 = vpack.c.bf16 %v2287_v27, %v2286_v26 }
0x2470   :  { %v5139_v5 = vpop.eup %5138 }
0x2471   :  { %v2042_v36 = vmul.f32 %v5139_v5, %v2040_v34 }
0x24d4   :  { %v2045_v31 = vpop.permute.xlu0 %2044 }
0x24d5   :  { %v2047_v32 = vmul.f32 %v5139_v5, %v2045_v31  ;;  %v2189_v31 = vld [vmem:[%s6369_s6 + $0x78] sm:$0xff] }
0x24d7   :  { %2049 = vrot.lane.b32.xlu1 %v2047_v32, %s5415_s21  ;;  %v2186_v32 = vld [vmem:[%s6369_s6 + $0x60] sm:$0xff] }
0x2549   :  { %v2050_v38 = vpop.permute.xlu1 %2049 }
0x254a   :  { %v2052_v39 = vadd.f32 %v2050_v38, %v2042_v36  ;;  %v2188_v36 = vld [vmem:[%s6369_s6 + $0x70] sm:$0xff] }
0x254b   :  { %v2288_v38 = vld [vmem:[%s6371_s8 + $0x10] sm:$0xff] }
0x254c   :  { %5140 = vtanh.f32 %v2052_v39 }
0x2556   :  { %v5141_v42 = vpop.eup %5140 }
0x2557   :  { %2055 = vrot.lane.b32.xlu0 %v5141_v42, %s5414_s4  ;;  %v4889_v42 = vpack.c.bf16 %v2188_v36, %v2186_v32 }
0x25c9   :  { %v2056_v43 = vpop.permute.xlu0 %2055 }
0x25ca   :  { %v2058_v50 = vmul.f32 %v5139_v5, %v2056_v43  ;;  %v2187_v5 = vld [vmem:[%s6369_s6 + $0x68] sm:$0xff] }
0x25cb   :  { %v4887_v34 = vpack.c.bf16 %v2189_v31, %v2187_v5 }
0x25cc   :  { %v2064_v4 = vrot.slane %v2058_v50, 2 }
0x25ce   :  { %2065 = vrot.lane.b32.xlu1 %v2064_v4, %s5415_s21 }
0x2640   :  { %v2066_v44 = vpop.permute.xlu1 %2065 }
0x2641   :  { %4550 = vmatmul.mubr.msk.f32.vlgmr.msra.gmra.mrb[22].mxu1 %vm415_vm11, %v2066_v44 }
0x2642   :  { %4560 = vmatprep.mubr.msk.f32.mxu1 %vm5413_vm5, %v5411_v16  ;;  %4893 = vmatpush3.bf16.msra.mxu1 %v5985_v28 }
0x2643   :  { %4894 = vmatprep.subr.bf16.mxu1 %v5412_v33 }
0x2714   :  { %v2135_v45 = vpop.f32.mrb[22].mxu1 }
0x2715   :  { %v2139_v46 = vadd.f32 %v2135_v45, %v5688_v0  ;;  %v4551_v52 = vpop.f32.mrb[23].mxu1  ;;  %v2148_v0 = vrot.slane %v2052_v39, 2  ;;  %v2289_v39 = vld [vmem:[%s6371_s8 + $0x18] sm:$0xff] }
0x2716   :  { %v6006_v43 = vpack.c.bf16 %v2289_v39, %v2288_v38 }
0x2717   :  { %5142 = vtanh.f32 %v2139_v46  ;;  %v4138_v55 = vmul.f32 -1.442695, %v2139_v46 }
0x2718   :  { %4896 = vmatpush3.bf16.msra.mxu1 %v6006_v43 }
0x2719   :  { %5144 = vpow2.f32 %v4138_v55  ;;  %4897 = vmatprep.subr.bf16.mxu1 %v5412_v33 }
0x271b   :  { %4561 = vmatmul.mubr.f32.vlgmr.msra.gmra.mrb[24].mxu1 %v5411_v16 }
0x271c   :  { %4899 = vmatpush3.bf16.msra.mxu1 %v5985_v28  ;;  %4571 = vmatprep.mubr.msk.f32.mxu1 %vm5413_vm5, %v5411_v16 }
0x271d   :  { %4900 = vmatprep.subr.bf16.mxu1 %v5412_v33 }
0x2720   :  { %4902 = vmatpush3.bf16.msra.mxu1 %v6006_v43 }
0x2721   :  { %v5143_v54 = vpop.eup %5142  ;;  %4909 = vmatprep.subr.bf16.mxu1 %v5412_v33 }
0x2722   :  { %2152 = vrot.lane.b32.xlu0 %v5143_v54, %s5414_s4 }
0x2723   :  { %v5145_v56 = vpop.eup %5144 }
0x2724   :  { %v2143_v57 = vadd.f32 1.0, %v5145_v56 }
0x2726   :  { %5146 = vrcp.f32 %v2143_v57 }
0x2730   :  { %v5922_v58 = vpop.eup %5146 }
0x2731   :  { %v2150_v48 = vmul.f32 %v5922_v58, %v2148_v0 }
0x2794   :  { %v2153_v59 = vpop.permute.xlu0 %2152 }
0x2795   :  { %v2155_v47 = vmul.f32 %v5922_v58, %v2153_v59 }
0x2797   :  { %2157 = vrot.lane.b32.xlu1 %v2155_v47, %s5415_s21 }
0x279b   :  { %624 = vrot.lane.b32.xlu1 %v5715_v51, %s5415_s21 }
0x279f   :  { %848 = vrot.lane.b32.xlu1 %v5745_v30, %s5415_s21  ;;  %v2175_v30 = vld [vmem:[%s6369_s6 + $0x8] sm:$0xff] }
0x27a0   :  { %v4875_v6 = vpack.c.bf16 %v2177_v2, %v2175_v30 }
0x27a2   :  { %4876 = vmatprep.subr.bf16.mxu0 %v4875_v6  ;;  %v1256_v6 = vrot.slane %v5844_v7, 2 }
0x27a3   :  { %1949 = vrot.lane.b32.xlu1 %v1947_v12, %s5414_s4  ;;  %v4879_v12 = vpack.c.bf16 %v2181_v10, %v2179_v9  ;;  %4878 = vmatpush1.bf16.msra.mxu0 %v4877_v11 }
0x27a4   :  { %v1258_v11 = vadd.f32 %v1256_v6, %v5692_v3 }
0x27a5   :  { %4880 = vmatprep.subr.bf16.mxu0 %v4879_v12 }
0x27a6   :  { %v4123_v15 = vmul.f32 -1.442695, %v1258_v11 }
0x27a7   :  { %4882 = vmatpush1.bf16.msra.mxu0 %v4881_v17 }
0x27a8   :  { %4884 = vmatprep.subr.bf16.mxu0 %v4883_v29 }
0x27ee   :  { %v2356_v56 = vpop.f32.mrb[24].mxu1 }
0x27ef   :  { %v4562_v57 = vpop.f32.mrb[25].mxu1 }
0x2809   :  { %v2158_v18 = vpop.permute.xlu1 %2157 }
0x280a   :  { %v5932_v21 = vadd.f32 %v2158_v18, %v2150_v48 }
0x280c   :  { %5148 = vtanh.f32 %v5932_v21 }
0x280d   :  { %v625_v37 = vpop.permute.xlu1 %624 }
0x280e   :  { %628 = vst.msk [vmem:[#allocation2] sm:$0xc] %vm627_vm12, %v625_v37 }
0x2811   :  { %v849_v63 = vpop.permute.xlu1 %848 }
0x2812   :  { %852 = vst.msk [vmem:[#allocation2] sm:$0xc0] %vm851_vm13, %v849_v63 }
0x2815   :  { %v1950_v45 = vpop.permute.xlu1 %1949 }
0x2816   :  { %v5149_v51 = vpop.eup %5148 }
0x2817   :  { %2163 = vrot.lane.b32.xlu0 %v5149_v51, %s5414_s4 }
0x281b   :  { %736 = vrot.lane.b32.xlu0 %v5730_v8, %s5415_s21  ;;  %v2182_v8 = vld [vmem:[%s6369_s6 + $0x40] sm:$0xff] }
0x281f   :  { %1838 = vrot.lane.b32.xlu0 %v5894_v53, %s5414_s4  ;;  %v4885_v53 = vpack.c.bf16 %v2184_v23, %v2182_v8 }
0x2821   :  { %4886 = vmatpush1.bf16.msra.mxu0 %v4885_v53  ;;  %v1267_v53 = vrot.slane %v5817_v49, 6 }
0x2822   :  { %4888 = vmatprep.subr.bf16.mxu0 %v4887_v34 }
0x2823   :  { %2060 = vrot.lane.b32.xlu0 %v2058_v50, %s5414_s4 }
0x2825   :  { %4890 = vmatpush1.bf16.msra.mxu0 %v4889_v42 }
0x2826   :  { %4903 = vmatprep.subr.bf16.mxu0 %v5412_v33 }
0x2889   :  { %v2164_v50 = vpop.permute.xlu0 %2163 }
0x288a   :  { %v2166_v4 = vmul.f32 %v5922_v58, %v2164_v50  ;;  %v6032_v58 = vld [vmem:[#allocation6] sm:$0x3] }
0x288b   :  { %v6037_v59 = vrot.slane %v6032_v58, %v320_v61 }
0x288c   :  { %2168 = vrot.lane.b32.xlu1 %v2166_v4, %s5414_s4 }
0x288d   :  { %v737_v44 = vpop.permute.xlu0 %736 }
0x288e   :  { %740 = vst.msk [vmem:[#allocation2] sm:$0x30] %vm739_vm14, %v737_v44 }
0x288f   :  { %1952 = vst.msk [vmem:[#allocation2] sm:$0x30] %vm1509_vm15, %v1950_v45 }
0x2891   :  { %v1839_v46 = vpop.permute.xlu0 %1838 }
0x2892   :  { %1841 = vst.msk [vmem:[#allocation2] sm:$0xc0] %vm1397_vm0, %v1839_v46 }
0x2895   :  { %v2061_v52 = vpop.permute.xlu0 %2060 }
0x2896   :  { %2063 = vst.msk [vmem:[#allocation2] sm:$0xc] %vm1621_vm1, %v2061_v52 }
0x28fe   :  { %v2169_v54 = vpop.permute.xlu1 %2168 }
0x28ff   :  { %2171 = vst.msk [vmem:[#allocation2] sm:$0x3] %vm1730_vm2, %v2169_v54 }
0x2906   :  { %v2172_v55 = vld [vmem:[#allocation2] sm:$0xff] }
0x2907   :  { %4139 = vmatmul.mubr.msk.f32.vlgmr.msra.gmra.mrb[14].mxu0 %vm2202_vm3, %v2172_v55 }
0x2908   :  { %2279 = vmatprep.mubr.f32.mxu0 %v5411_v16  ;;  %4905 = vmatpush3.bf16.msra.mxu0 %v5985_v28 }
0x2909   :  { %4906 = vmatprep.subr.bf16.mxu0 %v5412_v33 }
0x290c   :  { %4908 = vmatpush3.bf16.msra.mxu0 %v6006_v43 }
0x290d   :  { %4915 = vmatprep.subr.bf16.mxu0 %v5412_v33 }
0x29da   :  { %v2275_v47 = vpop.f32.mrb[14].mxu0 }
0x29db   :  { %v6040_v0 = vadd.f32 %v2275_v47, %v6037_v59  ;;  %v6042_v48 = vpop.f32.mrb[15].mxu0 }
0x29dd   :  { %v2360_v18 = vadd.f32 %v2356_v56, %v6040_v0 }
0x29df   :  { %5150 = vtanh.f32 %v2360_v18  ;;  %v4141_v63 = vmul.f32 -1.442695, %v2360_v18 }
0x29e1   :  { %5152 = vpow2.f32 %v4141_v63 }
0x29e9   :  { %v5151_v37 = vpop.eup %5150 }
0x29ea   :  { %2370 = vrot.lane.b32.xlu0 %v5151_v37, %s5414_s4 }
0x29eb   :  { %v5153_v51 = vpop.eup %5152 }
0x29ec   :  { %v2364_v30 = vadd.f32 1.0, %v5153_v51 }
0x29ee   :  { %5154 = vrcp.f32 %v2364_v30 }
0x29f8   :  { %v5155_v2 = vpop.eup %5154 }
0x29f9   :  { %v2368_v40 = vmul.f32 0.0, %v5155_v2 }
0x2a5c   :  { %v2371_v61 = vpop.permute.xlu0 %2370 }
0x2a5d   :  { %v2373_v24 = vmul.f32 %v5155_v2, %v2371_v61 }
0x2a5f   :  { %2375 = vrot.lane.b32.xlu1 %v2373_v24, %s5415_s21 }
0x2ad1   :  { %v2376_v9 = vpop.permute.xlu1 %2375 }
0x2ad2   :  { %v6048_v10 = vadd.f32 %v2376_v9, %v2368_v40 }
0x2ad4   :  { %5156 = vtanh.f32 %v6048_v10  ;;  %v2472_v55 = vrot.slane %v6048_v10, 6 }
0x2ad5   :  { %5158 = vtanh.f32 %v1258_v11 }
0x2ad6   :  { %5160 = vpow2.f32 %v4123_v15 }
0x2ade   :  { %v5157_v12 = vpop.eup %5156 }
0x2adf   :  { %2381 = vrot.lane.b32.xlu0 %v5157_v12, %s5414_s4  ;;  %v5159_v14 = vpop.eup %5158 }
0x2ae0   :  { %v5161_v17 = vpop.eup %5160 }
0x2ae1   :  { %v1262_v19 = vadd.f32 1.0, %v5161_v17 }
0x2ae3   :  { %1271 = vrot.lane.b32.xlu0 %v5159_v14, %s5414_s4  ;;  %5162 = vrcp.f32 %v1262_v19 }
0x2aed   :  { %v5163_v29 = vpop.eup %5162 }
0x2aee   :  { %v1269_v26 = vmul.f32 %v5163_v29, %v1267_v53 }
0x2b51   :  { %v2382_v7 = vpop.permute.xlu0 %2381 }
0x2b52   :  { %v2384_v22 = vmul.f32 %v5155_v2, %v2382_v7 }
0x2b54   :  { %2386 = vrot.lane.b32.xlu1 %v2384_v22, %s5415_s21 }
0x2b55   :  { %v1272_v3 = vpop.permute.xlu0 %1271 }
0x2b56   :  { %v1274_v8 = vmul.f32 %v5163_v29, %v1272_v3 }
0x2b58   :  { %1276 = vrot.lane.b32.xlu0 %v1274_v8, %s5415_s21 }
0x2bc6   :  { %v2387_v23 = vpop.permute.xlu1 %2386 }
0x2bc7   :  { %4572 = vmatmul.mubr.msk.f32.vlgmr.msra.gmra.mrb[26].mxu1 %vm415_vm11, %v2387_v23 }
0x2bc8   :  { %4911 = vmatpush3.bf16.msra.mxu1 %v5985_v28  ;;  %4593 = vmatprep.mubr.msk.f32.mxu1 %vm5413_vm5, %v5411_v16 }
0x2bc9   :  { %4912 = vmatprep.subr.bf16.mxu1 %v5412_v33 }
0x2bca   :  { %v1277_v27 = vpop.permute.xlu0 %1276 }
0x2bcb   :  { %v6062_v5 = vadd.f32 %v1277_v27, %v1269_v26 }
0x2bcc   :  { %4914 = vmatpush3.bf16.msra.mxu1 %v6006_v43 }
0x2bcd   :  { %5164 = vtanh.f32 %v6062_v5  ;;  %4921 = vmatprep.subr.bf16.mxu1 %v5412_v33 }
0x2bd7   :  { %v5165_v49 = vpop.eup %5164 }
0x2bd8   :  { %1282 = vrot.lane.b32.xlu0 %v5165_v49, %s5414_s4 }
0x2bdc   :  { %1065 = vrot.lane.b32.xlu0 %v5773_v13, %s5415_s21 }
0x2c4a   :  { %v1283_v31 = vpop.permute.xlu0 %1282 }
0x2c4b   :  { %v1285_v32 = vmul.f32 %v5163_v29, %v1283_v31 }
0x2c4d   :  { %1287 = vrot.lane.b32.xlu0 %v1285_v32, %s5415_s21 }
0x2c4e   :  { %v1066_v34 = vpop.permute.xlu0 %1065 }
0x2c4f   :  { %1068 = vst.msk [vmem:[#allocation2 + $0x8] sm:$0xc] %vm627_vm12, %v1066_v34 }
0x2c51   :  { %1506 = vrot.lane.b32.xlu0 %v5850_v35, %s5414_s4 }
0x2c55   :  { %1727 = vrot.lane.b32.xlu0 %v5880_v25, %s5414_s4 }
0x2c9a   :  { %v2456_v36 = vpop.f32.mrb[26].mxu1 }
0x2c9b   :  { %v2461_v38 = vrot.slane %v2456_v36, 6  ;;  %v4573_v39 = vpop.f32.mrb[27].mxu1 }
0x2c9d   :  { %v2463_v42 = vadd.f32 %v2461_v38, %v6040_v0 }
0x2c9f   :  { %5166 = vtanh.f32 %v2463_v42  ;;  %v4143_v35 = vmul.f32 -1.442695, %v2463_v42 }
0x2ca1   :  { %5168 = vpow2.f32 %v4143_v35 }
0x2ca9   :  { %v5167_v13 = vpop.eup %5166 }
0x2caa   :  { %2476 = vrot.lane.b32.xlu1 %v5167_v13, %s5414_s4 }
0x2cab   :  { %v5169_v45 = vpop.eup %5168 }
0x2cac   :  { %v2467_v25 = vadd.f32 1.0, %v5169_v45 }
0x2cae   :  { %5170 = vrcp.f32 %v2467_v25 }
0x2cb8   :  { %v5171_v46 = vpop.eup %5170 }
0x2cb9   :  { %v2474_v56 = vmul.f32 %v5171_v46, %v2472_v55 }
0x2cbf   :  { %v1288_v50 = vpop.permute.xlu0 %1287 }
0x2cc0   :  { %1290 = vst.msk [vmem:[#allocation2 + $0x8] sm:$0xc0] %vm851_vm13, %v1288_v50 }
0x2cc3   :  { %v1507_v4 = vpop.permute.xlu0 %1506 }
0x2cc7   :  { %v1728_v44 = vpop.permute.xlu0 %1727 }
0x2cc8   :  { %1731 = vst.msk [vmem:[#allocation2 + $0x8] sm:$0x3] %vm1730_vm2, %v1728_v44 }
0x2d1c   :  { %v2477_v52 = vpop.permute.xlu1 %2476 }
0x2d1d   :  { %v2479_v54 = vmul.f32 %v5171_v46, %v2477_v52 }
0x2d1f   :  { %2481 = vrot.lane.b32.xlu1 %v2479_v54, %s5415_s21 }
0x2d91   :  { %v2482_v57 = vpop.permute.xlu1 %2481 }
0x2d92   :  { %v2484_v47 = vadd.f32 %v2482_v57, %v2474_v56 }
0x2d94   :  { %5172 = vtanh.f32 %v2484_v47  ;;  %v2579_v22 = vrot.slane %v2484_v47, 6 }
0x2d9e   :  { %v5173_v18 = vpop.eup %5172 }
0x2d9f   :  { %2487 = vrot.lane.b32.xlu1 %v5173_v18, %s5414_s4 }
0x2da3   :  { %1176 = vrot.lane.b32.xlu1 %v5822_v62, %s5415_s21 }
0x2da7   :  { %1394 = vrot.lane.b32.xlu1 %v5826_v1, %s5414_s4 }
0x2dab   :  { %1618 = vrot.lane.b32.xlu1 %v5865_v60, %s5414_s4 }
0x2e11   :  { %v2488_v37 = vpop.permute.xlu1 %2487 }
0x2e12   :  { %v2490_v63 = vmul.f32 %v5171_v46, %v2488_v37 }
0x2e14   :  { %v2492_v51 = vrot.slane %v2490_v63, 2 }
0x2e15   :  { %v1177_v30 = vpop.permute.xlu1 %1176 }
0x2e16   :  { %1179 = vst.msk [vmem:[#allocation2 + $0x8] sm:$0x30] %vm739_vm14, %v1177_v30  ;;  %2493 = vrot.lane.b32.xlu1 %v2492_v51, %s5415_s21 }
0x2e17   :  { %1510 = vst.msk [vmem:[#allocation2 + $0x8] sm:$0x30] %vm1509_vm15, %v1507_v4 }
0x2e19   :  { %v1395_v2 = vpop.permute.xlu1 %1394 }
0x2e1a   :  { %1398 = vst.msk [vmem:[#allocation2 + $0x8] sm:$0xc0] %vm1397_vm0, %v1395_v2 }
0x2e1d   :  { %v1619_v62 = vpop.permute.xlu1 %1618 }
0x2e1e   :  { %1622 = vst.msk [vmem:[#allocation2 + $0x8] sm:$0xc] %vm1621_vm1, %v1619_v62 }
0x2e25   :  { %v2173_v1 = vld [vmem:[#allocation2 + $0x8] sm:$0xff] }
0x2e26   :  { %4140 = vmatmul.mubr.msk.f32.gmra.mrb[16].mxu0 %vm2202_vm3, %v2173_v1 }
0x2e27   :  { %4582 = vmatprep.mubr.msk.f32.mxu0 %vm5413_vm5, %v5411_v16 }
0x2e88   :  { %v2494_v60 = vpop.permute.xlu1 %2493 }
0x2e89   :  { %4583 = vmatmul.mubr.msk.f32.vlgmr.msra.gmra.mrb[18].mxu0 %vm415_vm11, %v2494_v60 }
0x2e8a   :  { %4917 = vmatpush3.bf16.msra.mxu0 %v5985_v28  ;;  %4604 = vmatprep.mubr.msk.f32.mxu0 %vm5413_vm5, %v5411_v16 }
0x2e8b   :  { %4918 = vmatprep.subr.bf16.mxu0 %v5412_v33 }
0x2e8e   :  { %4920 = vmatpush3.bf16.msra.mxu0 %v6006_v43 }
0x2e8f   :  { %4927 = vmatprep.subr.bf16.mxu0 %v5412_v33 }
0x2ef9   :  { %v6104_v61 = vpop.f32.mrb[16].mxu0 }
0x2efa   :  { %v6106_v24 = vpop.f32.mrb[17].mxu0  ;;  %v6134_v57 = vadd.f32 %v6104_v61, %v6037_v59 }
0x2f5c   :  { %v2563_v6 = vpop.f32.mrb[18].mxu0 }
0x2f5d   :  { %v2568_v40 = vrot.slane %v2563_v6, 4  ;;  %v4584_v9 = vpop.f32.mrb[19].mxu0 }
0x2f5f   :  { %v2570_v10 = vadd.f32 %v2568_v40, %v6040_v0 }
0x2f61   :  { %5174 = vtanh.f32 %v2570_v10  ;;  %v4145_v12 = vmul.f32 -1.442695, %v2570_v10 }
0x2f63   :  { %5176 = vpow2.f32 %v4145_v12 }
0x2f6b   :  { %v5175_v11 = vpop.eup %5174 }
0x2f6c   :  { %2583 = vrot.lane.b32.xlu0 %v5175_v11, %s5414_s4 }
0x2f6d   :  { %v5177_v14 = vpop.eup %5176 }
0x2f6e   :  { %v2574_v15 = vadd.f32 1.0, %v5177_v14 }
0x2f70   :  { %5178 = vrcp.f32 %v2574_v15 }
0x2f7a   :  { %v5179_v17 = vpop.eup %5178 }
0x2f7b   :  { %v2581_v29 = vmul.f32 %v5179_v17, %v2579_v22 }
0x2fde   :  { %v2584_v19 = vpop.permute.xlu0 %2583 }
0x2fdf   :  { %v2586_v7 = vmul.f32 %v5179_v17, %v2584_v19 }
0x2fe1   :  { %2588 = vrot.lane.b32.xlu1 %v2586_v7, %s5415_s21 }
0x3053   :  { %v2589_v3 = vpop.permute.xlu1 %2588 }
0x3054   :  { %v2591_v8 = vadd.f32 %v2589_v3, %v2581_v29 }
0x3056   :  { %5180 = vtanh.f32 %v2591_v8  ;;  %v2686_v35 = vrot.slane %v2591_v8, 6 }
0x3060   :  { %v5181_v23 = vpop.eup %5180 }
0x3061   :  { %2594 = vrot.lane.b32.xlu0 %v5181_v23, %s5414_s4 }
0x30d3   :  { %v2595_v53 = vpop.permute.xlu0 %2594 }
0x30d4   :  { %v2597_v26 = vmul.f32 %v5179_v17, %v2595_v53 }
0x30d6   :  { %v2599_v27 = vrot.slane %v2597_v26, 4 }
0x30d8   :  { %2600 = vrot.lane.b32.xlu1 %v2599_v27, %s5415_s21 }
0x314a   :  { %v2601_v49 = vpop.permute.xlu1 %2600 }
0x314b   :  { %4594 = vmatmul.mubr.msk.f32.vlgmr.msra.gmra.mrb[28].mxu1 %vm415_vm11, %v2601_v49 }
0x314c   :  { %4923 = vmatpush3.bf16.msra.mxu1 %v5985_v28  ;;  %4615 = vmatprep.mubr.msk.f32.mxu1 %vm5413_vm5, %v5411_v16 }
0x314d   :  { %4924 = vmatprep.subr.bf16.mxu1 %v5412_v33 }
0x3150   :  { %4926 = vmatpush3.bf16.msra.mxu1 %v6006_v43 }
0x3151   :  { %4933 = vmatprep.subr.bf16.mxu1 %v5412_v33 }
0x321e   :  { %v2670_v31 = vpop.f32.mrb[28].mxu1 }
0x321f   :  { %v2675_v32 = vrot.slane %v2670_v31, 2  ;;  %v4595_v34 = vpop.f32.mrb[29].mxu1 }
0x3221   :  { %v2677_v36 = vadd.f32 %v2675_v32, %v6040_v0 }
0x3223   :  { %5182 = vtanh.f32 %v2677_v36  ;;  %v4147_v39 = vmul.f32 -1.442695, %v2677_v36  ;;  %v3123_v36 = vld [vmem:[#allocation8] sm:$0xff] }
0x3225   :  { %5184 = vpow2.f32 %v4147_v39 }
0x322d   :  { %v5183_v38 = vpop.eup %5182 }
0x322e   :  { %2690 = vrot.lane.b32.xlu0 %v5183_v38, %s5414_s4  ;;  %v3124_v38 = vld [vmem:[#allocation8 + $0x8] sm:$0xff] }
0x322f   :  { %v5185_v42 = vpop.eup %5184  ;;  %v6156_v39 = vpack.c.bf16 %v3124_v38, %v3123_v36 }
0x3230   :  { %v2681_v13 = vadd.f32 1.0, %v5185_v42  ;;  %v3125_v42 = vld [vmem:[#allocation8 + $0x10] sm:$0xff] }
0x3232   :  { %5186 = vrcp.f32 %v2681_v13  ;;  %v3126_v13 = vld [vmem:[#allocation8 + $0x18] sm:$0xff] }
0x323c   :  { %v5187_v50 = vpop.eup %5186 }
0x323d   :  { %v2688_v45 = vmul.f32 %v5187_v50, %v2686_v35 }
0x32a0   :  { %v2691_v4 = vpop.permute.xlu0 %2690 }
0x32a1   :  { %v2693_v44 = vmul.f32 %v5187_v50, %v2691_v4  ;;  %v6160_v4 = vpack.c.bf16 %v3126_v13, %v3125_v42 }
0x32a3   :  { %2695 = vrot.lane.b32.xlu1 %v2693_v44, %s5415_s21 }
0x3315   :  { %v2696_v25 = vpop.permute.xlu1 %2695 }
0x3316   :  { %v2698_v46 = vadd.f32 %v2696_v25, %v2688_v45 }
0x3318   :  { %5188 = vtanh.f32 %v2698_v46  ;;  %v2790_v59 = vrot.slane %v2698_v46, 6  ;;  %v6178_v46 = vrot.slane %v6032_v58, %v324_v20 }
0x3322   :  { %v5189_v0 = vpop.eup %5188 }
0x3323   :  { %2701 = vrot.lane.b32.xlu0 %v5189_v0, %s5414_s4 }
0x3395   :  { %v2702_v52 = vpop.permute.xlu0 %2701 }
0x3396   :  { %v2704_v54 = vmul.f32 %v5187_v50, %v2702_v52  ;;  %v6182_v52 = vadd.f32 %v6106_v24, %v6178_v46 }
0x3398   :  { %v2706_v55 = vrot.slane %v2704_v54, 6 }
0x339a   :  { %2707 = vrot.lane.b32.xlu1 %v2706_v55, %s5415_s21 }
0x340c   :  { %v2708_v56 = vpop.permute.xlu1 %2707 }
0x340d   :  { %4605 = vmatmul.mubr.msk.f32.vlgmr.msra.gmra.mrb[20].mxu0 %vm415_vm11, %v2708_v56 }
0x340e   :  { %4929 = vmatpush3.bf16.msra.mxu0 %v5985_v28  ;;  %4626 = vmatprep.mubr.msk.f32.mxu0 %vm5413_vm5, %v5411_v16 }
0x340f   :  { %4930 = vmatprep.subr.bf16.mxu0 %v5412_v33 }
0x3412   :  { %4932 = vmatpush3.bf16.msra.mxu0 %v6006_v43 }
0x3413   :  { %4939 = vmatprep.subr.bf16.mxu0 %v5412_v33 }
0x34e0   :  { %v2777_v47 = vpop.f32.mrb[20].mxu0 }
0x34e1   :  { %v2781_v18 = vadd.f32 %v2777_v47, %v6134_v57  ;;  %v4606_v37 = vpop.f32.mrb[21].mxu0 }
0x34e3   :  { %5190 = vtanh.f32 %v2781_v18  ;;  %v4149_v51 = vmul.f32 -1.442695, %v2781_v18 }
0x34e5   :  { %5192 = vpow2.f32 %v4149_v51 }
0x34ed   :  { %v5191_v63 = vpop.eup %5190 }
0x34ee   :  { %2794 = vrot.lane.b32.xlu0 %v5191_v63, %s5414_s4 }
0x34ef   :  { %v5193_v30 = vpop.eup %5192 }
0x34f0   :  { %v2785_v2 = vadd.f32 1.0, %v5193_v30 }
0x34f2   :  { %5194 = vrcp.f32 %v2785_v2 }
0x34fc   :  { %v5195_v62 = vpop.eup %5194 }
0x34fd   :  { %v2792_v61 = vmul.f32 %v5195_v62, %v2790_v59 }
0x3560   :  { %v2795_v1 = vpop.permute.xlu0 %2794 }
0x3561   :  { %v2797_v60 = vmul.f32 %v5195_v62, %v2795_v1 }
0x3563   :  { %2799 = vrot.lane.b32.xlu1 %v2797_v60, %s5415_s21 }
0x35d5   :  { %v2800_v6 = vpop.permute.xlu1 %2799 }
0x35d6   :  { %v2802_v40 = vadd.f32 %v2800_v6, %v2792_v61 }
0x35d8   :  { %5196 = vtanh.f32 %v2802_v40 }
0x35e2   :  { %v5197_v9 = vpop.eup %5196 }
0x35e3   :  { %2805 = vrot.lane.b32.xlu0 %v5197_v9, %s5414_s4 }
0x3655   :  { %v2806_v10 = vpop.permute.xlu0 %2805 }
0x3656   :  { %v2808_v11 = vmul.f32 %v5195_v62, %v2806_v10 }
0x3658   :  { %2810 = vrot.lane.b32.xlu1 %v2808_v11, %s5415_s21 }
0x36ca   :  { %v2811_v12 = vpop.permute.xlu1 %2810 }
0x36cb   :  { %4616 = vmatmul.mubr.msk.f32.vlgmr.msra.gmra.mrb[30].mxu1 %vm415_vm11, %v2811_v12 }
0x36cc   :  { %4935 = vmatpush3.bf16.msra.mxu1 %v5985_v28  ;;  %4637 = vmatprep.mubr.msk.f32.mxu1 %vm5413_vm5, %v5411_v16 }
0x36cd   :  { %4936 = vmatprep.subr.bf16.mxu1 %v5412_v33 }
0x36d0   :  { %4938 = vmatpush3.bf16.msra.mxu1 %v6006_v43  ;;  %v2896_v43 = vrot.slane %v2802_v40, 6 }
0x36d1   :  { %4945 = vmatprep.subr.bf16.mxu1 %v5412_v33 }
0x379e   :  { %v2880_v14 = vpop.f32.mrb[30].mxu1 }
0x379f   :  { %v2885_v15 = vrot.slane %v2880_v14, 6  ;;  %v4617_v17 = vpop.f32.mrb[31].mxu1 }
0x37a1   :  { %v2887_v19 = vadd.f32 %v2885_v15, %v6134_v57 }
0x37a3   :  { %5198 = vtanh.f32 %v2887_v19  ;;  %v4151_v22 = vmul.f32 -1.442695, %v2887_v19 }
0x37a5   :  { %5200 = vpow2.f32 %v4151_v22 }
0x37ad   :  { %v5199_v7 = vpop.eup %5198 }
0x37ae   :  { %2900 = vrot.lane.b32.xlu0 %v5199_v7, %s5414_s4 }
0x37af   :  { %v5201_v28 = vpop.eup %5200 }
0x37b0   :  { %v2891_v29 = vadd.f32 1.0, %v5201_v28 }
0x37b2   :  { %5202 = vrcp.f32 %v2891_v29 }
0x37bc   :  { %v5203_v3 = vpop.eup %5202 }
0x37bd   :  { %v2898_v53 = vmul.f32 %v5203_v3, %v2896_v43 }
0x3820   :  { %v2901_v8 = vpop.permute.xlu0 %2900 }
0x3821   :  { %v2903_v23 = vmul.f32 %v5203_v3, %v2901_v8 }
0x3823   :  { %2905 = vrot.lane.b32.xlu1 %v2903_v23, %s5415_s21 }
0x3895   :  { %v2906_v26 = vpop.permute.xlu1 %2905 }
0x3896   :  { %v6151_v27 = vadd.f32 %v2906_v26, %v2898_v53 }
0x3898   :  { %5204 = vtanh.f32 %v6151_v27  ;;  %v3003_v59 = vrot.slane %v6151_v27, 6 }
0x38a2   :  { %v5205_v49 = vpop.eup %5204 }
0x38a3   :  { %2911 = vrot.lane.b32.xlu0 %v5205_v49, %s5414_s4 }
0x3915   :  { %v2912_v31 = vpop.permute.xlu0 %2911 }
0x3916   :  { %v2914_v32 = vmul.f32 %v5203_v3, %v2912_v31 }
0x3918   :  { %v2916_v34 = vrot.slane %v2914_v32, 2 }
0x391a   :  { %2917 = vrot.lane.b32.xlu1 %v2916_v34, %s5415_s21 }
0x398c   :  { %v2918_v50 = vpop.permute.xlu1 %2917 }
0x398d   :  { %4627 = vmatmul.mubr.msk.f32.vlgmr.msra.gmra.mrb[22].mxu0 %vm415_vm11, %v2918_v50 }
0x398e   :  { %4941 = vmatpush3.bf16.msra.mxu0 %v6156_v39  ;;  %4648 = vmatprep.mubr.msk.f32.mxu0 %vm5413_vm5, %v5411_v16 }
0x398f   :  { %4942 = vmatprep.subr.bf16.mxu0 %v5412_v33 }
0x3992   :  { %4944 = vmatpush3.bf16.msra.mxu0 %v6160_v4 }
0x3993   :  { %4951 = vmatprep.subr.bf16.mxu0 %v5412_v33 }
0x3995   :  { %4649 = vmatmul.mubr.f32.vlgmr.msra.gmra.mrb[24].mxu0 %v5411_v16 }
0x3996   :  { %4953 = vmatpush3.bf16.msra.mxu0 %v6156_v39  ;;  %4670 = vmatprep.mubr.msk.f32.mxu0 %vm5413_vm5, %v5411_v16 }
0x3997   :  { %4954 = vmatprep.subr.bf16.mxu0 %v5412_v33 }
0x399a   :  { %4956 = vmatpush3.bf16.msra.mxu0 %v6160_v4 }
0x399b   :  { %4963 = vmatprep.subr.bf16.mxu0 %v5412_v33 }
0x3a60   :  { %v2987_v44 = vpop.f32.mrb[22].mxu0 }
0x3a61   :  { %v2992_v35 = vrot.slane %v2987_v44, 4  ;;  %v4628_v45 = vpop.f32.mrb[23].mxu0 }
0x3a63   :  { %v2994_v25 = vadd.f32 %v2992_v35, %v6134_v57 }
0x3a65   :  { %5206 = vtanh.f32 %v2994_v25  ;;  %v4153_v41 = vmul.f32 -1.442695, %v2994_v25 }
0x3a68   :  { %v3193_v0 = vpop.f32.mrb[24].mxu0 }
0x3a69   :  { %v3198_v54 = vrot.slane %v3193_v0, 2  ;;  %v4650_v55 = vpop.f32.mrb[25].mxu0 }
0x3a6b   :  { %v3200_v56 = vadd.f32 %v3198_v54, %v6182_v52 }
0x3a6d   :  { %5208 = vtanh.f32 %v3200_v56  ;;  %v4156_v20 = vmul.f32 -1.442695, %v3200_v56 }
0x3a6e   :  { %5210 = vpow2.f32 %v4153_v41 }
0x3a6f   :  { %v5207_v47 = vpop.eup %5206  ;;  %5212 = vpow2.f32 %v4156_v20 }
0x3a70   :  { %3007 = vrot.lane.b32.xlu0 %v5207_v47, %s5414_s4 }
0x3a77   :  { %v5209_v18 = vpop.eup %5208 }
0x3a78   :  { %3210 = vrot.lane.b32.xlu1 %v5209_v18, %s5414_s4  ;;  %v5211_v58 = vpop.eup %5210 }
0x3a79   :  { %v2998_v37 = vadd.f32 1.0, %v5211_v58  ;;  %v5213_v24 = vpop.eup %5212 }
0x3a7a   :  { %v3204_v63 = vadd.f32 1.0, %v5213_v24 }
0x3a7b   :  { %5214 = vrcp.f32 %v2998_v37 }
0x3a7c   :  { %5216 = vrcp.f32 %v3204_v63 }
0x3a85   :  { %v5215_v51 = vpop.eup %5214 }
0x3a86   :  { %v5217_v62 = vpop.eup %5216  ;;  %v3005_v61 = vmul.f32 %v5215_v51, %v3003_v59 }
0x3a87   :  { %v3208_v9 = vmul.f32 0.0, %v5217_v62 }
0x3ae2   :  { %v3008_v30 = vpop.permute.xlu0 %3007 }
0x3ae3   :  { %v3010_v2 = vmul.f32 %v5215_v51, %v3008_v30 }
0x3ae5   :  { %3012 = vrot.lane.b32.xlu0 %v3010_v2, %s5415_s21 }
0x3aea   :  { %v3211_v1 = vpop.permute.xlu1 %3210 }
0x3aeb   :  { %v3213_v60 = vmul.f32 %v5217_v62, %v3211_v1 }
0x3aed   :  { %3215 = vrot.lane.b32.xlu1 %v3213_v60, %s5415_s21 }
0x3b57   :  { %v3013_v6 = vpop.permute.xlu0 %3012 }
0x3b58   :  { %v6190_v40 = vadd.f32 %v3013_v6, %v3005_v61 }
0x3b5a   :  { %5218 = vtanh.f32 %v6190_v40 }
0x3b5f   :  { %v3216_v10 = vpop.permute.xlu1 %3215 }
0x3b60   :  { %v3218_v11 = vadd.f32 %v3216_v10, %v3208_v9 }
0x3b62   :  { %5220 = vtanh.f32 %v3218_v11  ;;  %v3313_v13 = vrot.slane %v3218_v11, 2 }
0x3b64   :  { %v5219_v12 = vpop.eup %5218 }
0x3b65   :  { %3018 = vrot.lane.b32.xlu0 %v5219_v12, %s5414_s4 }
0x3b6c   :  { %v5221_v14 = vpop.eup %5220 }
0x3b6d   :  { %3221 = vrot.lane.b32.xlu1 %v5221_v14, %s5414_s4 }
0x3bd7   :  { %v3019_v15 = vpop.permute.xlu0 %3018 }
0x3bd8   :  { %v3021_v17 = vmul.f32 %v5215_v51, %v3019_v15 }
0x3bda   :  { %v3023_v19 = vrot.slane %v3021_v17, 4 }
0x3bdc   :  { %3024 = vrot.lane.b32.xlu0 %v3023_v19, %s5415_s21 }
0x3bdf   :  { %v3222_v7 = vpop.permute.xlu1 %3221 }
0x3be0   :  { %v3224_v22 = vmul.f32 %v5217_v62, %v3222_v7 }
0x3be2   :  { %v3226_v28 = vrot.slane %v3224_v22, 6 }
0x3be4   :  { %3227 = vrot.lane.b32.xlu1 %v3226_v28, %s5415_s21 }
0x3c4e   :  { %v3025_v29 = vpop.permute.xlu0 %3024 }
0x3c4f   :  { %4638 = vmatmul.mubr.msk.f32.vlgmr.msra.gmra.mrb[32].mxu1 %vm415_vm11, %v3025_v29 }
0x3c50   :  { %4947 = vmatpush3.bf16.msra.mxu1 %v6156_v39  ;;  %4659 = vmatprep.mubr.msk.f32.mxu1 %vm5413_vm5, %v5411_v16 }
0x3c51   :  { %4948 = vmatprep.subr.bf16.mxu1 %v5412_v33 }
0x3c54   :  { %4950 = vmatpush3.bf16.msra.mxu1 %v6160_v4 }
0x3c55   :  { %4957 = vmatprep.subr.bf16.mxu1 %v5412_v33 }
0x3c56   :  { %v3228_v3 = vpop.permute.xlu1 %3227 }
0x3c57   :  { %4660 = vmatmul.mubr.msk.f32.vlgmr.msra.gmra.mrb[34].mxu1 %vm415_vm11, %v3228_v3 }
0x3c58   :  { %4959 = vmatpush3.bf16.msra.mxu1 %v6156_v39  ;;  %4681 = vmatprep.mubr.msk.f32.mxu1 %vm5413_vm5, %v5411_v16 }
0x3c59   :  { %4960 = vmatprep.subr.bf16.mxu1 %v5412_v33 }
0x3c5c   :  { %4962 = vmatpush3.bf16.msra.mxu1 %v6160_v4 }
0x3c5d   :  { %4969 = vmatprep.subr.bf16.mxu1 %v5412_v33 }
0x3d22   :  { %v6211_v8 = vpop.f32.mrb[32].mxu1 }
0x3d23   :  { %v4639_v23 = vpop.f32.mrb[33].mxu1 }
0x3d2a   :  { %v3297_v43 = vpop.f32.mrb[34].mxu1 }
0x3d2b   :  { %v3302_v53 = vrot.slane %v3297_v43, 4  ;;  %v4661_v26 = vpop.f32.mrb[35].mxu1 }
0x3d2d   :  { %v3304_v27 = vadd.f32 %v3302_v53, %v6182_v52 }
0x3d2f   :  { %5222 = vtanh.f32 %v3304_v27  ;;  %v4158_v31 = vmul.f32 -1.442695, %v3304_v27 }
0x3d31   :  { %5224 = vpow2.f32 %v4158_v31 }
0x3d39   :  { %v5223_v49 = vpop.eup %5222 }
0x3d3a   :  { %3317 = vrot.lane.b32.xlu0 %v5223_v49, %s5414_s4 }
0x3d3b   :  { %v5225_v32 = vpop.eup %5224 }
0x3d3c   :  { %v3308_v34 = vadd.f32 1.0, %v5225_v32  ;;  %v6251_v32 = vadd.f32 %v6042_v48, %v6178_v46 }
0x3d3e   :  { %5226 = vrcp.f32 %v3308_v34 }
0x3d48   :  { %v5227_v36 = vpop.eup %5226 }
0x3d49   :  { %v3315_v50 = vmul.f32 %v5227_v36, %v3313_v13 }
0x3dac   :  { %v3318_v38 = vpop.permute.xlu0 %3317 }
0x3dad   :  { %v3320_v42 = vmul.f32 %v5227_v36, %v3318_v38 }
0x3daf   :  { %3322 = vrot.lane.b32.xlu1 %v3320_v42, %s5415_s21 }
0x3e21   :  { %v3323_v44 = vpop.permute.xlu1 %3322 }
0x3e22   :  { %v3325_v35 = vadd.f32 %v3323_v44, %v3315_v50 }
0x3e24   :  { %5228 = vtanh.f32 %v3325_v35  ;;  %v3420_v2 = vrot.slane %v3325_v35, 2 }
0x3e2e   :  { %v5229_v45 = vpop.eup %5228 }
0x3e2f   :  { %3328 = vrot.lane.b32.xlu0 %v5229_v45, %s5414_s4 }
0x3ea1   :  { %v3329_v25 = vpop.permute.xlu0 %3328 }
0x3ea2   :  { %v3331_v0 = vmul.f32 %v5227_v36, %v3329_v25 }
0x3ea4   :  { %v3333_v54 = vrot.slane %v3331_v0, 4 }
0x3ea6   :  { %3334 = vrot.lane.b32.xlu1 %v3333_v54, %s5415_s21 }
0x3f18   :  { %v3335_v55 = vpop.permute.xlu1 %3334 }
0x3f19   :  { %4671 = vmatmul.mubr.msk.f32.vlgmr.msra.gmra.mrb[26].mxu0 %vm415_vm11, %v3335_v55 }
0x3f1a   :  { %4965 = vmatpush3.bf16.msra.mxu0 %v6156_v39  ;;  %4692 = vmatprep.mubr.msk.f32.mxu0 %vm5413_vm5, %v5411_v16 }
0x3f1b   :  { %4966 = vmatprep.subr.bf16.mxu0 %v5412_v33 }
0x3f1e   :  { %4968 = vmatpush3.bf16.msra.mxu0 %v6160_v4 }
0x3f1f   :  { %4975 = vmatprep.subr.bf16.mxu0 %v5412_v33 }
0x3fec   :  { %v3404_v56 = vpop.f32.mrb[26].mxu0 }
0x3fed   :  { %v3409_v47 = vrot.slane %v3404_v56, 6  ;;  %v4672_v18 = vpop.f32.mrb[27].mxu0 }
0x3fef   :  { %v3411_v41 = vadd.f32 %v3409_v47, %v6182_v52 }
0x3ff1   :  { %5230 = vtanh.f32 %v3411_v41  ;;  %v4160_v58 = vmul.f32 -1.442695, %v3411_v41 }
0x3ff3   :  { %5232 = vpow2.f32 %v4160_v58 }
0x3ffb   :  { %v5231_v20 = vpop.eup %5230 }
0x3ffc   :  { %3424 = vrot.lane.b32.xlu0 %v5231_v20, %s5414_s4 }
0x3ffd   :  { %v5233_v37 = vpop.eup %5232 }
0x3ffe   :  { %v3415_v24 = vadd.f32 1.0, %v5233_v37 }
0x4000   :  { %5234 = vrcp.f32 %v3415_v24 }
0x400a   :  { %v5235_v63 = vpop.eup %5234 }
0x400b   :  { %v3422_v62 = vmul.f32 %v5235_v63, %v3420_v2 }
0x406e   :  { %v3425_v51 = vpop.permute.xlu0 %3424 }
0x406f   :  { %v3427_v30 = vmul.f32 %v5235_v63, %v3425_v51 }
0x4071   :  { %3429 = vrot.lane.b32.xlu1 %v3427_v30, %s5415_s21 }
0x40e3   :  { %v3430_v1 = vpop.permute.xlu1 %3429 }
0x40e4   :  { %v3432_v60 = vadd.f32 %v3430_v1, %v3422_v62 }
0x40e6   :  { %5236 = vtanh.f32 %v3432_v60  ;;  %v3524_v3 = vrot.slane %v3432_v60, 2 }
0x40f0   :  { %v5237_v59 = vpop.eup %5236 }
0x40f1   :  { %3435 = vrot.lane.b32.xlu0 %v5237_v59, %s5414_s4 }
0x4163   :  { %v3436_v61 = vpop.permute.xlu0 %3435 }
0x4164   :  { %v3438_v6 = vmul.f32 %v5235_v63, %v3436_v61 }
0x4166   :  { %v3440_v9 = vrot.slane %v3438_v6, 2 }
0x4168   :  { %3441 = vrot.lane.b32.xlu1 %v3440_v9, %s5415_s21 }
0x41da   :  { %v3442_v10 = vpop.permute.xlu1 %3441 }
0x41db   :  { %4682 = vmatmul.mubr.msk.f32.vlgmr.msra.gmra.mrb[36].mxu1 %vm415_vm11, %v3442_v10 }
0x41dc   :  { %4971 = vmatpush3.bf16.msra.mxu1 %v6156_v39  ;;  %4703 = vmatprep.mubr.msk.f32.mxu1 %vm5413_vm5, %v5411_v16 }
0x41dd   :  { %4972 = vmatprep.subr.bf16.mxu1 %v5412_v33 }
0x41e0   :  { %4974 = vmatpush3.bf16.msra.mxu1 %v6160_v4 }
0x41e1   :  { %4981 = vmatprep.subr.bf16.mxu1 %v5412_v33 }
0x42ae   :  { %v3511_v11 = vpop.f32.mrb[36].mxu1 }
0x42af   :  { %v3515_v12 = vadd.f32 %v3511_v11, %v6182_v52  ;;  %v4683_v14 = vpop.f32.mrb[37].mxu1 }
0x42b1   :  { %5238 = vtanh.f32 %v3515_v12  ;;  %v4162_v17 = vmul.f32 -1.442695, %v3515_v12 }
0x42b3   :  { %5240 = vpow2.f32 %v4162_v17 }
0x42bb   :  { %v5239_v15 = vpop.eup %5238 }
0x42bc   :  { %3528 = vrot.lane.b32.xlu0 %v5239_v15, %s5414_s4 }
0x42bd   :  { %v5241_v19 = vpop.eup %5240 }
0x42be   :  { %v3519_v7 = vadd.f32 1.0, %v5241_v19 }
0x42c0   :  { %5242 = vrcp.f32 %v3519_v7 }
0x42ca   :  { %v5243_v22 = vpop.eup %5242 }
0x42cb   :  { %v3526_v23 = vmul.f32 %v5243_v22, %v3524_v3 }
0x432e   :  { %v3529_v28 = vpop.permute.xlu0 %3528 }
0x432f   :  { %v3531_v29 = vmul.f32 %v5243_v22, %v3529_v28 }
0x4331   :  { %3533 = vrot.lane.b32.xlu1 %v3531_v29, %s5415_s21 }
0x43a3   :  { %v3534_v43 = vpop.permute.xlu1 %3533 }
0x43a4   :  { %v3536_v53 = vadd.f32 %v3534_v43, %v3526_v23 }
0x43a6   :  { %5244 = vtanh.f32 %v3536_v53  ;;  %v3630_v48 = vrot.slane %v3536_v53, 2 }
0x43b0   :  { %v5245_v52 = vpop.eup %5244 }
0x43b1   :  { %3539 = vrot.lane.b32.xlu0 %v5245_v52, %s5414_s4 }
0x4423   :  { %v3540_v26 = vpop.permute.xlu0 %3539 }
0x4424   :  { %v3542_v27 = vmul.f32 %v5243_v22, %v3540_v26 }
0x4426   :  { %3544 = vrot.lane.b32.xlu1 %v3542_v27, %s5415_s21 }
0x4498   :  { %v3545_v49 = vpop.permute.xlu1 %3544 }
0x4499   :  { %4693 = vmatmul.mubr.msk.f32.vlgmr.msra.gmra.mrb[28].mxu0 %vm415_vm11, %v3545_v49  ;;  %v3099_v49 = vrot.slane %v6211_v8, 2 }
0x449a   :  { %4977 = vmatpush3.bf16.msra.mxu0 %v6156_v39  ;;  %4714 = vmatprep.mubr.msk.f32.mxu0 %vm5413_vm5, %v5411_v16 }
0x449b   :  { %4978 = vmatprep.subr.bf16.mxu0 %v5412_v33 }
0x449e   :  { %4980 = vmatpush3.bf16.msra.mxu0 %v6160_v4 }
0x449f   :  { %4987 = vmatprep.subr.bf16.mxu0 %v5412_v33 }
0x456c   :  { %v3614_v31 = vpop.f32.mrb[28].mxu0 }
0x456d   :  { %v3619_v34 = vrot.slane %v3614_v31, 2  ;;  %v4694_v36 = vpop.f32.mrb[29].mxu0  ;;  %v3101_v31 = vadd.f32 %v3099_v49, %v6134_v57 }
0x456f   :  { %v3621_v38 = vadd.f32 %v3619_v34, %v6251_v32 }
0x4571   :  { %5246 = vtanh.f32 %v3621_v38  ;;  %v4164_v13 = vmul.f32 -1.442695, %v3621_v38 }
0x4573   :  { %5248 = vpow2.f32 %v4164_v13  ;;  %v4155_v13 = vmul.f32 -1.442695, %v3101_v31 }
0x457b   :  { %v5247_v42 = vpop.eup %5246 }
0x457c   :  { %3634 = vrot.lane.b32.xlu0 %v5247_v42, %s5414_s4 }
0x457d   :  { %v5249_v50 = vpop.eup %5248 }
0x457e   :  { %v3625_v44 = vadd.f32 1.0, %v5249_v50 }
0x4580   :  { %5250 = vrcp.f32 %v3625_v44 }
0x458a   :  { %v5251_v35 = vpop.eup %5250 }
0x458b   :  { %v3632_v46 = vmul.f32 %v5251_v35, %v3630_v48 }
0x45ee   :  { %v3635_v45 = vpop.permute.xlu0 %3634 }
0x45ef   :  { %v3637_v25 = vmul.f32 %v5251_v35, %v3635_v45 }
0x45f1   :  { %3639 = vrot.lane.b32.xlu1 %v3637_v25, %s5415_s21  ;;  %v3110_v25 = vrot.slane %v6190_v40, 6  ;;  %v3981_v40 = vld [vmem:[%s6373_s10] sm:$0xff] }
0x4663   :  { %v3640_v0 = vpop.permute.xlu1 %3639 }
0x4664   :  { %v3642_v54 = vadd.f32 %v3640_v0, %v3632_v46 }
0x4666   :  { %5252 = vtanh.f32 %v3642_v54 }
0x4670   :  { %v5253_v55 = vpop.eup %5252 }
0x4671   :  { %3645 = vrot.lane.b32.xlu0 %v5253_v55, %s5414_s4 }
0x46e3   :  { %v3646_v56 = vpop.permute.xlu0 %3645 }
0x46e4   :  { %v3648_v47 = vmul.f32 %v5251_v35, %v3646_v56 }
0x46e6   :  { %v3650_v18 = vrot.slane %v3648_v47, 6 }
0x46e8   :  { %3651 = vrot.lane.b32.xlu1 %v3650_v18, %s5415_s21 }
0x475a   :  { %v3652_v41 = vpop.permute.xlu1 %3651 }
0x475b   :  { %4704 = vmatmul.mubr.msk.f32.vlgmr.msra.gmra.mrb[38].mxu1 %vm415_vm11, %v3652_v41 }
0x475c   :  { %4983 = vmatpush3.bf16.msra.mxu1 %v6156_v39  ;;  %4725 = vmatprep.mubr.msk.f32.mxu1 %vm5413_vm5, %v5411_v16 }
0x475d   :  { %4984 = vmatprep.subr.bf16.mxu1 %v5412_v33 }
0x4760   :  { %4986 = vmatpush3.bf16.msra.mxu1 %v6160_v4  ;;  %v3737_v4 = vrot.slane %v3642_v54, 2 }
0x482e   :  { %v3721_v20 = vpop.f32.mrb[38].mxu1 }
0x482f   :  { %v3726_v58 = vrot.slane %v3721_v20, 4  ;;  %v4705_v37 = vpop.f32.mrb[39].mxu1 }
0x4831   :  { %v3728_v24 = vadd.f32 %v3726_v58, %v6251_v32  ;;  %v3982_v58 = vld [vmem:[%s6373_s10 + $0x8] sm:$0xff] }
0x4832   :  { %v4988_v37 = vpack.c.bf16 %v3982_v58, %v3981_v40 }
0x4833   :  { %5254 = vtanh.f32 %v3728_v24  ;;  %v4166_v51 = vmul.f32 -1.442695, %v3728_v24  ;;  %v3984_v24 = vld [vmem:[%s6373_s10 + $0x18] sm:$0xff] }
0x4835   :  { %5256 = vpow2.f32 %v4166_v51  ;;  %v3985_v51 = vld [vmem:[%s6373_s10 + $0x20] sm:$0xff] }
0x483d   :  { %v5255_v63 = vpop.eup %5254 }
0x483e   :  { %3741 = vrot.lane.b32.xlu0 %v5255_v63, %s5414_s4 }
0x483f   :  { %v5257_v30 = vpop.eup %5256 }
0x4840   :  { %v3732_v39 = vadd.f32 1.0, %v5257_v30  ;;  %v3986_v30 = vld [vmem:[%s6373_s10 + $0x28] sm:$0xff] }
0x4842   :  { %5258 = vrcp.f32 %v3732_v39 }
0x484c   :  { %v5259_v2 = vpop.eup %5258 }
0x484d   :  { %v3739_v60 = vmul.f32 %v5259_v2, %v3737_v4  ;;  %v3987_v4 = vld [vmem:[%s6373_s10 + $0x30] sm:$0xff] }
0x48b0   :  { %v3742_v62 = vpop.permute.xlu0 %3741 }
0x48b1   :  { %v3744_v1 = vmul.f32 %v5259_v2, %v3742_v62 }
0x48b3   :  { %3746 = vrot.lane.b32.xlu1 %v3744_v1, %s5415_s21  ;;  %v4994_v1 = vpack.c.bf16 %v3986_v30, %v3985_v51 }
0x4925   :  { %v3747_v59 = vpop.permute.xlu1 %3746 }
0x4926   :  { %v3749_v61 = vadd.f32 %v3747_v59, %v3739_v60  ;;  %v3988_v60 = vld [vmem:[%s6373_s10 + $0x38] sm:$0xff] }
0x4927   :  { %v4997_v59 = vpack.c.bf16 %v3988_v60, %v3987_v4 }
0x4928   :  { %5260 = vtanh.f32 %v3749_v61 }
0x4932   :  { %v5261_v6 = vpop.eup %5260 }
0x4933   :  { %3752 = vrot.lane.b32.xlu0 %v5261_v6, %s5414_s4  ;;  %v3990_v6 = vld [vmem:[%s6373_s10 + $0x48] sm:$0xff] }
0x49a5   :  { %v3753_v9 = vpop.permute.xlu0 %3752 }
0x49a6   :  { %v3755_v10 = vmul.f32 %v5259_v2, %v3753_v9 }
0x49a8   :  { %v3757_v11 = vrot.slane %v3755_v10, 4  ;;  %v3991_v10 = vld [vmem:[%s6373_s10 + $0x50] sm:$0xff] }
0x49aa   :  { %3758 = vrot.lane.b32.xlu1 %v3757_v11, %s5415_s21  ;;  %v3992_v11 = vld [vmem:[%s6373_s10 + $0x58] sm:$0xff] }
0x4a1c   :  { %v3759_v12 = vpop.permute.xlu1 %3758 }
0x4a1d   :  { %4715 = vmatmul.mubr.msk.f32.vlgmr.msra.gmra.mrb[30].mxu0 %vm415_vm11, %v3759_v12  ;;  %v5003_v12 = vpack.c.bf16 %v3992_v11, %v3991_v10 }
0x4a1e   :  { %4760 = vmatprep.mubr.msk.f32.mxu0 %vm5413_vm5, %v5411_v16  ;;  %v3844_v16 = vrot.slane %v3749_v61, 2  ;;  %4989 = vmatpush3.bf16.msra.mxu0 %v4988_v37  ;;  %v3989_v61 = vld [vmem:[%s6373_s10 + $0x40] sm:$0xff]  ;;  %vm4083_vm5 = vcmask 41984  }
0x4a1f   :  { %4990 = vmatprep.subr.bf16.mxu0 %v5412_v33  ;;  %v5000_v9 = vpack.c.bf16 %v3990_v6, %v3989_v61 }
0x4af0   :  { %v3828_v14 = vpop.f32.mrb[30].mxu0 }
0x4af1   :  { %v3833_v15 = vrot.slane %v3828_v14, 6  ;;  %v4716_v17 = vpop.f32.mrb[31].mxu0  ;;  %v3994_v14 = vld [vmem:[%s6373_s10 + $0x68] sm:$0xff] }
0x4af2   :  { %v3995_v17 = vld [vmem:[%s6373_s10 + $0x70] sm:$0xff] }
0x4af3   :  { %v3835_v19 = vadd.f32 %v3833_v15, %v6251_v32 }
0x4af5   :  { %5262 = vtanh.f32 %v3835_v19  ;;  %v4168_v22 = vmul.f32 -1.442695, %v3835_v19  ;;  %v3996_v19 = vld [vmem:[%s6373_s10 + $0x78] sm:$0xff] }
0x4af7   :  { %5264 = vpow2.f32 %v4168_v22 }
0x4aff   :  { %v5263_v7 = vpop.eup %5262 }
0x4b00   :  { %3848 = vrot.lane.b32.xlu0 %v5263_v7, %s5414_s4  ;;  %v5009_v7 = vpack.c.bf16 %v3996_v19, %v3995_v17 }
0x4b01   :  { %v5265_v28 = vpop.eup %5264 }
0x4b02   :  { %v3839_v29 = vadd.f32 1.0, %v5265_v28 }
0x4b04   :  { %5266 = vrcp.f32 %v3839_v29 }
0x4b0e   :  { %v5267_v3 = vpop.eup %5266 }
0x4b0f   :  { %v3846_v53 = vmul.f32 %v5267_v3, %v3844_v16 }
0x4b72   :  { %v3849_v23 = vpop.permute.xlu0 %3848 }
0x4b73   :  { %v3851_v43 = vmul.f32 %v5267_v3, %v3849_v23 }
0x4b75   :  { %3853 = vrot.lane.b32.xlu1 %v3851_v43, %s5415_s21 }
0x4be7   :  { %v3854_v52 = vpop.permute.xlu1 %3853 }
0x4be8   :  { %v6275_v26 = vadd.f32 %v3854_v52, %v3846_v53 }
0x4bea   :  { %5268 = vtanh.f32 %v6275_v26  ;;  %v3948_v22 = vrot.slane %v6275_v26, 2  ;;  %v4171_v26 = vld [vmem:[#allocation9] ss:$0 sm:$0xff] }
0x4beb   :  { %5270 = vtanh.f32 %v3101_v31 }
0x4bec   :  { %5272 = vpow2.f32 %v4155_v13 }
0x4bf4   :  { %v5269_v27 = vpop.eup %5268 }
0x4bf5   :  { %3859 = vrot.lane.b32.xlu0 %v5269_v27, %s5414_s4  ;;  %v5271_v42 = vpop.eup %5270 }
0x4bf6   :  { %v5273_v50 = vpop.eup %5272 }
0x4bf7   :  { %v3105_v44 = vadd.f32 1.0, %v5273_v50 }
0x4bf9   :  { %5274 = vrcp.f32 %v3105_v44 }
0x4c03   :  { %v5275_v8 = vpop.eup %5274 }
0x4c04   :  { %v3112_v48 = vmul.f32 %v5275_v8, %v3110_v25 }
0x4c67   :  { %v3860_v34 = vpop.permute.xlu0 %3859 }
0x4c68   :  { %v3862_v36 = vmul.f32 %v5267_v3, %v3860_v34 }
0x4c6a   :  { %v3864_v38 = vrot.slane %v3862_v36, 2 }
0x4c6c   :  { %3865 = vrot.lane.b32.xlu1 %v3864_v38, %s5415_s21 }
0x4c70   :  { %3114 = vrot.lane.b32.xlu1 %v5271_v42, %s5414_s4 }
0x4cde   :  { %v3866_v35 = vpop.permute.xlu1 %3865 }
0x4cdf   :  { %4726 = vmatmul.mubr.msk.f32.vlgmr.msra.gmra.mrb[40].mxu1 %vm415_vm11, %v3866_v35 }
0x4ce2   :  { %v3115_v45 = vpop.permute.xlu1 %3114 }
0x4ce3   :  { %v3117_v57 = vmul.f32 %v5275_v8, %v3115_v45 }
0x4ce5   :  { %3119 = vrot.lane.b32.xlu1 %v3117_v57, %s5415_s21 }
0x4d57   :  { %v3120_v46 = vpop.permute.xlu1 %3119 }
0x4d58   :  { %v3122_v0 = vadd.f32 %v3120_v46, %v3112_v48 }
0x4d5a   :  { %3969 = vrot.lane.b32.xlu1 %v3122_v0, %s5415_s21 }
0x4db2   :  { %v3935_v54 = vpop.f32.mrb[40].mxu1 }
0x4db3   :  { %v3939_v55 = vadd.f32 %v3935_v54, %v6251_v32  ;;  %v4727_v56 = vpop.f32.mrb[41].mxu1  ;;  %v3983_v32 = vld [vmem:[%s6373_s10 + $0x10] sm:$0xff] }
0x4db4   :  { %v4991_v63 = vpack.c.bf16 %v3984_v24, %v3983_v32 }
0x4db5   :  { %5276 = vtanh.f32 %v3939_v55  ;;  %v4170_v18 = vmul.f32 -1.442695, %v3939_v55 }
0x4db6   :  { %4992 = vmatpush3.bf16.msra.mxu0 %v4991_v63 }
0x4db7   :  { %5278 = vpow2.f32 %v4170_v18  ;;  %4993 = vmatprep.subr.bf16.mxu0 %v5412_v33 }
0x4dba   :  { %4995 = vmatpush3.bf16.msra.mxu0 %v4994_v1 }
0x4dbb   :  { %4996 = vmatprep.subr.bf16.mxu0 %v5412_v33 }
0x4dbe   :  { %4998 = vmatpush3.bf16.msra.mxu0 %v4997_v59 }
0x4dbf   :  { %v5277_v47 = vpop.eup %5276  ;;  %4999 = vmatprep.subr.bf16.mxu0 %v5412_v33 }
0x4dc0   :  { %3952 = vrot.lane.b32.xlu0 %v5277_v47, %s5414_s4 }
0x4dc1   :  { %v5279_v41 = vpop.eup %5278 }
0x4dc2   :  { %v3943_v20 = vadd.f32 1.0, %v5279_v41  ;;  %5001 = vmatpush3.bf16.msra.mxu0 %v5000_v9 }
0x4dc3   :  { %5002 = vmatprep.subr.bf16.mxu0 %v5412_v33 }
0x4dc4   :  { %5280 = vrcp.f32 %v3943_v20 }
0x4dc6   :  { %5004 = vmatpush3.bf16.msra.mxu0 %v5003_v12 }
0x4dc7   :  { %5005 = vmatprep.subr.bf16.mxu0 %v5412_v33 }
0x4dcc   :  { %v3970_v53 = vpop.permute.xlu1 %3969 }
0x4dce   :  { %v5281_v39 = vpop.eup %5280 }
0x4dcf   :  { %v3950_v28 = vmul.f32 %v5281_v39, %v3948_v22 }
0x4e32   :  { %v3953_v2 = vpop.permute.xlu0 %3952 }
0x4e33   :  { %v3955_v62 = vmul.f32 %v5281_v39, %v3953_v2 }
0x4e35   :  { %3957 = vrot.lane.b32.xlu0 %v3955_v62, %s5415_s21 }
0x4e39   :  { %3962 = vrot.lane.b32.xlu0 %v6062_v5, %s5416_s16  ;;  %v3993_v5 = vld [vmem:[%s6373_s10 + $0x60] sm:$0xff]  ;;  %s5417_s10 = smov [#allocation11]  }
0x4e3a   :  { %v5006_v15 = vpack.c.bf16 %v3994_v14, %v3993_v5 }
0x4e3c   :  { %5007 = vmatpush3.bf16.msra.mxu0 %v5006_v15 }
0x4e3d   :  { %5008 = vmatprep.subr.bf16.mxu0 %v5412_v33  ;;  %v3966_v33 = vrot.slane %v5932_v21, 2 }
0x4e40   :  { %5010 = vmatpush3.bf16.msra.mxu0 %v5009_v7 }
0x4ea7   :  { %v3958_v29 = vpop.permute.xlu0 %3957 }
0x4ea8   :  { %v3960_v3 = vadd.f32 %v3958_v29, %v3950_v28 }
0x4eaa   :  { %v3973_v23 = vrot.slane %v3960_v3, 2 }
0x4eab   :  { %v3963_v43 = vpop.permute.xlu0 %3962 }
0x4eac   :  { %3974 = vrot.lane.b32.xlu0 %v3973_v23, %s5414_s4  ;;  %v3977_v16 = vsel %vm415_vm11, %v3963_v43, %v3966_v33  ;;  %s4091_s4 = sshll.u32 %s5417_s10, 4  ;;  %s4092_s4 = int_to_ptr.vmem [resolvable:$true] %s4091_s4 }
0x4ead   :  { %v3978_v52 = vsel %vm2202_vm3, %v3977_v16, %v3970_v53  ;;  %s5374_s25 = scalar_lea.vmem %s4092_s4, 32  ;;  %p5379_p5 = scmp.lt.s32.totalorder %s4092_s4, %s4092_s4 }
0x4eae   :  { %p5375_p4 = scmp.ne.s32.totalorder %s4092_s4, %s5374_s25  ;;  %p5380_p6 = scmp.lt.s32.totalorder %s5374_s25, %s5374_s25 }
0x4eb0   :  { %p5381_p7 = por %p5380_p6, %p5379_p5 }
0x4eb2   :  { %p5382_p8 = pnand %p5381_p7, %p5375_p4 }
0x4f1e   :  { %v3975_v27 = vpop.permute.xlu0 %3974 }
0x4f1f   :  { %v3980_v49 = vsel %vm3979_vm4, %v3978_v52, %v3975_v27 }
0x4f20   :  { %v4005_v31 = vrot.slane %v3980_v49, 6 }
0x4f22   :  { %4761 = vmatmul.mubr.f32.vlgmr.msra.gmra.mrb[32].mxu0 %v4005_v31 }
0x4ff5   :  { %v4073_v34 = vpop.f32.mrb[32].mxu0 }
0x4ff6   :  { %v4074_v36 = vadd.f32 %v4171_v26, %v4073_v34  ;;  %v4762_v38 = vpop.f32.mrb[33].mxu0 }
0x4ff8   :  { %v4172_v42 = vmul.f32 -1.442695, %v4074_v36 }
0x4ffa   :  { %5282 = vpow2.f32 %v4172_v42 }
0x5004   :  { %v5283_v13 = vpop.eup %5282 }
0x5005   :  { %v4080_v50 = vadd.f32 1.0, %v5283_v13 }
0x5007   :  { %5284 = vrcp.f32 %v4080_v50 }
0x5011   :  { %v5285_v21 = vpop.eup %5284 }
0x5012   :  { %4084 = vst.msk [vmem:[#allocation11] sm:$0x3] %vm4083_vm5, %v5285_v21 }
0x5013   :  { %5385 = shalt.err (!%p5382_p8)
}
0x5014   :  { %s5386_s22 = scalar_lea.hbm %s6375_s12, 32 }
0x5015   :  { %p5387_p9 = scmp.ne.s32.totalorder %s6375_s12, %s5386_s22  ;;  %p5390_p10 = scmp.lt.u32.totalorder %s5386_s22, %s6375_s12 }
0x5017   :  { %p5392_p11 = pnand %p5390_p10, %p5387_p9 }
0x5019   :  { %5395 = shalt.err (!%p5392_p11)
}
0x501a   :  { %4094 = dma.vmem_to_hbm [thread:$0]  %s4092_s4, 32, %s6375_s12, [#allocation5]  }
0x501b   :  { %5402 = dma.done.wait [#allocation5], 32  }
0x501c   :  { %5403 = vsyncadd [#allocation5], 4294967264 }
0x501d   :  { %4098 = vsyncpa [#allocation4], 1 }
0x501e   :  { %4099 = vsyncpa [#allocation7], 1 }
0x501f   :  { %4100 = vsyncpa [#allocation10], 1 }
0x5020   :  { %4101 = vsyncpa [#allocation5], 1 }

</bundles_post_ra>
